<compile_context>
chip_gen: v6e
topology: v6e:2x2x1
jax: 0.10.0
libtpu: 0.0.40
codegen_flags: <defaults>
</compile_context>

<pallas_src>
import functools

import jax
import jax.numpy as jnp
import numpy as np
from jax.experimental import pallas as pl
from jax.experimental.pallas import tpu as pltpu


def _round_up(x, m):
    return ((x + m - 1) // m) * m


# ------------------------------ Pallas kernel ------------------------------- #

def _encoder_kernel(x_ref, w1_ref, b1_ref, w2_ref, b2_ref, w3_ref, b3_ref,
                    w4_ref, b4_ref, o_ref, z1_ref, p1_ref, z2_ref, h2_ref):
    bt = x_ref.shape[0]
    kx = x_ref.shape[2]                                   # 28 * C

    # ---------------- conv1 (5x5, C -> 10): 5 banded MXU matmuls ---------------- #
    acc1 = None
    for di in range(5):
        lhs = x_ref[:, pl.ds(di, 24), :].reshape(bt * 24, kx).astype(jnp.bfloat16)
        part = jnp.dot(lhs, w1_ref[di], preferred_element_type=jnp.float32)
        acc1 = part if acc1 is None else acc1 + part      # [bt*24, 256]

    # 2x2 max-pool: column (oj) pairs live in the two 128-aligned lane blocks...
    z1_ref[...] = jnp.maximum(acc1[:, 0:120], acc1[:, 128:248]).reshape(bt, 24, 120)
    # ...row (oi) pairs via stride-2 sublane reads; then bias (+b commutes with max) + ReLU.
    p1 = jnp.maximum(z1_ref[:, pl.ds(0, 12, stride=2), :],
                     z1_ref[:, pl.ds(1, 12, stride=2), :])
    p1_ref[...] = jnp.maximum(p1 + b1_ref[...][:, :120], 0.0)        # [bt, 12, 120]

    # ---------------- conv2 (5x5, 10 -> 20); Dropout2d = identity in eval ------- #
    acc2 = None
    for di in range(5):
        lhs = p1_ref[:, pl.ds(di, 8), :].reshape(bt * 8, 120).astype(jnp.bfloat16)
        part = jnp.dot(lhs, w2_ref[di], preferred_element_type=jnp.float32)
        acc2 = part if acc2 is None else acc2 + part      # [bt*8, 256]

    z2_ref[...] = jnp.maximum(acc2[:, 0:80], acc2[:, 128:208]).reshape(bt, 8, 80)
    h2 = jnp.maximum(z2_ref[:, pl.ds(0, 4, stride=2), :],
                     z2_ref[:, pl.ds(1, 4, stride=2), :])
    h2_ref[...] = jnp.maximum(h2 + b2_ref[...][:, :80], 0.0)         # [bt, 4, 80]

    # ---------------- fc1 (320 -> 256): 4 accumulated dots == free flatten ------ #
    y = None
    for p in range(4):
        lhs = h2_ref[:, p, :].astype(jnp.bfloat16)                   # [bt, 80]
        part = jnp.dot(lhs, w3_ref[p], preferred_element_type=jnp.float32)
        y = part if y is None else y + part
    y = jnp.maximum(y + b3_ref[...], 0.0)                            # fc1 + ReLU
    # F.dropout(x, training=False) is identity.
    y = jnp.dot(y.astype(jnp.bfloat16), w4_ref[...],
                preferred_element_type=jnp.float32) + b4_ref[...]    # fc2 (padded to 128 lanes)
    o_ref[...] = y.astype(o_ref.dtype)


# --------------------------- one-time weight prep ---------------------------- #

def prepare_params(params):
    """Host-side, call ONCE at init: banded conv weights + permuted/padded fc weights."""
    c1 = np.asarray(params['conv1_w'], np.float32)          # [10, C, 5, 5]
    c2 = np.asarray(params['conv2_w'], np.float32)          # [20, 10, 5, 5]
    C = c1.shape[1]
    h_dim = int(np.asarray(params['fc2_w']).shape[0])

    # conv1 banded: w1[di, wj*C + c, par*128 + q*10 + co] = c1[co, c, di, wj - (2q+par)]
    w1 = np.zeros((5, 28 * C, 256), np.float32)
    for di in range(5):
        for q in range(12):
            for par in range(2):
                oj = 2 * q + par
                col = par * 128 + q * 10
                for dj in range(5):
                    wj = oj + dj
                    w1[di, wj * C:(wj + 1) * C, col:col + 10] = c1[:, :, di, dj].T
    # conv2 banded: w2[di, wj*10 + c, par*128 + q*20 + co]
    w2 = np.zeros((5, 120, 256), np.float32)
    for di in range(5):
        for q in range(4):
            for par in range(2):
                oj = 2 * q + par
                col = par * 128 + q * 20
                for dj in range(5):
                    wj = oj + dj
                    w2[di, wj * 10:(wj + 1) * 10, col:col + 20] = c2[:, :, di, dj].T

    # fc1: permute PyTorch's (c,h,w) flatten to the kernel's (h,w,c) order, split into
    # one 80x256 block per pooled output row.
    fc1 = np.asarray(params['fc1_w'], np.float32)            # [256, 320]
    w3 = np.transpose(fc1.reshape(256, 20, 4, 4), (2, 3, 1, 0)).reshape(4, 80, 256)

    # fc2: transpose + zero-pad the output dim to a lane-dense multiple of 128.
    fc2 = np.asarray(params['fc2_w'], np.float32)             # [h_dim, 256]
    n_out = max(_round_up(h_dim, 128), 128)
    w4 = np.zeros((256, n_out), np.float32); w4[:, :h_dim] = fc2.T
    b4 = np.zeros((1, n_out), np.float32); b4[0, :h_dim] = np.asarray(params['fc2_b'])

    b1 = np.zeros((1, 128), np.float32); b1[0, :120] = np.tile(np.asarray(params['conv1_b']), 12)
    b2 = np.zeros((1, 128), np.float32); b2[0, :80] = np.tile(np.asarray(params['conv2_b']), 4)
    b3 = np.asarray(params['fc1_b'], np.float32).reshape(1, 256)

    kw = {
        'w1': jnp.asarray(w1, jnp.bfloat16), 'b1': jnp.asarray(b1),
        'w2': jnp.asarray(w2, jnp.bfloat16), 'b2': jnp.asarray(b2),
        'w3': jnp.asarray(w3, jnp.bfloat16), 'b3': jnp.asarray(b3),
        'w4': jnp.asarray(w4, jnp.bfloat16), 'b4': jnp.asarray(b4),
    }
    return kw, h_dim


# ------------------------------- JAX wrapper --------------------------------- #

@functools.partial(jax.jit, static_argnames=("h_dim", "bt"))
def _forward(x_nchw, kw, h_dim, bt):
    B, C, H, W = x_nchw.shape
    assert H == 28 and W == 28, "CIFAR_encoder requires 28x28 inputs (fc1 expects 320 features)"
    # Lane-dense staging: fuse W and C into the minormost dim -> [B, 28, 28*C].
    x = jnp.transpose(x_nchw, (0, 2, 3, 1)).reshape(B, H, W * C).astype(jnp.float32)
    b_pad = _round_up(B, bt)
    if b_pad != B:                                    # only the remainder rows get padded
        x = jnp.pad(x, ((0, b_pad - B), (0, 0), (0, 0)))
    n_out = kw['w4'].shape[1]

    out = pl.pallas_call(
        _encoder_kernel,
        out_shape=jax.ShapeDtypeStruct((b_pad, n_out), jnp.float32),
        grid=(b_pad // bt,),
        in_specs=[
            pl.BlockSpec((bt, H, W * C), lambda i: (i, 0, 0)),
            pl.BlockSpec(kw['w1'].shape, lambda i: (0, 0, 0)),
            pl.BlockSpec(kw['b1'].shape, lambda i: (0, 0)),
            pl.BlockSpec(kw['w2'].shape, lambda i: (0, 0, 0)),
            pl.BlockSpec(kw['b2'].shape, lambda i: (0, 0)),
            pl.BlockSpec(kw['w3'].shape, lambda i: (0, 0, 0)),
            pl.BlockSpec(kw['b3'].shape, lambda i: (0, 0)),
            pl.BlockSpec(kw['w4'].shape, lambda i: (0, 0)),
            pl.BlockSpec(kw['b4'].shape, lambda i: (0, 0)),
        ],
        out_specs=pl.BlockSpec((bt, n_out), lambda i: (i, 0)),
        scratch_shapes=[
            pltpu.VMEM((bt, 24, 120), jnp.float32),   # conv1, column-pooled (pre row-pool)
            pltpu.VMEM((bt, 12, 120), jnp.float32),   # pool1 output = conv2 input
            pltpu.VMEM((bt, 8, 80), jnp.float32),     # conv2, column-pooled (pre row-pool)
            pltpu.VMEM((bt, 4, 80), jnp.float32),     # pool2 output = fc1 input
        ],
        compiler_params=pltpu.CompilerParams(
            dimension_semantics=("parallel",),         # batch tiles independent (v7x 2 TCs)
            vmem_limit_bytes=48 * 1024 * 1024),
    )(x, kw['w1'], kw['b1'], kw['w2'], kw['b2'],
      kw['w3'], kw['b3'], kw['w4'], kw['b4'])
    return out[:B, :h_dim]


def cifar_encoder_forward(x_nchw, prepped, bt=64):
    """Eval-mode forward of CIFAR_encoder: NCHW [B, C, 28, 28] -> [B, h_dim]."""
    kw, h_dim = prepped
    bt = min(bt, _round_up(x_nchw.shape[0], 8))       # tiny batches: shrink the tile
    return _forward(x_nchw, kw, h_dim=h_dim, bt=bt)


# --------------------------- pure-JAX reference ------------------------------ #

def reference_forward(x, params):
    dn = ('NCHW', 'OIHW', 'NCHW')
    y = jax.lax.conv_general_dilated(x, params['conv1_w'], (1, 1), 'VALID',
                                     dimension_numbers=dn)
    y = y + params['conv1_b'][None, :, None, None]
    y = jax.lax.reduce_window(y, -jnp.inf, jax.lax.max,
                              (1, 1, 2, 2), (1, 1, 2, 2), 'VALID')
    y = jnp.maximum(y, 0.0)
    y = jax.lax.conv_general_dilated(y, params['conv2_w'], (1, 1), 'VALID',
                                     dimension_numbers=dn)
    y = y + params['conv2_b'][None, :, None, None]
    y = jax.lax.reduce_window(y, -jnp.inf, jax.lax.max,
                              (1, 1, 2, 2), (1, 1, 2, 2), 'VALID')
    y = jnp.maximum(y, 0.0)
    y = y.reshape(y.shape[0], -1)
    y = jnp.maximum(y @ params['fc1_w'].T + params['fc1_b'], 0.0)
    y = y @ params['fc2_w'].T + params['fc2_b']
    return y


# ---------------------------------- main -------------------------------------- #

if __name__ == "__main__":
    B, C, H, W, h_dim = 2, 3, 28, 28, 32     # spatial must be 28 so the flatten is 320
    keys = jax.random.split(jax.random.PRNGKey(0), 9)
    params = {
        'conv1_w': 0.10 * jax.random.normal(keys[0], (10, C, 5, 5), jnp.float32),
        'conv1_b': 0.10 * jax.random.normal(keys[1], (10,), jnp.float32),
        'conv2_w': 0.10 * jax.random.normal(keys[2], (20, 10, 5, 5), jnp.float32),
        'conv2_b': 0.10 * jax.random.normal(keys[3], (20,), jnp.float32),
        'fc1_w': 0.05 * jax.random.normal(keys[4], (256, 320), jnp.float32),
        'fc1_b': 0.05 * jax.random.normal(keys[5], (256,), jnp.float32),
        'fc2_w': 0.05 * jax.random.normal(keys[6], (h_dim, 256), jnp.float32),
        'fc2_b': 0.05 * jax.random.normal(keys[7], (h_dim,), jnp.float32),
    }
    x = jax.random.normal(keys[8], (B, C, H, W), jnp.float32)

    prepped = prepare_params(params)                       # one-time weight prep
    out = jax.block_until_ready(cifar_encoder_forward(x, prepped))
    ref = jax.block_until_ready(reference_forward(x, params))

    assert out.shape == (B, h_dim), out.shape
    # Tolerance accounts for bf16 matmul operands (f32 accumulation) vs the f32 reference.
    np.testing.assert_allclose(np.asarray(out), np.asarray(ref), rtol=5e-2, atol=5e-2)
    print("KERNEL_OK")
</pallas_src>

<mosaic_0001>
module attributes {stable_mosaic.version = 11 : i64} {
  func.func @_encoder_kernel(%arg0: i32, %arg1: memref<8x28x84xf32, #tpu.memory_space<vmem>>, %arg2: memref<5x84x256xbf16, #tpu.memory_space<vmem>>, %arg3: memref<1x128xf32, #tpu.memory_space<vmem>>, %arg4: memref<5x120x256xbf16, #tpu.memory_space<vmem>>, %arg5: memref<1x128xf32, #tpu.memory_space<vmem>>, %arg6: memref<4x80x256xbf16, #tpu.memory_space<vmem>>, %arg7: memref<1x256xf32, #tpu.memory_space<vmem>>, %arg8: memref<256x128xbf16, #tpu.memory_space<vmem>>, %arg9: memref<1x128xf32, #tpu.memory_space<vmem>>, %arg10: memref<8x128xf32, #tpu.memory_space<vmem>>, %arg11: memref<8x24x120xf32, #tpu.memory_space<vmem>>, %arg12: memref<8x12x120xf32, #tpu.memory_space<vmem>>, %arg13: memref<8x8x80xf32, #tpu.memory_space<vmem>>, %arg14: memref<8x4x80xf32, #tpu.memory_space<vmem>>) attributes {dimension_semantics = [#tpu.dimension_semantics<parallel>], iteration_bounds = array<i64: 1>, scalar_prefetch = 0 : i64, scratch_operands = 4 : i64, tpu.core_type = #tpu.core_type<tc>, window_params = [{transform_indices = @transform_0, window_bounds = array<i64: 8, 28, 84>}, {pipeline_mode = #tpu.pipeline_mode<synchronous>, transform_indices = @transform_1, window_bounds = array<i64: 5, 84, 256>}, {pipeline_mode = #tpu.pipeline_mode<synchronous>, transform_indices = @transform_2, window_bounds = array<i64: 1, 128>}, {pipeline_mode = #tpu.pipeline_mode<synchronous>, transform_indices = @transform_3, window_bounds = array<i64: 5, 120, 256>}, {pipeline_mode = #tpu.pipeline_mode<synchronous>, transform_indices = @transform_4, window_bounds = array<i64: 1, 128>}, {pipeline_mode = #tpu.pipeline_mode<synchronous>, transform_indices = @transform_5, window_bounds = array<i64: 4, 80, 256>}, {pipeline_mode = #tpu.pipeline_mode<synchronous>, transform_indices = @transform_6, window_bounds = array<i64: 1, 256>}, {pipeline_mode = #tpu.pipeline_mode<synchronous>, transform_indices = @transform_7, window_bounds = array<i64: 256, 128>}, {pipeline_mode = #tpu.pipeline_mode<synchronous>, transform_indices = @transform_8, window_bounds = array<i64: 1, 128>}, {transform_indices = @transform_9, window_bounds = array<i64: 8, 128>}]} {
    %c0 = arith.constant 0 : index
    %c0_0 = arith.constant 0 : index
    %c0_1 = arith.constant 0 : index
    %0 = vector.load %arg1[%c0, %c0_0, %c0_1] : memref<8x28x84xf32, #tpu.memory_space<vmem>>, vector<8x24x84xf32>
    %1 = vector.shape_cast %0 : vector<8x24x84xf32> to vector<192x84xf32>
    %2 = arith.truncf %1 : vector<192x84xf32> to vector<192x84xbf16>
    %c0_2 = arith.constant 0 : index
    %c0_3 = arith.constant 0 : index
    %c0_4 = arith.constant 0 : index
    %3 = vector.load %arg2[%c0_2, %c0_3, %c0_4] : memref<5x84x256xbf16, #tpu.memory_space<vmem>>, vector<1x84x256xbf16>
    %4 = vector.shape_cast %3 : vector<1x84x256xbf16> to vector<84x256xbf16>
    %cst = arith.constant dense<0.000000e+00> : vector<192x256xf32>
    %5 = tpu.matmul %2, %4, %cst {dimension_numbers = #tpu.dot_dimension_numbers<[1], [0], [0], [1], [0, 0, 1, 1], [], []>} : vector<192x84xbf16>, vector<84x256xbf16>, vector<192x256xf32> -> vector<192x256xf32>
    %c0_5 = arith.constant 0 : index
    %c1 = arith.constant 1 : index
    %c0_6 = arith.constant 0 : index
    %6 = vector.load %arg1[%c0_5, %c1, %c0_6] : memref<8x28x84xf32, #tpu.memory_space<vmem>>, vector<8x24x84xf32>
    %7 = vector.shape_cast %6 : vector<8x24x84xf32> to vector<192x84xf32>
    %8 = arith.truncf %7 : vector<192x84xf32> to vector<192x84xbf16>
    %c1_7 = arith.constant 1 : index
    %c0_8 = arith.constant 0 : index
    %c0_9 = arith.constant 0 : index
    %9 = vector.load %arg2[%c1_7, %c0_8, %c0_9] : memref<5x84x256xbf16, #tpu.memory_space<vmem>>, vector<1x84x256xbf16>
    %10 = vector.shape_cast %9 : vector<1x84x256xbf16> to vector<84x256xbf16>
    %cst_10 = arith.constant dense<0.000000e+00> : vector<192x256xf32>
    %11 = tpu.matmul %8, %10, %cst_10 {dimension_numbers = #tpu.dot_dimension_numbers<[1], [0], [0], [1], [0, 0, 1, 1], [], []>} : vector<192x84xbf16>, vector<84x256xbf16>, vector<192x256xf32> -> vector<192x256xf32>
    %12 = arith.addf %5, %11 : vector<192x256xf32>
    %c0_11 = arith.constant 0 : index
    %c2 = arith.constant 2 : index
    %c0_12 = arith.constant 0 : index
    %13 = vector.load %arg1[%c0_11, %c2, %c0_12] : memref<8x28x84xf32, #tpu.memory_space<vmem>>, vector<8x24x84xf32>
    %14 = vector.shape_cast %13 : vector<8x24x84xf32> to vector<192x84xf32>
    %15 = arith.truncf %14 : vector<192x84xf32> to vector<192x84xbf16>
    %c2_13 = arith.constant 2 : index
    %c0_14 = arith.constant 0 : index
    %c0_15 = arith.constant 0 : index
    %16 = vector.load %arg2[%c2_13, %c0_14, %c0_15] : memref<5x84x256xbf16, #tpu.memory_space<vmem>>, vector<1x84x256xbf16>
    %17 = vector.shape_cast %16 : vector<1x84x256xbf16> to vector<84x256xbf16>
    %cst_16 = arith.constant dense<0.000000e+00> : vector<192x256xf32>
    %18 = tpu.matmul %15, %17, %cst_16 {dimension_numbers = #tpu.dot_dimension_numbers<[1], [0], [0], [1], [0, 0, 1, 1], [], []>} : vector<192x84xbf16>, vector<84x256xbf16>, vector<192x256xf32> -> vector<192x256xf32>
    %19 = arith.addf %12, %18 : vector<192x256xf32>
    %c0_17 = arith.constant 0 : index
    %c3 = arith.constant 3 : index
    %c0_18 = arith.constant 0 : index
    %20 = vector.load %arg1[%c0_17, %c3, %c0_18] : memref<8x28x84xf32, #tpu.memory_space<vmem>>, vector<8x24x84xf32>
    %21 = vector.shape_cast %20 : vector<8x24x84xf32> to vector<192x84xf32>
    %22 = arith.truncf %21 : vector<192x84xf32> to vector<192x84xbf16>
    %c3_19 = arith.constant 3 : index
    %c0_20 = arith.constant 0 : index
    %c0_21 = arith.constant 0 : index
    %23 = vector.load %arg2[%c3_19, %c0_20, %c0_21] : memref<5x84x256xbf16, #tpu.memory_space<vmem>>, vector<1x84x256xbf16>
    %24 = vector.shape_cast %23 : vector<1x84x256xbf16> to vector<84x256xbf16>
    %cst_22 = arith.constant dense<0.000000e+00> : vector<192x256xf32>
    %25 = tpu.matmul %22, %24, %cst_22 {dimension_numbers = #tpu.dot_dimension_numbers<[1], [0], [0], [1], [0, 0, 1, 1], [], []>} : vector<192x84xbf16>, vector<84x256xbf16>, vector<192x256xf32> -> vector<192x256xf32>
    %26 = arith.addf %19, %25 : vector<192x256xf32>
    %c0_23 = arith.constant 0 : index
    %c4 = arith.constant 4 : index
    %c0_24 = arith.constant 0 : index
    %27 = vector.load %arg1[%c0_23, %c4, %c0_24] : memref<8x28x84xf32, #tpu.memory_space<vmem>>, vector<8x24x84xf32>
    %28 = vector.shape_cast %27 : vector<8x24x84xf32> to vector<192x84xf32>
    %29 = arith.truncf %28 : vector<192x84xf32> to vector<192x84xbf16>
    %c4_25 = arith.constant 4 : index
    %c0_26 = arith.constant 0 : index
    %c0_27 = arith.constant 0 : index
    %30 = vector.load %arg2[%c4_25, %c0_26, %c0_27] : memref<5x84x256xbf16, #tpu.memory_space<vmem>>, vector<1x84x256xbf16>
    %31 = vector.shape_cast %30 : vector<1x84x256xbf16> to vector<84x256xbf16>
    %cst_28 = arith.constant dense<0.000000e+00> : vector<192x256xf32>
    %32 = tpu.matmul %29, %31, %cst_28 {dimension_numbers = #tpu.dot_dimension_numbers<[1], [0], [0], [1], [0, 0, 1, 1], [], []>} : vector<192x84xbf16>, vector<84x256xbf16>, vector<192x256xf32> -> vector<192x256xf32>
    %33 = arith.addf %26, %32 : vector<192x256xf32>
    %34 = vector.extract_strided_slice %33 {offsets = [0, 0], sizes = [192, 120], strides = [1, 1]} : vector<192x256xf32> to vector<192x120xf32>
    %35 = vector.extract_strided_slice %33 {offsets = [0, 128], sizes = [192, 120], strides = [1, 1]} : vector<192x256xf32> to vector<192x120xf32>
    %36 = arith.maximumf %34, %35 : vector<192x120xf32>
    %37 = vector.shape_cast %36 : vector<192x120xf32> to vector<8x24x120xf32>
    %c0_29 = arith.constant 0 : index
    %c0_30 = arith.constant 0 : index
    %c0_31 = arith.constant 0 : index
    %38 = vector.load %arg11[%c0_29, %c0_30, %c0_31] : memref<8x24x120xf32, #tpu.memory_space<vmem>>, vector<8x24x120xf32>
    tpu.vector_store %arg11[%c0_29, %c0_30, %c0_31], %37 {strides = array<i32>} : memref<8x24x120xf32, #tpu.memory_space<vmem>>, vector<8x24x120xf32>,
    %c0_32 = arith.constant 0 : index
    %c0_33 = arith.constant 0 : index
    %c0_34 = arith.constant 0 : index
    %39 = tpu.strided_load %arg11[%c0_32, %c0_33, %c0_34] {strides = array<i32: 1, 2, 1>} : memref<8x24x120xf32, #tpu.memory_space<vmem>>, vector<8x12x120xf32>
    %c0_35 = arith.constant 0 : index
    %c1_36 = arith.constant 1 : index
    %c0_37 = arith.constant 0 : index
    %40 = tpu.strided_load %arg11[%c0_35, %c1_36, %c0_37] {strides = array<i32: 1, 2, 1>} : memref<8x24x120xf32, #tpu.memory_space<vmem>>, vector<8x12x120xf32>
    %41 = arith.maximumf %39, %40 : vector<8x12x120xf32>
    %c0_38 = arith.constant 0 : index
    %c0_39 = arith.constant 0 : index
    %42 = vector.load %arg3[%c0_38, %c0_39] : memref<1x128xf32, #tpu.memory_space<vmem>>, vector<1x128xf32>
    %43 = vector.extract_strided_slice %42 {offsets = [0, 0], sizes = [1, 120], strides = [1, 1]} : vector<1x128xf32> to vector<1x120xf32>
    %44 = vector.shape_cast %43 : vector<1x120xf32> to vector<1x1x120xf32>
    %45 = vector.broadcast %44 : vector<1x1x120xf32> to vector<8x12x120xf32>
    %46 = arith.addf %41, %45 : vector<8x12x120xf32>
    %cst_40 = arith.constant 0.000000e+00 : f32
    %47 = vector.broadcast %cst_40 : f32 to vector<8x12x120xf32>
    %48 = arith.maximumf %46, %47 : vector<8x12x120xf32>
    %c0_41 = arith.constant 0 : index
    %c0_42 = arith.constant 0 : index
    %c0_43 = arith.constant 0 : index
    %49 = vector.load %arg12[%c0_41, %c0_42, %c0_43] : memref<8x12x120xf32, #tpu.memory_space<vmem>>, vector<8x12x120xf32>
    tpu.vector_store %arg12[%c0_41, %c0_42, %c0_43], %48 {strides = array<i32>} : memref<8x12x120xf32, #tpu.memory_space<vmem>>, vector<8x12x120xf32>,
    %c0_44 = arith.constant 0 : index
    %c0_45 = arith.constant 0 : index
    %c0_46 = arith.constant 0 : index
    %50 = vector.load %arg12[%c0_44, %c0_45, %c0_46] : memref<8x12x120xf32, #tpu.memory_space<vmem>>, vector<8x8x120xf32>
    %51 = vector.shape_cast %50 : vector<8x8x120xf32> to vector<64x120xf32>
    %52 = arith.truncf %51 : vector<64x120xf32> to vector<64x120xbf16>
    %c0_47 = arith.constant 0 : index
    %c0_48 = arith.constant 0 : index
    %c0_49 = arith.constant 0 : index
    %53 = vector.load %arg4[%c0_47, %c0_48, %c0_49] : memref<5x120x256xbf16, #tpu.memory_space<vmem>>, vector<1x120x256xbf16>
    %54 = vector.shape_cast %53 : vector<1x120x256xbf16> to vector<120x256xbf16>
    %cst_50 = arith.constant dense<0.000000e+00> : vector<64x256xf32>
    %55 = tpu.matmul %52, %54, %cst_50 {dimension_numbers = #tpu.dot_dimension_numbers<[1], [0], [0], [1], [0, 0, 1, 1], [], []>} : vector<64x120xbf16>, vector<120x256xbf16>, vector<64x256xf32> -> vector<64x256xf32>
    %c0_51 = arith.constant 0 : index
    %c1_52 = arith.constant 1 : index
    %c0_53 = arith.constant 0 : index
    %56 = vector.load %arg12[%c0_51, %c1_52, %c0_53] : memref<8x12x120xf32, #tpu.memory_space<vmem>>, vector<8x8x120xf32>
    %57 = vector.shape_cast %56 : vector<8x8x120xf32> to vector<64x120xf32>
    %58 = arith.truncf %57 : vector<64x120xf32> to vector<64x120xbf16>
    %c1_54 = arith.constant 1 : index
    %c0_55 = arith.constant 0 : index
    %c0_56 = arith.constant 0 : index
    %59 = vector.load %arg4[%c1_54, %c0_55, %c0_56] : memref<5x120x256xbf16, #tpu.memory_space<vmem>>, vector<1x120x256xbf16>
    %60 = vector.shape_cast %59 : vector<1x120x256xbf16> to vector<120x256xbf16>
    %cst_57 = arith.constant dense<0.000000e+00> : vector<64x256xf32>
    %61 = tpu.matmul %58, %60, %cst_57 {dimension_numbers = #tpu.dot_dimension_numbers<[1], [0], [0], [1], [0, 0, 1, 1], [], []>} : vector<64x120xbf16>, vector<120x256xbf16>, vector<64x256xf32> -> vector<64x256xf32>
    %62 = arith.addf %55, %61 : vector<64x256xf32>
    %c0_58 = arith.constant 0 : index
    %c2_59 = arith.constant 2 : index
    %c0_60 = arith.constant 0 : index
    %63 = vector.load %arg12[%c0_58, %c2_59, %c0_60] : memref<8x12x120xf32, #tpu.memory_space<vmem>>, vector<8x8x120xf32>
    %64 = vector.shape_cast %63 : vector<8x8x120xf32> to vector<64x120xf32>
    %65 = arith.truncf %64 : vector<64x120xf32> to vector<64x120xbf16>
    %c2_61 = arith.constant 2 : index
    %c0_62 = arith.constant 0 : index
    %c0_63 = arith.constant 0 : index
    %66 = vector.load %arg4[%c2_61, %c0_62, %c0_63] : memref<5x120x256xbf16, #tpu.memory_space<vmem>>, vector<1x120x256xbf16>
    %67 = vector.shape_cast %66 : vector<1x120x256xbf16> to vector<120x256xbf16>
    %cst_64 = arith.constant dense<0.000000e+00> : vector<64x256xf32>
    %68 = tpu.matmul %65, %67, %cst_64 {dimension_numbers = #tpu.dot_dimension_numbers<[1], [0], [0], [1], [0, 0, 1, 1], [], []>} : vector<64x120xbf16>, vector<120x256xbf16>, vector<64x256xf32> -> vector<64x256xf32>
    %69 = arith.addf %62, %68 : vector<64x256xf32>
    %c0_65 = arith.constant 0 : index
    %c3_66 = arith.constant 3 : index
    %c0_67 = arith.constant 0 : index
    %70 = vector.load %arg12[%c0_65, %c3_66, %c0_67] : memref<8x12x120xf32, #tpu.memory_space<vmem>>, vector<8x8x120xf32>
    %71 = vector.shape_cast %70 : vector<8x8x120xf32> to vector<64x120xf32>
    %72 = arith.truncf %71 : vector<64x120xf32> to vector<64x120xbf16>
    %c3_68 = arith.constant 3 : index
    %c0_69 = arith.constant 0 : index
    %c0_70 = arith.constant 0 : index
    %73 = vector.load %arg4[%c3_68, %c0_69, %c0_70] : memref<5x120x256xbf16, #tpu.memory_space<vmem>>, vector<1x120x256xbf16>
    %74 = vector.shape_cast %73 : vector<1x120x256xbf16> to vector<120x256xbf16>
    %cst_71 = arith.constant dense<0.000000e+00> : vector<64x256xf32>
    %75 = tpu.matmul %72, %74, %cst_71 {dimension_numbers = #tpu.dot_dimension_numbers<[1], [0], [0], [1], [0, 0, 1, 1], [], []>} : vector<64x120xbf16>, vector<120x256xbf16>, vector<64x256xf32> -> vector<64x256xf32>
    %76 = arith.addf %69, %75 : vector<64x256xf32>
    %c0_72 = arith.constant 0 : index
    %c4_73 = arith.constant 4 : index
    %c0_74 = arith.constant 0 : index
    %77 = vector.load %arg12[%c0_72, %c4_73, %c0_74] : memref<8x12x120xf32, #tpu.memory_space<vmem>>, vector<8x8x120xf32>
    %78 = vector.shape_cast %77 : vector<8x8x120xf32> to vector<64x120xf32>
    %79 = arith.truncf %78 : vector<64x120xf32> to vector<64x120xbf16>
    %c4_75 = arith.constant 4 : index
    %c0_76 = arith.constant 0 : index
    %c0_77 = arith.constant 0 : index
    %80 = vector.load %arg4[%c4_75, %c0_76, %c0_77] : memref<5x120x256xbf16, #tpu.memory_space<vmem>>, vector<1x120x256xbf16>
    %81 = vector.shape_cast %80 : vector<1x120x256xbf16> to vector<120x256xbf16>
    %cst_78 = arith.constant dense<0.000000e+00> : vector<64x256xf32>
    %82 = tpu.matmul %79, %81, %cst_78 {dimension_numbers = #tpu.dot_dimension_numbers<[1], [0], [0], [1], [0, 0, 1, 1], [], []>} : vector<64x120xbf16>, vector<120x256xbf16>, vector<64x256xf32> -> vector<64x256xf32>
    %83 = arith.addf %76, %82 : vector<64x256xf32>
    %84 = vector.extract_strided_slice %83 {offsets = [0, 0], sizes = [64, 80], strides = [1, 1]} : vector<64x256xf32> to vector<64x80xf32>
    %85 = vector.extract_strided_slice %83 {offsets = [0, 128], sizes = [64, 80], strides = [1, 1]} : vector<64x256xf32> to vector<64x80xf32>
    %86 = arith.maximumf %84, %85 : vector<64x80xf32>
    %87 = vector.shape_cast %86 : vector<64x80xf32> to vector<8x8x80xf32>
    %c0_79 = arith.constant 0 : index
    %c0_80 = arith.constant 0 : index
    %c0_81 = arith.constant 0 : index
    %88 = vector.load %arg13[%c0_79, %c0_80, %c0_81] : memref<8x8x80xf32, #tpu.memory_space<vmem>>, vector<8x8x80xf32>
    tpu.vector_store %arg13[%c0_79, %c0_80, %c0_81], %87 {strides = array<i32>} : memref<8x8x80xf32, #tpu.memory_space<vmem>>, vector<8x8x80xf32>,
    %c0_82 = arith.constant 0 : index
    %c0_83 = arith.constant 0 : index
    %c0_84 = arith.constant 0 : index
    %89 = tpu.strided_load %arg13[%c0_82, %c0_83, %c0_84] {strides = array<i32: 1, 2, 1>} : memref<8x8x80xf32, #tpu.memory_space<vmem>>, vector<8x4x80xf32>
    %c0_85 = arith.constant 0 : index
    %c1_86 = arith.constant 1 : index
    %c0_87 = arith.constant 0 : index
    %90 = tpu.strided_load %arg13[%c0_85, %c1_86, %c0_87] {strides = array<i32: 1, 2, 1>} : memref<8x8x80xf32, #tpu.memory_space<vmem>>, vector<8x4x80xf32>
    %91 = arith.maximumf %89, %90 : vector<8x4x80xf32>
    %c0_88 = arith.constant 0 : index
    %c0_89 = arith.constant 0 : index
    %92 = vector.load %arg5[%c0_88, %c0_89] : memref<1x128xf32, #tpu.memory_space<vmem>>, vector<1x128xf32>
    %93 = vector.extract_strided_slice %92 {offsets = [0, 0], sizes = [1, 80], strides = [1, 1]} : vector<1x128xf32> to vector<1x80xf32>
    %94 = vector.shape_cast %93 : vector<1x80xf32> to vector<1x1x80xf32>
    %95 = vector.broadcast %94 : vector<1x1x80xf32> to vector<8x4x80xf32>
    %96 = arith.addf %91, %95 : vector<8x4x80xf32>
    %cst_90 = arith.constant 0.000000e+00 : f32
    %97 = vector.broadcast %cst_90 : f32 to vector<8x4x80xf32>
    %98 = arith.maximumf %96, %97 : vector<8x4x80xf32>
    %c0_91 = arith.constant 0 : index
    %c0_92 = arith.constant 0 : index
    %c0_93 = arith.constant 0 : index
    %99 = vector.load %arg14[%c0_91, %c0_92, %c0_93] : memref<8x4x80xf32, #tpu.memory_space<vmem>>, vector<8x4x80xf32>
    tpu.vector_store %arg14[%c0_91, %c0_92, %c0_93], %98 {strides = array<i32>} : memref<8x4x80xf32, #tpu.memory_space<vmem>>, vector<8x4x80xf32>,
    %c0_94 = arith.constant 0 : index
    %c0_95 = arith.constant 0 : index
    %c0_96 = arith.constant 0 : index
    %100 = vector.load %arg14[%c0_94, %c0_95, %c0_96] : memref<8x4x80xf32, #tpu.memory_space<vmem>>, vector<8x1x80xf32>
    %101 = vector.shape_cast %100 : vector<8x1x80xf32> to vector<8x80xf32>
    %102 = arith.truncf %101 : vector<8x80xf32> to vector<8x80xbf16>
    %c0_97 = arith.constant 0 : index
    %c0_98 = arith.constant 0 : index
    %c0_99 = arith.constant 0 : index
    %103 = vector.load %arg6[%c0_97, %c0_98, %c0_99] : memref<4x80x256xbf16, #tpu.memory_space<vmem>>, vector<1x80x256xbf16>
    %104 = vector.shape_cast %103 : vector<1x80x256xbf16> to vector<80x256xbf16>
    %cst_100 = arith.constant dense<0.000000e+00> : vector<8x256xf32>
    %105 = tpu.matmul %102, %104, %cst_100 {dimension_numbers = #tpu.dot_dimension_numbers<[1], [0], [0], [1], [0, 0, 1, 1], [], []>} : vector<8x80xbf16>, vector<80x256xbf16>, vector<8x256xf32> -> vector<8x256xf32>
    %c0_101 = arith.constant 0 : index
    %c1_102 = arith.constant 1 : index
    %c0_103 = arith.constant 0 : index
    %106 = vector.load %arg14[%c0_101, %c1_102, %c0_103] : memref<8x4x80xf32, #tpu.memory_space<vmem>>, vector<8x1x80xf32>
    %107 = vector.shape_cast %106 : vector<8x1x80xf32> to vector<8x80xf32>
    %108 = arith.truncf %107 : vector<8x80xf32> to vector<8x80xbf16>
    %c1_104 = arith.constant 1 : index
    %c0_105 = arith.constant 0 : index
    %c0_106 = arith.constant 0 : index
    %109 = vector.load %arg6[%c1_104, %c0_105, %c0_106] : memref<4x80x256xbf16, #tpu.memory_space<vmem>>, vector<1x80x256xbf16>
    %110 = vector.shape_cast %109 : vector<1x80x256xbf16> to vector<80x256xbf16>
    %cst_107 = arith.constant dense<0.000000e+00> : vector<8x256xf32>
    %111 = tpu.matmul %108, %110, %cst_107 {dimension_numbers = #tpu.dot_dimension_numbers<[1], [0], [0], [1], [0, 0, 1, 1], [], []>} : vector<8x80xbf16>, vector<80x256xbf16>, vector<8x256xf32> -> vector<8x256xf32>
    %112 = arith.addf %105, %111 : vector<8x256xf32>
    %c0_108 = arith.constant 0 : index
    %c2_109 = arith.constant 2 : index
    %c0_110 = arith.constant 0 : index
    %113 = vector.load %arg14[%c0_108, %c2_109, %c0_110] : memref<8x4x80xf32, #tpu.memory_space<vmem>>, vector<8x1x80xf32>
    %114 = vector.shape_cast %113 : vector<8x1x80xf32> to vector<8x80xf32>
    %115 = arith.truncf %114 : vector<8x80xf32> to vector<8x80xbf16>
    %c2_111 = arith.constant 2 : index
    %c0_112 = arith.constant 0 : index
    %c0_113 = arith.constant 0 : index
    %116 = vector.load %arg6[%c2_111, %c0_112, %c0_113] : memref<4x80x256xbf16, #tpu.memory_space<vmem>>, vector<1x80x256xbf16>
    %117 = vector.shape_cast %116 : vector<1x80x256xbf16> to vector<80x256xbf16>
    %cst_114 = arith.constant dense<0.000000e+00> : vector<8x256xf32>
    %118 = tpu.matmul %115, %117, %cst_114 {dimension_numbers = #tpu.dot_dimension_numbers<[1], [0], [0], [1], [0, 0, 1, 1], [], []>} : vector<8x80xbf16>, vector<80x256xbf16>, vector<8x256xf32> -> vector<8x256xf32>
    %119 = arith.addf %112, %118 : vector<8x256xf32>
    %c0_115 = arith.constant 0 : index
    %c3_116 = arith.constant 3 : index
    %c0_117 = arith.constant 0 : index
    %120 = vector.load %arg14[%c0_115, %c3_116, %c0_117] : memref<8x4x80xf32, #tpu.memory_space<vmem>>, vector<8x1x80xf32>
    %121 = vector.shape_cast %120 : vector<8x1x80xf32> to vector<8x80xf32>
    %122 = arith.truncf %121 : vector<8x80xf32> to vector<8x80xbf16>
    %c3_118 = arith.constant 3 : index
    %c0_119 = arith.constant 0 : index
    %c0_120 = arith.constant 0 : index
    %123 = vector.load %arg6[%c3_118, %c0_119, %c0_120] : memref<4x80x256xbf16, #tpu.memory_space<vmem>>, vector<1x80x256xbf16>
    %124 = vector.shape_cast %123 : vector<1x80x256xbf16> to vector<80x256xbf16>
    %cst_121 = arith.constant dense<0.000000e+00> : vector<8x256xf32>
    %125 = tpu.matmul %122, %124, %cst_121 {dimension_numbers = #tpu.dot_dimension_numbers<[1], [0], [0], [1], [0, 0, 1, 1], [], []>} : vector<8x80xbf16>, vector<80x256xbf16>, vector<8x256xf32> -> vector<8x256xf32>
    %126 = arith.addf %119, %125 : vector<8x256xf32>
    %c0_122 = arith.constant 0 : index
    %c0_123 = arith.constant 0 : index
    %127 = vector.load %arg7[%c0_122, %c0_123] : memref<1x256xf32, #tpu.memory_space<vmem>>, vector<1x256xf32>
    %128 = vector.broadcast %127 : vector<1x256xf32> to vector<8x256xf32>
    %129 = arith.addf %126, %128 : vector<8x256xf32>
    %cst_124 = arith.constant 0.000000e+00 : f32
    %130 = vector.broadcast %cst_124 : f32 to vector<8x256xf32>
    %131 = arith.maximumf %129, %130 : vector<8x256xf32>
    %132 = arith.truncf %131 : vector<8x256xf32> to vector<8x256xbf16>
    %c0_125 = arith.constant 0 : index
    %c0_126 = arith.constant 0 : index
    %133 = vector.load %arg8[%c0_125, %c0_126] : memref<256x128xbf16, #tpu.memory_space<vmem>>, vector<256x128xbf16>
    %cst_127 = arith.constant dense<0.000000e+00> : vector<8x128xf32>
    %134 = tpu.matmul %132, %133, %cst_127 {dimension_numbers = #tpu.dot_dimension_numbers<[1], [0], [0], [1], [0, 0, 1, 1], [], []>} : vector<8x256xbf16>, vector<256x128xbf16>, vector<8x128xf32> -> vector<8x128xf32>
    %c0_128 = arith.constant 0 : index
    %c0_129 = arith.constant 0 : index
    %135 = vector.load %arg9[%c0_128, %c0_129] : memref<1x128xf32, #tpu.memory_space<vmem>>, vector<1x128xf32>
    %136 = vector.broadcast %135 : vector<1x128xf32> to vector<8x128xf32>
    %137 = arith.addf %134, %136 : vector<8x128xf32>
    %c0_130 = arith.constant 0 : index
    %c0_131 = arith.constant 0 : index
    %138 = vector.load %arg10[%c0_130, %c0_131] : memref<8x128xf32, #tpu.memory_space<vmem>>, vector<8x128xf32>
    tpu.vector_store %arg10[%c0_130, %c0_131], %137 {strides = array<i32>} : memref<8x128xf32, #tpu.memory_space<vmem>>, vector<8x128xf32>,
    return
  }
  func.func @transform_0(%arg0: i32) -> (i32, i32, i32) {
    %c0_i32 = arith.constant 0 : i32
    %c0_i32_0 = arith.constant 0 : i32
    %c0_i32_1 = arith.constant 0 : i32
    return %arg0, %c0_i32, %c0_i32_0 : i32, i32, i32
  }
  func.func @transform_1(%arg0: i32) -> (i32, i32, i32) {
    %c0_i32 = arith.constant 0 : i32
    %c0_i32_0 = arith.constant 0 : i32
    %c0_i32_1 = arith.constant 0 : i32
    %c0_i32_2 = arith.constant 0 : i32
    return %c0_i32, %c0_i32_0, %c0_i32_1 : i32, i32, i32
  }
  func.func @transform_2(%arg0: i32) -> (i32, i32) {
    %c0_i32 = arith.constant 0 : i32
    %c0_i32_0 = arith.constant 0 : i32
    %c0_i32_1 = arith.constant 0 : i32
    return %c0_i32, %c0_i32_0 : i32, i32
  }
  func.func @transform_3(%arg0: i32) -> (i32, i32, i32) {
    %c0_i32 = arith.constant 0 : i32
    %c0_i32_0 = arith.constant 0 : i32
    %c0_i32_1 = arith.constant 0 : i32
    %c0_i32_2 = arith.constant 0 : i32
    return %c0_i32, %c0_i32_0, %c0_i32_1 : i32, i32, i32
  }
  func.func @transform_4(%arg0: i32) -> (i32, i32) {
    %c0_i32 = arith.constant 0 : i32
    %c0_i32_0 = arith.constant 0 : i32
    %c0_i32_1 = arith.constant 0 : i32
    return %c0_i32, %c0_i32_0 : i32, i32
  }
  func.func @transform_5(%arg0: i32) -> (i32, i32, i32) {
    %c0_i32 = arith.constant 0 : i32
    %c0_i32_0 = arith.constant 0 : i32
    %c0_i32_1 = arith.constant 0 : i32
    %c0_i32_2 = arith.constant 0 : i32
    return %c0_i32, %c0_i32_0, %c0_i32_1 : i32, i32, i32
  }
  func.func @transform_6(%arg0: i32) -> (i32, i32) {
    %c0_i32 = arith.constant 0 : i32
    %c0_i32_0 = arith.constant 0 : i32
    %c0_i32_1 = arith.constant 0 : i32
    return %c0_i32, %c0_i32_0 : i32, i32
  }
  func.func @transform_7(%arg0: i32) -> (i32, i32) {
    %c0_i32 = arith.constant 0 : i32
    %c0_i32_0 = arith.constant 0 : i32
    %c0_i32_1 = arith.constant 0 : i32
    return %c0_i32, %c0_i32_0 : i32, i32
  }
  func.func @transform_8(%arg0: i32) -> (i32, i32) {
    %c0_i32 = arith.constant 0 : i32
    %c0_i32_0 = arith.constant 0 : i32
    %c0_i32_1 = arith.constant 0 : i32
    return %c0_i32, %c0_i32_0 : i32, i32
  }
  func.func @transform_9(%arg0: i32) -> (i32, i32) {
    %c0_i32 = arith.constant 0 : i32
    %c0_i32_0 = arith.constant 0 : i32
    return %arg0, %c0_i32 : i32, i32
  }
}

</mosaic_0001>

<bundles_post_ra>
// kernel: _forward.1
= control target key start
LH: loop header
LB: loop body
LE: loop exit
PB: predicated region body
PF: predicated region fallthrough
CT: control target
= control target key end

     0   :  { %14 = vsyncpa [#allocation7], 0  ;;  %s6071_s0 = inlined_call_operand.vmem [shape: f32[8,28,84], index: 0, kind: input, shape index: {}]   ;;  %s6072_s1 = inlined_call_operand.hbm [shape: bf16[5,84,256], index: 1, kind: input, shape index: {}]   ;;  %s6073_s2 = inlined_call_operand.vmem [shape: f32[1,128], index: 2, kind: input, shape index: {}]   ;;  %s6074_s3 = inlined_call_operand.vmem [shape: bf16[5,120,256], index: 3, kind: input, shape index: {}]   ;;  %s6075_s4 = inlined_call_operand.vmem [shape: f32[1,128], index: 4, kind: input, shape index: {}]   ;;  %s6076_s5 = inlined_call_operand.hbm [shape: bf16[4,80,256], index: 5, kind: input, shape index: {}]   ;;  %s6077_s6 = inlined_call_operand.vmem [shape: f32[1,256], index: 6, kind: input, shape index: {}]   ;;  %s6078_s7 = inlined_call_operand.vmem [shape: bf16[256,128], index: 7, kind: input, shape index: {}]   ;;  %s6079_s8 = inlined_call_operand.vmem [shape: f32[1,128], index: 8, kind: input, shape index: {}]   ;;  %s6080_s9 = inlined_call_operand.vmem [shape: f32[8,128], index: 9, kind: output, shape index: {}]  }
   0x1   :  { %15 = vsyncpa [#allocation9], 0  ;;  %s4504_s30 = smov [#allocation6]  }
   0x2   :  { %s23_s10 = sshll.u32 %s4504_s30, 4  ;;  %s24_s10 = int_to_ptr.vmem [resolvable:$true] %s23_s10 }
   0x3   :  { %s4468_s11 = scalar_lea.vmem %s24_s10, 7040  ;;  %p4473_p1 = scmp.lt.s32.totalorder %s24_s10, %s24_s10 }
   0x4   :  { %p4469_p0 = scmp.ne.s32.totalorder %s24_s10, %s4468_s11  ;;  %p4474_p2 = scmp.lt.s32.totalorder %s4468_s11, %s4468_s11 }
   0x6   :  { %p4475_p3 = por %p4474_p2, %p4473_p1 }
   0x8   :  { %p4476_p4 = pnand %p4475_p3, %p4469_p0 }
   0xa   :  { %4479 = shalt.err (!%p4476_p4)
}
   0xb   :  { %s4505_s12 = smov 128   ;;  %s4506_s13 = smov 8  }
   0xc   :  { %29 = dma.hbm_to_vmem [thread:$0]  %s6072_s1, 7040, %s24_s10, [#allocation7], %s4505_s12, %s4505_s12, %s4506_s13  }
   0xd   :  { %s4507_s16 = smov [#allocation8]  }
   0xe   :  { %s41_s17 = sshll.u32 %s4507_s16, 4  ;;  %s42_s17 = int_to_ptr.vmem [resolvable:$true] %s41_s17 }
   0xf   :  { %s4488_s18 = scalar_lea.vmem %s42_s17, 5120  ;;  %p4493_p6 = scmp.lt.s32.totalorder %s42_s17, %s42_s17 }
  0x10   :  { %p4489_p5 = scmp.ne.s32.totalorder %s42_s17, %s4488_s18  ;;  %p4494_p7 = scmp.lt.s32.totalorder %s4488_s18, %s4488_s18 }
  0x12   :  { %p4495_p8 = por %p4494_p7, %p4493_p6 }
  0x14   :  { %p4496_p9 = pnand %p4495_p8, %p4489_p5 }
  0x16   :  { %4499 = shalt.err (!%p4496_p9)
}
  0x17   :  { %47 = dma.hbm_to_vmem [thread:$0]  %s6076_s5, 5120, %s42_s17, [#allocation9], %s4505_s12, %s4505_s12, %s4506_s13  }
  0x18   :  { %4500 = dma.done.wait [#allocation7], 7040  }
  0x19   :  { %4501 = vsyncadd [#allocation7], 4294960256 }
  0x1a   :  { %4502 = dma.done.wait [#allocation9], 5120  }
  0x1b   :  { %4503 = vsyncadd [#allocation9], 4294962176  ;;  %v6081_v0 = vmov 0   ;;  %v155_v1 = vld [vmem:[#allocation6 + $0xa8] sm:$0x33]  ;;  %vm248_vm0 = vcmask 1041408  }
  0x1c   :  { %287 = vmatprep.mubr.bf16.mxu0 %v6081_v0  ;;  %537 = vmatprep.mubr.bf16.mxu1 %v6081_v0  ;;  %v107_v2 = vld [vmem:[#allocation6 + $0x50] sm:$0x33]  ;;  %v3815_v3 = vcombine.high %v155_v1, %v155_v1  ;;  %v3814_v5 = vcombine.low %v155_v1, %v155_v1  ;;  %v4188_v7 = vld [vmem:[#allocation6 + $0x9c] ss:$8 sps:$4 sm:$0xff]   ;;  %v4192_v11 = vld [vmem:[#allocation6 + $0x98] ss:$8 sps:$4 sm:$0xff]  }
  0x1d   :  { %v3840_v4 = vcombine.high %v107_v2, %v107_v2  ;;  %v3839_v6 = vcombine.low %v107_v2, %v107_v2  ;;  %v4190_v8 = vld [vmem:[#allocation6 + $0x44] ss:$8 sps:$4 sm:$0xff]   ;;  %v4193_v12 = vld [vmem:[#allocation6 + $0x40] ss:$8 sps:$4 sm:$0xff]   ;;  %v4196_v14 = vld [vmem:[#allocation6 + $0x34] ss:$8 sps:$4 sm:$0xff]  }
  0x1e   :  { %3816 = vmatprep.subr.msk.bf16.mxu0 %vm248_vm0, %v3815_v3  ;;  %v250_v9 = vsel %vm248_vm0, %v3814_v5, 0  ;;  %v4194_v13 = vld [vmem:[#allocation6 + $0x8c] ss:$8 sps:$4 sm:$0xff]   ;;  %v4198_v15 = vld [vmem:[#allocation6 + $0x88] ss:$8 sps:$4 sm:$0xff]   ;;  %v61_v32 = vld [vmem:[%s6071_s0] sm:$0xff] }
  0x1f   :  { %3841 = vmatprep.subr.msk.bf16.mxu1 %vm248_vm0, %v3840_v4  ;;  %v500_v10 = vsel %vm248_vm0, %v3839_v6, 0  ;;  %260 = vmatpush1.bf16.msra.mxu0 %v250_v9  ;;  %v4199_v16 = vld [vmem:[#allocation6 + $0x30] ss:$8 sps:$4 sm:$0xff]   ;;  %v4200_v17 = vld [vmem:[#allocation6 + $0x7c] ss:$8 sps:$4 sm:$0xff]   ;;  %v62_v33 = vld [vmem:[%s6071_s0 + $0x8] sm:$0xff] }
  0x20   :  { %510 = vmatpush1.bf16.msra.mxu1 %v500_v10  ;;  %261 = vmatprep.subr.bf16.mxu0 %v4188_v7  ;;  %v4202_v18 = vld [vmem:[#allocation6 + $0x24] ss:$8 sps:$4 sm:$0xff]   ;;  %v4204_v19 = vld [vmem:[#allocation6 + $0x78] ss:$8 sps:$4 sm:$0xff]   ;;  %v4208_v22 = vld [vmem:[#allocation6 + $0x14] ss:$8 sps:$4 sm:$0xff]   ;;  %v85_v37 = vpack.c.bf16 %v62_v33, %v61_v32 }
  0x21   :  { %511 = vmatprep.subr.bf16.mxu1 %v4190_v8  ;;  %v4205_v20 = vld [vmem:[#allocation6 + $0x20] ss:$8 sps:$4 sm:$0xff]   ;;  %v4206_v21 = vld [vmem:[#allocation6 + $0x6c] ss:$8 sps:$4 sm:$0xff]   ;;  %v4211_v24 = vld [vmem:[#allocation6 + $0x10] ss:$8 sps:$4 sm:$0xff]  }
  0x22   :  { %v4210_v23 = vld [vmem:[#allocation6 + $0x68] ss:$8 sps:$4 sm:$0xff]   ;;  %v4212_v25 = vld [vmem:[#allocation6 + $0x5c] ss:$8 sps:$4 sm:$0xff]   ;;  %v4216_v28 = vld [vmem:[#allocation6 + $0x58] ss:$8 sps:$4 sm:$0xff]  }
  0x23   :  { %262 = vmatpush1.bf16.msra.mxu0 %v4192_v11  ;;  %v4214_v26 = vld [vmem:[#allocation6 + $0x4] ss:$8 sps:$4 sm:$0xff]   ;;  %v4217_v29 = vld [vmem:[#allocation6] ss:$8 sps:$4 sm:$0xff]   ;;  %vm211_vm1 = vcmask 687104   ;;  %v110_v40 = vld [vmem:[%s6071_s0 + $0x11] sm:$0xff] }
  0x24   :  { %512 = vmatpush1.bf16.msra.mxu1 %v4193_v12  ;;  %263 = vmatprep.subr.bf16.mxu0 %v4194_v13  ;;  %v705_v27 = vld [vmem:[#allocation6 + $0x100] sm:$0x33]  ;;  %v109_v31 = vld [vmem:[%s6071_s0 + $0x9] sm:$0xff]  ;;  %v4222_v39 = vld [vmem:[#allocation6 + $0xf4] ss:$8 sps:$4 sm:$0xff]   ;;  %vm2022_vm2 = vcmask 1043456  }
  0x25   :  { %513 = vmatprep.subr.bf16.mxu1 %v4196_v14  ;;  %v108_v30 = vld [vmem:[%s6071_s0 + $0x1] sm:$0xff]  ;;  %v3865_v34 = vcombine.high %v705_v27, %v705_v27  ;;  %v3864_v35 = vcombine.low %v705_v27, %v705_v27  ;;  %v63_v42 = vld [vmem:[%s6071_s0 + $0x10] sm:$0xff]  ;;  %v1051_v49 = vld [vmem:[#allocation6 + $0x158] sm:$0x33]  ;;  %vm1720_vm3 = vcmask 982016   ;;  %vm1864_vm4 = vcmask 977920  }
  0x26   :  { %v132_v36 = vpack.c.bf16 %v109_v31, %v108_v30  ;;  %v111_v41 = vld [vmem:[%s6071_s0 + $0x21] sm:$0xff]  ;;  %v4220_v44 = vld [vmem:[#allocation6 + $0xf0] ss:$8 sps:$4 sm:$0xff]   ;;  %v4228_v51 = vld [vmem:[#allocation6 + $0xd4] ss:$8 sps:$4 sm:$0xff]   ;;  %v3890_v52 = vcombine.high %v1051_v49, %v1051_v49  ;;  %v3889_v53 = vcombine.low %v1051_v49, %v1051_v49  ;;  %vm2906_vm5 = vcmask 654336  }
  0x27   :  { %264 = vmatpush1.bf16.msra.mxu0 %v4198_v15  ;;  %v798_v38 = vsel %vm248_vm0, %v3864_v35, 0  ;;  %v64_v43 = vld [vmem:[%s6071_s0 + $0x20] sm:$0xff]  ;;  %v133_v46 = vpack.c.bf16 %v111_v41, %v110_v40  ;;  %v112_v50 = vld [vmem:[%s6071_s0 + $0x29] sm:$0xff]  ;;  %v113_v54 = vld [vmem:[%s6071_s0 + $0x31] sm:$0xff]  ;;  %vm2977_vm6 = vcmask 650240   ;;  %vm3056_vm7 = vcmask 1041409  }
  0x28   :  { %514 = vmatpush1.bf16.msra.mxu1 %v4199_v16  ;;  %265 = vmatprep.subr.bf16.mxu0 %v4200_v17  ;;  %v4225_v45 = vld [vmem:[#allocation6 + $0xe4] ss:$8 sps:$4 sm:$0xff]   ;;  %v86_v47 = vpack.c.bf16 %v64_v43, %v63_v42  ;;  %v4223_v48 = vld [vmem:[#allocation6 + $0xe0] ss:$8 sps:$4 sm:$0xff]   ;;  %v66_v57 = vld [vmem:[%s6071_s0 + $0x30] sm:$0xff]  ;;  %v1144_v58 = vsel %vm248_vm0, %v3889_v53, 0  ;;  %v134_v62 = vpack.c.bf16 %v113_v54, %v112_v50 }
  0x29   :  { %515 = vmatprep.subr.bf16.mxu1 %v4202_v18  ;;  %v65_v55 = vld [vmem:[%s6071_s0 + $0x28] sm:$0xff]  ;;  %v4226_v59 = vld [vmem:[#allocation6 + $0xd0] ss:$8 sps:$4 sm:$0xff]   ;;  %v4242_v2 = vld [vmem:[#allocation6 + $0x13c] ss:$8 sps:$4 sm:$0xff]   ;;  %vm3059_vm8 = vcmask 1042434  }
  0x2a   :  { %v4236_v56 = vld [vmem:[#allocation6 + $0x14c] ss:$8 sps:$4 sm:$0xff]   ;;  %v4234_v61 = vld [vmem:[#allocation6 + $0x148] ss:$8 sps:$4 sm:$0xff]   ;;  %v87_v63 = vpack.c.bf16 %v66_v57, %v65_v55  ;;  %v4240_v5 = vld [vmem:[#allocation6 + $0x138] ss:$8 sps:$4 sm:$0xff]  }
  0x2b   :  { %266 = vmatpush1.bf16.msra.mxu0 %v4204_v19  ;;  %v4231_v60 = vld [vmem:[#allocation6 + $0xc4] ss:$8 sps:$4 sm:$0xff]   ;;  %v4229_v1 = vld [vmem:[#allocation6 + $0xc0] ss:$8 sps:$4 sm:$0xff]   ;;  %v4239_v4 = vld [vmem:[#allocation6 + $0xb4] ss:$8 sps:$4 sm:$0xff]  }
  0x2c   :  { %516 = vmatpush1.bf16.msra.mxu1 %v4205_v20  ;;  %267 = vmatprep.subr.bf16.mxu0 %v4206_v21  ;;  %v114_v3 = vld [vmem:[%s6071_s0 + $0x41] sm:$0xff]  ;;  %v115_v6 = vld [vmem:[%s6071_s0 + $0x49] sm:$0xff]  ;;  %v116_v19 = vld [vmem:[%s6071_s0 + $0x51] sm:$0xff]  ;;  %vm3062_vm9 = vcmask 1043459   ;;  %vm3065_vm10 = vcmask 1044484   ;;  %vm3068_vm11 = vcmask 1045509  }
  0x2d   :  { %517 = vmatprep.subr.bf16.mxu1 %v4208_v22  ;;  %v4245_v7 = vld [vmem:[#allocation6 + $0x12c] ss:$8 sps:$4 sm:$0xff]   ;;  %v67_v8 = vld [vmem:[%s6071_s0 + $0x40] sm:$0xff]  ;;  %v4237_v11 = vld [vmem:[#allocation6 + $0xb0] ss:$8 sps:$4 sm:$0xff]   ;;  %v135_v15 = vpack.c.bf16 %v115_v6, %v114_v3  ;;  %vm3071_vm12 = vcmask 1046534  }
  0x2e   :  { %v68_v9 = vld [vmem:[%s6071_s0 + $0x48] sm:$0xff]  ;;  %v1397_v10 = vld [vmem:[#allocation6 + $0x1b0] sm:$0x33]  ;;  %v4248_v18 = vld [vmem:[#allocation6 + $0x11c] ss:$8 sps:$4 sm:$0xff]   ;;  %vm3074_vm13 = vcmask 1047559  }
  0x2f   :  { %268 = vmatpush1.bf16.msra.mxu0 %v4210_v23  ;;  %v3914_v12 = vcombine.low %v1397_v10, %v1397_v10  ;;  %v4243_v13 = vld [vmem:[#allocation6 + $0x128] ss:$8 sps:$4 sm:$0xff]   ;;  %v3915_v14 = vcombine.high %v1397_v10, %v1397_v10  ;;  %v88_v16 = vpack.c.bf16 %v68_v9, %v67_v8  ;;  %v4246_v20 = vld [vmem:[#allocation6 + $0x118] ss:$8 sps:$4 sm:$0xff]   ;;  %v4251_v22 = vld [vmem:[#allocation6 + $0x10c] ss:$8 sps:$4 sm:$0xff]  }
  0x30   :  { %518 = vmatpush1.bf16.msra.mxu1 %v4211_v24  ;;  %269 = vmatprep.subr.bf16.mxu0 %v4212_v25  ;;  %v117_v21 = vld [vmem:[%s6071_s0 + $0x61] sm:$0xff]  ;;  %v69_v23 = vld [vmem:[%s6071_s0 + $0x50] sm:$0xff] }
  0x31   :  { %519 = vmatprep.subr.bf16.mxu1 %v4214_v26  ;;  %v4636_v17 = vsel %vm248_vm0, %v3914_v12, 0  ;;  %v70_v24 = vld [vmem:[%s6071_s0 + $0x60] sm:$0xff]  ;;  %v4249_v25 = vld [vmem:[#allocation6 + $0x108] ss:$8 sps:$4 sm:$0xff]   ;;  %v136_v26 = vpack.c.bf16 %v117_v21, %v116_v19 }
  0x32   :  { %v89_v27 = vpack.c.bf16 %v70_v24, %v69_v23  ;;  %v71_v30 = vld [vmem:[%s6071_s0 + $0x68] sm:$0xff]  ;;  %v72_v31 = vld [vmem:[%s6071_s0 + $0x70] sm:$0xff]  ;;  %v76_v43 = vld [vmem:[%s6071_s0 + $0xa0] sm:$0xff] }
  0x33   :  { %270 = vmatpush1.bf16.msra.mxu0 %v4216_v28  ;;  %v118_v28 = vld [vmem:[%s6071_s0 + $0x69] sm:$0xff]  ;;  %v90_v33 = vpack.c.bf16 %v72_v31, %v71_v30  ;;  %v122_v40 = vld [vmem:[%s6071_s0 + $0x91] sm:$0xff]  ;;  %v123_v41 = vld [vmem:[%s6071_s0 + $0xa1] sm:$0xff] }
  0x34   :  { %520 = vmatpush1.bf16.msra.mxu1 %v4217_v29  ;;  %3866 = vmatprep.subr.msk.bf16.mxu0 %vm248_vm0, %v3865_v34  ;;  %v119_v29 = vld [vmem:[%s6071_s0 + $0x71] sm:$0xff]  ;;  %v120_v34 = vld [vmem:[%s6071_s0 + $0x81] sm:$0xff]  ;;  %v121_v35 = vld [vmem:[%s6071_s0 + $0x89] sm:$0xff] }
  0x35   :  { %3891 = vmatprep.subr.msk.bf16.mxu1 %vm248_vm0, %v3890_v52  ;;  %v137_v32 = vpack.c.bf16 %v119_v29, %v118_v28  ;;  %v75_v42 = vld [vmem:[%s6071_s0 + $0x90] sm:$0xff]  ;;  %v126_v52 = vld [vmem:[%s6071_s0 + $0xc1] sm:$0xff] }
  0x36   :  { %3817 = vmatmul.mubr.msk.bf16.vlgmr.msra.gmra.mxu0 %vm211_vm1, %v132_v36  ;;  %v73_v36 = vld [vmem:[%s6071_s0 + $0x80] sm:$0xff]  ;;  %v78_v49 = vld [vmem:[%s6071_s0 + $0xb0] sm:$0xff]  ;;  %v80_v55 = vld [vmem:[%s6071_s0 + $0xc8] sm:$0xff] }
  0x37   :  { %3842 = vmatmul.mubr.msk.bf16.vlgmr.msra.gmra.mxu1 %vm211_vm1, %v85_v37  ;;  %808 = vmatpush1.bf16.msra.mxu0 %v798_v38  ;;  %v74_v37 = vld [vmem:[%s6071_s0 + $0x88] sm:$0xff]  ;;  %v138_v38 = vpack.c.bf16 %v121_v35, %v120_v34  ;;  %v79_v54 = vld [vmem:[%s6071_s0 + $0xc0] sm:$0xff]  ;;  %v4257_v23 = vld [vmem:[#allocation6 + $0x190] ss:$8 sps:$4 sm:$0xff]  }
  0x38   :  { %297 = vmatprep.mubr.bf16.mxu0 %v6081_v0  ;;  %547 = vmatprep.mubr.bf16.mxu1 %v6081_v0  ;;  %v127_v53 = vld [vmem:[%s6071_s0 + $0xc9] sm:$0xff]  ;;  %v94_v57 = vpack.c.bf16 %v80_v55, %v79_v54  ;;  %v4265_v29 = vld [vmem:[#allocation6 + $0x174] ss:$8 sps:$4 sm:$0xff]  }
  0x39   :  { %809 = vmatprep.subr.bf16.mxu0 %v4222_v39  ;;  %1154 = vmatpush1.bf16.msra.mxu1 %v1144_v58  ;;  %v91_v39 = vpack.c.bf16 %v74_v37, %v73_v36  ;;  %v128_v58 = vld [vmem:[%s6071_s0 + $0xd1] sm:$0xff]  ;;  %v83_v3 = vld [vmem:[%s6071_s0 + $0xe8] sm:$0xff] }
  0x3a   :  { %1155 = vmatprep.subr.bf16.mxu1 %v4236_v56  ;;  %v141_v56 = vpack.c.bf16 %v127_v53, %v126_v52  ;;  %v659_v8 = vld [vmem:[%s6071_s0 + $0xa] sm:$0xff]  ;;  %v664_v34 = vld [vmem:[%s6071_s0 + $0x42] sm:$0xff] }
  0x3b   :  { %810 = vmatpush1.bf16.msra.mxu0 %v4220_v44  ;;  %v139_v44 = vpack.c.bf16 %v123_v41, %v122_v40  ;;  %v1004_v9 = vld [vmem:[%s6071_s0 + $0x3] sm:$0xff]  ;;  %v1005_v10 = vld [vmem:[%s6071_s0 + $0xb] sm:$0xff] }
  0x3c   :  { %811 = vmatprep.subr.bf16.mxu0 %v4225_v45  ;;  %v92_v45 = vpack.c.bf16 %v76_v43, %v75_v42  ;;  %v1028_v12 = vpack.c.bf16 %v1005_v10, %v1004_v9  ;;  %v4254_v19 = vld [vmem:[#allocation6 + $0x1a0] ss:$8 sps:$4 sm:$0xff]   ;;  %v666_v41 = vld [vmem:[%s6071_s0 + $0x52] sm:$0xff] }
  0x3d   :  { %1156 = vmatpush1.bf16.msra.mxu1 %v4234_v61  ;;  %v82_v61 = vld [vmem:[%s6071_s0 + $0xe0] sm:$0xff]  ;;  %v662_v24 = vld [vmem:[%s6071_s0 + $0x2a] sm:$0xff]  ;;  %v1012_v43 = vld [vmem:[%s6071_s0 + $0x53] sm:$0xff] }
  0x3e   :  { %3818 = vmatmul.mubr.msk.bf16.gmra.mxu0 %vm211_vm1, %v133_v46  ;;  %1157 = vmatprep.subr.bf16.mxu1 %v4242_v2  ;;  %v124_v46 = vld [vmem:[%s6071_s0 + $0xa9] sm:$0xff]  ;;  %v131_v2 = vld [vmem:[%s6071_s0 + $0xf1] sm:$0xff] }
  0x3f   :  { %3843 = vmatmul.mubr.msk.bf16.gmra.mxu1 %vm211_vm1, %v86_v47  ;;  %307 = vmatprep.mubr.bf16.mxu0 %v6081_v0  ;;  %v125_v47 = vld [vmem:[%s6071_s0 + $0xb1] sm:$0xff]  ;;  %v4260_v28 = vld [vmem:[#allocation6 + $0x180] ss:$8 sps:$4 sm:$0xff]  }
  0x40   :  { %557 = vmatprep.mubr.bf16.mxu1 %v6081_v0  ;;  %812 = vmatpush1.bf16.msra.mxu0 %v4223_v48  ;;  %v77_v48 = vld [vmem:[%s6071_s0 + $0xa8] sm:$0xff]  ;;  %v140_v50 = vpack.c.bf16 %v125_v47, %v124_v46 }
  0x41   :  { %813 = vmatprep.subr.bf16.mxu0 %v4228_v51  ;;  %1158 = vmatpush1.bf16.msra.mxu1 %v4240_v5  ;;  %v93_v51 = vpack.c.bf16 %v78_v49, %v77_v48  ;;  %v665_v35 = vld [vmem:[%s6071_s0 + $0x4a] sm:$0xff]  ;;  %v667_v42 = vld [vmem:[%s6071_s0 + $0x62] sm:$0xff]  ;;  %v669_v48 = vld [vmem:[%s6071_s0 + $0x72] sm:$0xff] }
  0x42   :  { %1159 = vmatprep.subr.bf16.mxu1 %v4245_v7  ;;  %v658_v7 = vld [vmem:[%s6071_s0 + $0x2] sm:$0xff]  ;;  %v1011_v37 = vld [vmem:[%s6071_s0 + $0x4b] sm:$0xff] }
  0x43   :  { %v1010_v36 = vld [vmem:[%s6071_s0 + $0x43] sm:$0xff]  ;;  %v1014_v49 = vld [vmem:[%s6071_s0 + $0x6b] sm:$0xff] }
  0x44   :  { %814 = vmatpush1.bf16.msra.mxu0 %v4226_v59  ;;  %v129_v59 = vld [vmem:[%s6071_s0 + $0xe1] sm:$0xff]  ;;  %v1031_v40 = vpack.c.bf16 %v1011_v37, %v1010_v36  ;;  %v668_v47 = vld [vmem:[%s6071_s0 + $0x6a] sm:$0xff] }
  0x45   :  { %815 = vmatprep.subr.bf16.mxu0 %v4231_v60  ;;  %1160 = vmatpush1.bf16.msra.mxu1 %v4243_v13  ;;  %v81_v60 = vld [vmem:[%s6071_s0 + $0xd0] sm:$0xff]  ;;  %v4256_v13 = vld [vmem:[#allocation6 + $0x1a4] ss:$8 sps:$4 sm:$0xff]  }
  0x46   :  { %3819 = vmatmul.mubr.msk.bf16.gmra.mxu0 %vm211_vm1, %v134_v62  ;;  %1161 = vmatprep.subr.bf16.mxu1 %v4248_v18  ;;  %v142_v62 = vpack.c.bf16 %v129_v59, %v128_v58  ;;  %v1007_v18 = vld [vmem:[%s6071_s0 + $0x23] sm:$0xff]  ;;  %v672_v59 = vld [vmem:[%s6071_s0 + $0x92] sm:$0xff] }
  0x47   :  { %3844 = vmatmul.mubr.msk.bf16.gmra.mxu1 %vm211_vm1, %v87_v63  ;;  %317 = vmatprep.mubr.bf16.mxu0 %v6081_v0  ;;  %v95_v63 = vpack.c.bf16 %v82_v61, %v81_v60  ;;  %v670_v53 = vld [vmem:[%s6071_s0 + $0x82] sm:$0xff]  ;;  %v671_v54 = vld [vmem:[%s6071_s0 + $0x8a] sm:$0xff]  ;;  %v1018_v61 = vld [vmem:[%s6071_s0 + $0x93] sm:$0xff] }
  0x48   :  { %567 = vmatprep.mubr.bf16.mxu1 %v6081_v0  ;;  %816 = vmatpush1.bf16.msra.mxu0 %v4229_v1  ;;  %v130_v1 = vld [vmem:[%s6071_s0 + $0xe9] sm:$0xff] }
  0x49   :  { %817 = vmatprep.subr.bf16.mxu0 %v4239_v4  ;;  %1162 = vmatpush1.bf16.msra.mxu1 %v4246_v20  ;;  %v84_v4 = vld [vmem:[%s6071_s0 + $0xf0] sm:$0xff]  ;;  %v143_v5 = vpack.c.bf16 %v131_v2, %v130_v1  ;;  %v1016_v55 = vld [vmem:[%s6071_s0 + $0x83] sm:$0xff] }
  0x4a   :  { %1163 = vmatprep.subr.bf16.mxu1 %v4251_v22  ;;  %v96_v6 = vpack.c.bf16 %v84_v4, %v83_v3  ;;  %v4259_v20 = vld [vmem:[#allocation6 + $0x194] ss:$8 sps:$4 sm:$0xff]   ;;  %v673_v60 = vld [vmem:[%s6071_s0 + $0xa2] sm:$0xff]  ;;  %v674_v2 = vld [vmem:[%s6071_s0 + $0xaa] sm:$0xff] }
  0x4b   :  { %v675_v3 = vld [vmem:[%s6071_s0 + $0xb2] sm:$0xff]  ;;  %v677_v9 = vld [vmem:[%s6071_s0 + $0xca] sm:$0xff] }
  0x4c   :  { %818 = vmatpush1.bf16.msra.mxu0 %v4237_v11  ;;  %v682_v11 = vpack.c.bf16 %v659_v8, %v658_v7  ;;  %v1020_v4 = vld [vmem:[%s6071_s0 + $0xab] sm:$0xff]  ;;  %v676_v8 = vld [vmem:[%s6071_s0 + $0xc2] sm:$0xff] }
  0x4d   :  { %3916 = vmatprep.subr.msk.bf16.mxu0 %vm248_vm0, %v3915_v14  ;;  %1164 = vmatpush1.bf16.msra.mxu1 %v4249_v25  ;;  %v660_v14 = vld [vmem:[%s6071_s0 + $0x12] sm:$0xff]  ;;  %v1022_v10 = vld [vmem:[%s6071_s0 + $0xc3] sm:$0xff] }
  0x4e   :  { %3820 = vmatmul.mubr.msk.bf16.gmra.mxu0 %vm211_vm1, %v135_v15  ;;  %v661_v15 = vld [vmem:[%s6071_s0 + $0x22] sm:$0xff]  ;;  %v663_v25 = vld [vmem:[%s6071_s0 + $0x32] sm:$0xff] }
  0x4f   :  { %3845 = vmatmul.mubr.msk.bf16.gmra.mxu1 %vm211_vm1, %v88_v16  ;;  %327 = vmatprep.mubr.bf16.mxu0 %v6081_v0  ;;  %v1006_v16 = vld [vmem:[%s6071_s0 + $0x13] sm:$0xff]  ;;  %v683_v21 = vpack.c.bf16 %v661_v15, %v660_v14  ;;  %v684_v30 = vpack.c.bf16 %v663_v25, %v662_v24  ;;  %v679_v15 = vld [vmem:[%s6071_s0 + $0xe2] sm:$0xff] }
  0x50   :  { %577 = vmatprep.mubr.bf16.mxu1 %v6081_v0  ;;  %v1029_v22 = vpack.c.bf16 %v1007_v18, %v1006_v16  ;;  %v678_v14 = vld [vmem:[%s6071_s0 + $0xd2] sm:$0xff]  ;;  %v1025_v18 = vld [vmem:[%s6071_s0 + $0xe3] sm:$0xff] }
  0x51   :  { %v1024_v16 = vld [vmem:[%s6071_s0 + $0xd3] sm:$0xff] }
  0x56   :  { %3821 = vmatmul.mubr.msk.bf16.gmra.mxu0 %vm211_vm1, %v136_v26  ;;  %v1008_v26 = vld [vmem:[%s6071_s0 + $0x2b] sm:$0xff] }
  0x57   :  { %3846 = vmatmul.mubr.msk.bf16.gmra.mxu1 %vm211_vm1, %v89_v27  ;;  %337 = vmatprep.mubr.bf16.mxu0 %v6081_v0  ;;  %v1009_v27 = vld [vmem:[%s6071_s0 + $0x33] sm:$0xff] }
  0x58   :  { %587 = vmatprep.mubr.bf16.mxu1 %v6081_v0  ;;  %v1030_v31 = vpack.c.bf16 %v1009_v27, %v1008_v26  ;;  %v1350_v26 = vld [vmem:[%s6071_s0 + $0x4] sm:$0xff]  ;;  %v1351_v27 = vld [vmem:[%s6071_s0 + $0xc] sm:$0xff] }
  0x5e   :  { %3822 = vmatmul.mubr.msk.bf16.gmra.mxu0 %vm211_vm1, %v137_v32  ;;  %v4263_v32 = vld [vmem:[#allocation6 + $0x170] ss:$8 sps:$4 sm:$0xff]  }
  0x5f   :  { %3847 = vmatmul.mubr.msk.bf16.gmra.mxu1 %vm211_vm1, %v90_v33  ;;  %347 = vmatprep.mubr.bf16.mxu0 %v6081_v0  ;;  %v4268_v33 = vld [vmem:[#allocation6 + $0x164] ss:$8 sps:$4 sm:$0xff]  }
  0x60   :  { %597 = vmatprep.mubr.bf16.mxu1 %v6081_v0 }
  0x66   :  { %3823 = vmatmul.mubr.msk.bf16.gmra.mxu0 %vm211_vm1, %v138_v38  ;;  %v4266_v38 = vld [vmem:[#allocation6 + $0x160] ss:$8 sps:$4 sm:$0xff]  }
  0x67   :  { %3848 = vmatmul.mubr.msk.bf16.gmra.mxu1 %vm211_vm1, %v91_v39  ;;  %357 = vmatprep.mubr.bf16.mxu0 %v6081_v0  ;;  %v685_v39 = vpack.c.bf16 %v665_v35, %v664_v34 }
  0x68   :  { %607 = vmatprep.mubr.bf16.mxu1 %v6081_v0 }
  0x6e   :  { %3824 = vmatmul.mubr.msk.bf16.gmra.mxu0 %vm211_vm1, %v139_v44  ;;  %v1013_v44 = vld [vmem:[%s6071_s0 + $0x63] sm:$0xff] }
  0x6f   :  { %3849 = vmatmul.mubr.msk.bf16.gmra.mxu1 %vm211_vm1, %v92_v45  ;;  %367 = vmatprep.mubr.bf16.mxu0 %v6081_v0  ;;  %v686_v45 = vpack.c.bf16 %v667_v42, %v666_v41  ;;  %v1032_v46 = vpack.c.bf16 %v1013_v44, %v1012_v43 }
  0x70   :  { %617 = vmatprep.mubr.bf16.mxu1 %v6081_v0 }
  0x76   :  { %3825 = vmatmul.mubr.msk.bf16.gmra.mxu0 %vm211_vm1, %v140_v50  ;;  %v1015_v50 = vld [vmem:[%s6071_s0 + $0x73] sm:$0xff] }
  0x77   :  { %3850 = vmatmul.mubr.msk.bf16.gmra.mxu1 %vm211_vm1, %v93_v51  ;;  %377 = vmatprep.mubr.bf16.mxu0 %v6081_v0  ;;  %v687_v51 = vpack.c.bf16 %v669_v48, %v668_v47  ;;  %v1033_v52 = vpack.c.bf16 %v1015_v50, %v1014_v49  ;;  %v1355_v47 = vld [vmem:[%s6071_s0 + $0x34] sm:$0xff] }
  0x78   :  { %627 = vmatprep.mubr.bf16.mxu1 %v6081_v0 }
  0x7e   :  { %3826 = vmatmul.mubr.msk.bf16.gmra.mxu0 %vm211_vm1, %v141_v56  ;;  %v1017_v56 = vld [vmem:[%s6071_s0 + $0x8b] sm:$0xff] }
  0x7f   :  { %3851 = vmatmul.mubr.msk.bf16.gmra.mxu1 %vm211_vm1, %v94_v57  ;;  %387 = vmatprep.mubr.bf16.mxu0 %v6081_v0  ;;  %v688_v57 = vpack.c.bf16 %v671_v54, %v670_v53  ;;  %v1034_v58 = vpack.c.bf16 %v1017_v56, %v1016_v55 }
  0x80   :  { %637 = vmatprep.mubr.bf16.mxu1 %v6081_v0 }
  0x86   :  { %3827 = vmatmul.mubr.msk.bf16.gmra.mxu0 %vm211_vm1, %v142_v62  ;;  %v1019_v62 = vld [vmem:[%s6071_s0 + $0xa3] sm:$0xff] }
  0x87   :  { %3852 = vmatmul.mubr.msk.bf16.gmra.mxu1 %vm211_vm1, %v95_v63  ;;  %397 = vmatprep.mubr.bf16.mxu0 %v6081_v0  ;;  %v689_v63 = vpack.c.bf16 %v673_v60, %v672_v59  ;;  %v1035_v1 = vpack.c.bf16 %v1019_v62, %v1018_v61  ;;  %v1356_v60 = vld [vmem:[%s6071_s0 + $0x44] sm:$0xff]  ;;  %v1357_v61 = vld [vmem:[%s6071_s0 + $0x4c] sm:$0xff] }
  0x88   :  { %647 = vmatprep.mubr.bf16.mxu1 %v6081_v0 }
  0x8e   :  { %3828 = vmatmul.mubr.msk.bf16.gmra.mxu0 %vm211_vm1, %v143_v5  ;;  %v1021_v5 = vld [vmem:[%s6071_s0 + $0xb3] sm:$0xff] }
  0x8f   :  { %3853 = vmatmul.mubr.msk.bf16.gmra.mxu1 %vm211_vm1, %v96_v6  ;;  %835 = vmatprep.mubr.bf16.mxu0 %v6081_v0  ;;  %v690_v6 = vpack.c.bf16 %v675_v3, %v674_v2  ;;  %v1036_v7 = vpack.c.bf16 %v1021_v5, %v1020_v4  ;;  %v1377_v4 = vpack.c.bf16 %v1357_v61, %v1356_v60 }
  0x90   :  { %1181 = vmatprep.mubr.bf16.mxu1 %v6081_v0 }
  0x96   :  { %3867 = vmatmul.mubr.msk.bf16.vlgmr.msra.gmra.mxu0 %vm211_vm1, %v682_v11  ;;  %v1023_v11 = vld [vmem:[%s6071_s0 + $0xcb] sm:$0xff] }
  0x97   :  { %3892 = vmatmul.mubr.msk.bf16.vlgmr.msra.gmra.mxu1 %vm211_vm1, %v1028_v12  ;;  %1500 = vmatpush1.bf16.msra.mxu0 %v4636_v17  ;;  %v4262_v17 = vld [vmem:[#allocation6 + $0x184] ss:$8 sps:$4 sm:$0xff]   ;;  %v691_v12 = vpack.c.bf16 %v677_v9, %v676_v8 }
  0x98   :  { %845 = vmatprep.mubr.bf16.mxu0 %v6081_v0  ;;  %1191 = vmatprep.mubr.bf16.mxu1 %v6081_v0 }
  0x99   :  { %1501 = vmatprep.subr.bf16.mxu0 %v4256_v13  ;;  %v1037_v13 = vpack.c.bf16 %v1023_v11, %v1022_v10  ;;  %v1358_v11 = vld [vmem:[%s6071_s0 + $0x54] sm:$0xff] }
  0x9b   :  { %1502 = vmatpush1.bf16.msra.mxu0 %v4254_v19  ;;  %v692_v19 = vpack.c.bf16 %v679_v15, %v678_v14 }
  0x9c   :  { %1503 = vmatprep.subr.bf16.mxu0 %v4259_v20  ;;  %v1038_v20 = vpack.c.bf16 %v1025_v18, %v1024_v16 }
  0x9e   :  { %3868 = vmatmul.mubr.msk.bf16.gmra.mxu0 %vm211_vm1, %v683_v21  ;;  %v680_v21 = vld [vmem:[%s6071_s0 + $0xea] sm:$0xff] }
  0x9f   :  { %3893 = vmatmul.mubr.msk.bf16.gmra.mxu1 %vm211_vm1, %v1029_v22  ;;  %855 = vmatprep.mubr.bf16.mxu0 %v6081_v0  ;;  %v681_v22 = vld [vmem:[%s6071_s0 + $0xf2] sm:$0xff] }
  0xa0   :  { %1201 = vmatprep.mubr.bf16.mxu1 %v6081_v0  ;;  %1504 = vmatpush1.bf16.msra.mxu0 %v4257_v23  ;;  %v1026_v23 = vld [vmem:[%s6071_s0 + $0xeb] sm:$0xff]  ;;  %v693_v24 = vpack.c.bf16 %v681_v22, %v680_v21 }
  0xa1   :  { %1505 = vmatprep.subr.bf16.mxu0 %v4262_v17  ;;  %v1027_v17 = vld [vmem:[%s6071_s0 + $0xf3] sm:$0xff] }
  0xa2   :  { %v1039_v25 = vpack.c.bf16 %v1027_v17, %v1026_v23 }
  0xa4   :  { %1506 = vmatpush1.bf16.msra.mxu0 %v4260_v28  ;;  %v1374_v28 = vpack.c.bf16 %v1351_v27, %v1350_v26  ;;  %v1361_v26 = vld [vmem:[%s6071_s0 + $0x74] sm:$0xff] }
  0xa5   :  { %1507 = vmatprep.subr.bf16.mxu0 %v4265_v29 }
  0xa6   :  { %3869 = vmatmul.mubr.msk.bf16.gmra.mxu0 %vm211_vm1, %v684_v30 }
  0xa7   :  { %3894 = vmatmul.mubr.msk.bf16.gmra.mxu1 %vm211_vm1, %v1030_v31  ;;  %865 = vmatprep.mubr.bf16.mxu0 %v6081_v0 }
  0xa8   :  { %1211 = vmatprep.mubr.bf16.mxu1 %v6081_v0  ;;  %1508 = vmatpush1.bf16.msra.mxu0 %v4263_v32  ;;  %v1352_v32 = vld [vmem:[%s6071_s0 + $0x14] sm:$0xff] }
  0xa9   :  { %1509 = vmatprep.subr.bf16.mxu0 %v4268_v33  ;;  %v1353_v33 = vld [vmem:[%s6071_s0 + $0x24] sm:$0xff] }
  0xac   :  { %1510 = vmatpush1.bf16.msra.mxu0 %v4266_v38 }
  0xae   :  { %3870 = vmatmul.mubr.msk.bf16.gmra.mxu0 %vm211_vm1, %v685_v39  ;;  %v1375_v39 = vpack.c.bf16 %v1353_v33, %v1352_v32 }
  0xaf   :  { %3895 = vmatmul.mubr.msk.bf16.gmra.mxu1 %vm211_vm1, %v1031_v40  ;;  %875 = vmatprep.mubr.bf16.mxu0 %v6081_v0 }
  0xb0   :  { %1221 = vmatprep.mubr.bf16.mxu1 %v6081_v0 }
  0xb6   :  { %3871 = vmatmul.mubr.msk.bf16.gmra.mxu0 %vm211_vm1, %v686_v45 }
  0xb7   :  { %3896 = vmatmul.mubr.msk.bf16.gmra.mxu1 %vm211_vm1, %v1032_v46  ;;  %885 = vmatprep.mubr.bf16.mxu0 %v6081_v0  ;;  %v1354_v46 = vld [vmem:[%s6071_s0 + $0x2c] sm:$0xff] }
  0xb8   :  { %1231 = vmatprep.mubr.bf16.mxu1 %v6081_v0  ;;  %v1376_v53 = vpack.c.bf16 %v1355_v47, %v1354_v46  ;;  %v1363_v46 = vld [vmem:[%s6071_s0 + $0x8c] sm:$0xff] }
  0xbe   :  { %3872 = vmatmul.mubr.msk.bf16.gmra.mxu0 %vm211_vm1, %v687_v51 }
  0xbf   :  { %3897 = vmatmul.mubr.msk.bf16.gmra.mxu1 %vm211_vm1, %v1033_v52  ;;  %895 = vmatprep.mubr.bf16.mxu0 %v6081_v0 }
  0xc0   :  { %1241 = vmatprep.mubr.bf16.mxu1 %v6081_v0 }
  0xc6   :  { %3873 = vmatmul.mubr.msk.bf16.gmra.mxu0 %vm211_vm1, %v688_v57 }
  0xc7   :  { %3898 = vmatmul.mubr.msk.bf16.gmra.mxu1 %vm211_vm1, %v1034_v58  ;;  %905 = vmatprep.mubr.bf16.mxu0 %v6081_v0 }
  0xc8   :  { %1251 = vmatprep.mubr.bf16.mxu1 %v6081_v0 }
  0xce   :  { %3874 = vmatmul.mubr.msk.bf16.gmra.mxu0 %vm211_vm1, %v689_v63 }
  0xcf   :  { %3899 = vmatmul.mubr.msk.bf16.gmra.mxu1 %vm211_vm1, %v1035_v1  ;;  %915 = vmatprep.mubr.bf16.mxu0 %v6081_v0 }
  0xd0   :  { %1261 = vmatprep.mubr.bf16.mxu1 %v6081_v0 }
  0xd6   :  { %3875 = vmatmul.mubr.msk.bf16.gmra.mxu0 %vm211_vm1, %v690_v6 }
  0xd7   :  { %3900 = vmatmul.mubr.msk.bf16.gmra.mxu1 %vm211_vm1, %v1036_v7  ;;  %925 = vmatprep.mubr.bf16.mxu0 %v6081_v0 }
  0xd8   :  { %1271 = vmatprep.mubr.bf16.mxu1 %v6081_v0 }
  0xde   :  { %3876 = vmatmul.mubr.msk.bf16.gmra.mxu0 %vm211_vm1, %v691_v12  ;;  %v1359_v12 = vld [vmem:[%s6071_s0 + $0x64] sm:$0xff] }
  0xdf   :  { %3901 = vmatmul.mubr.msk.bf16.gmra.mxu1 %vm211_vm1, %v1037_v13  ;;  %935 = vmatprep.mubr.bf16.mxu0 %v6081_v0 }
  0xe0   :  { %1281 = vmatprep.mubr.bf16.mxu1 %v6081_v0 }
  0xe6   :  { %3877 = vmatmul.mubr.msk.bf16.gmra.mxu0 %vm211_vm1, %v692_v19  ;;  %v1378_v19 = vpack.c.bf16 %v1359_v12, %v1358_v11 }
  0xe7   :  { %3902 = vmatmul.mubr.msk.bf16.gmra.mxu1 %vm211_vm1, %v1038_v20  ;;  %945 = vmatprep.mubr.bf16.mxu0 %v6081_v0 }
  0xe8   :  { %1291 = vmatprep.mubr.bf16.mxu1 %v6081_v0 }
  0xee   :  { %3878 = vmatmul.mubr.msk.bf16.gmra.mxu0 %vm211_vm1, %v693_v24 }
  0xef   :  { %3903 = vmatmul.mubr.msk.bf16.gmra.mxu1 %vm211_vm1, %v1039_v25  ;;  %1527 = vmatprep.mubr.bf16.mxu0 %v6081_v0  ;;  %v1360_v25 = vld [vmem:[%s6071_s0 + $0x6c] sm:$0xff] }
  0xf0   :  { %2061 = vmatprep.mubr.bf16.mxu1 %v6081_v0  ;;  %v1379_v33 = vpack.c.bf16 %v1361_v26, %v1360_v25  ;;  %v1366_v25 = vld [vmem:[%s6071_s0 + $0xac] sm:$0xff]  ;;  %v1367_v26 = vld [vmem:[%s6071_s0 + $0xb4] sm:$0xff] }
  0xf6   :  { %v289_v29 = vpop.f32.mrf.mxu0  ;;  %3917 = vmatmul.mubr.msk.bf16.vlgmr.msra.gmra.mxu0 %vm211_vm1, %v1374_v28 }
  0xf7   :  { %v539_v30 = vpop.f32.mrf.mxu1  ;;  %1537 = vmatprep.mubr.bf16.mxu0 %v6081_v0 }
  0xf8   :  { %v4971_v31 = vadd.f32 %v539_v30, %v289_v29  ;;  %v291_v34 = vpop.f32.mrf.mxu0 }
  0xf9   :  { %v541_v35 = vpop.f32.mrf.mxu1 }
  0xfa   :  { %v4980_v36 = vadd.f32 %v541_v35, %v291_v34  ;;  %v293_v37 = vpop.f32.mrf.mxu0 }
  0xfb   :  { %v543_v38 = vpop.f32.mrf.mxu1 }
  0xfc   :  { %v4982_v40 = vadd.f32 %v543_v38, %v293_v37  ;;  %v4984_v41 = vpop.f32.mrf.mxu0 }
  0xfd   :  { %v4986_v42 = vpop.f32.mrf.mxu1 }
  0xfe   :  { %v299_v43 = vpop.f32.mrf.mxu0  ;;  %3918 = vmatmul.mubr.msk.bf16.gmra.mxu0 %vm211_vm1, %v1375_v39 }
  0xff   :  { %v549_v44 = vpop.f32.mrf.mxu1  ;;  %1547 = vmatprep.mubr.bf16.mxu0 %v6081_v0 }
 0x100   :  { %v4989_v45 = vadd.f32 %v549_v44, %v299_v43  ;;  %v301_v48 = vpop.f32.mrf.mxu0  ;;  %v1362_v44 = vld [vmem:[%s6071_s0 + $0x84] sm:$0xff] }
 0x101   :  { %v551_v49 = vpop.f32.mrf.mxu1 }
 0x102   :  { %v4998_v50 = vadd.f32 %v551_v49, %v301_v48  ;;  %v303_v51 = vpop.f32.mrf.mxu0 }
 0x103   :  { %v553_v52 = vpop.f32.mrf.mxu1 }
 0x104   :  { %v5000_v54 = vadd.f32 %v553_v52, %v303_v51  ;;  %v5002_v55 = vpop.f32.mrf.mxu0 }
 0x105   :  { %6084 = vst [vmem:[#allocation12_spill] sm:$0xff] %v5002_v55  ;;  %v5004_v56 = vpop.f32.mrf.mxu1 }
 0x106   :  { %6085 = vst [vmem:[#allocation13_spill] sm:$0xff] %v5004_v56  ;;  %v309_v57 = vpop.f32.mrf.mxu0  ;;  %3919 = vmatmul.mubr.msk.bf16.gmra.mxu0 %vm211_vm1, %v1376_v53  ;;  %v1380_v53 = vpack.c.bf16 %v1363_v46, %v1362_v44 }
 0x107   :  { %v559_v58 = vpop.f32.mrf.mxu1  ;;  %1557 = vmatprep.mubr.bf16.mxu0 %v6081_v0 }
 0x108   :  { %v5007_v59 = vadd.f32 %v559_v58, %v309_v57  ;;  %v311_v62 = vpop.f32.mrf.mxu0 }
 0x109   :  { %v561_v63 = vpop.f32.mrf.mxu1 }
 0x10a   :  { %v5016_v1 = vadd.f32 %v561_v63, %v311_v62  ;;  %v313_v2 = vpop.f32.mrf.mxu0 }
 0x10b   :  { %v563_v3 = vpop.f32.mrf.mxu1 }
 0x10c   :  { %v5018_v5 = vadd.f32 %v563_v3, %v313_v2  ;;  %v5020_v6 = vpop.f32.mrf.mxu0  ;;  %v1364_v2 = vld [vmem:[%s6071_s0 + $0x94] sm:$0xff]  ;;  %v1365_v3 = vld [vmem:[%s6071_s0 + $0xa4] sm:$0xff] }
 0x10d   :  { %v5022_v7 = vpop.f32.mrf.mxu1 }
 0x10e   :  { %v319_v8 = vpop.f32.mrf.mxu0  ;;  %3920 = vmatmul.mubr.msk.bf16.gmra.mxu0 %vm211_vm1, %v1377_v4 }
 0x10f   :  { %v569_v9 = vpop.f32.mrf.mxu1  ;;  %1567 = vmatprep.mubr.bf16.mxu0 %v6081_v0 }
 0x110   :  { %v5025_v10 = vadd.f32 %v569_v9, %v319_v8  ;;  %v321_v13 = vpop.f32.mrf.mxu0 }
 0x111   :  { %v571_v14 = vpop.f32.mrf.mxu1 }
 0x112   :  { %v5034_v15 = vadd.f32 %v571_v14, %v321_v13  ;;  %v323_v16 = vpop.f32.mrf.mxu0  ;;  %v1381_v13 = vpack.c.bf16 %v1365_v3, %v1364_v2 }
 0x113   :  { %v573_v18 = vpop.f32.mrf.mxu1 }
 0x114   :  { %v5036_v20 = vadd.f32 %v573_v18, %v323_v16  ;;  %v5038_v21 = vpop.f32.mrf.mxu0 }
 0x115   :  { %v5040_v22 = vpop.f32.mrf.mxu1 }
 0x116   :  { %v329_v23 = vpop.f32.mrf.mxu0  ;;  %3921 = vmatmul.mubr.msk.bf16.gmra.mxu0 %vm211_vm1, %v1378_v19 }
 0x117   :  { %v579_v17 = vpop.f32.mrf.mxu1  ;;  %1577 = vmatprep.mubr.bf16.mxu0 %v6081_v0 }
 0x118   :  { %v5043_v24 = vadd.f32 %v579_v17, %v329_v23  ;;  %v331_v27 = vpop.f32.mrf.mxu0 }
 0x119   :  { %v581_v28 = vpop.f32.mrf.mxu1 }
 0x11a   :  { %v5052_v29 = vadd.f32 %v581_v28, %v331_v27  ;;  %v333_v30 = vpop.f32.mrf.mxu0 }
 0x11b   :  { %v583_v32 = vpop.f32.mrf.mxu1 }
 0x11c   :  { %v5054_v34 = vadd.f32 %v583_v32, %v333_v30  ;;  %v5056_v35 = vpop.f32.mrf.mxu0 }
 0x11d   :  { %v5058_v37 = vpop.f32.mrf.mxu1 }
 0x11e   :  { %v339_v38 = vpop.f32.mrf.mxu0  ;;  %3922 = vmatmul.mubr.msk.bf16.gmra.mxu0 %vm211_vm1, %v1379_v33 }
 0x11f   :  { %v589_v39 = vpop.f32.mrf.mxu1  ;;  %1587 = vmatprep.mubr.bf16.mxu0 %v6081_v0 }
 0x120   :  { %v5061_v43 = vadd.f32 %v589_v39, %v339_v38  ;;  %v341_v47 = vpop.f32.mrf.mxu0  ;;  %v1382_v38 = vpack.c.bf16 %v1367_v26, %v1366_v25 }
 0x121   :  { %v591_v48 = vpop.f32.mrf.mxu1 }
 0x122   :  { %v5070_v49 = vadd.f32 %v591_v48, %v341_v47  ;;  %v343_v51 = vpop.f32.mrf.mxu0 }
 0x123   :  { %v593_v52 = vpop.f32.mrf.mxu1 }
 0x124   :  { %v5072_v57 = vadd.f32 %v593_v52, %v343_v51  ;;  %v5074_v58 = vpop.f32.mrf.mxu0  ;;  %v1368_v52 = vld [vmem:[%s6071_s0 + $0xc4] sm:$0xff] }
 0x125   :  { %v5076_v60 = vpop.f32.mrf.mxu1 }
 0x126   :  { %v349_v61 = vpop.f32.mrf.mxu0  ;;  %3923 = vmatmul.mubr.msk.bf16.gmra.mxu0 %vm211_vm1, %v1380_v53  ;;  %v1369_v53 = vld [vmem:[%s6071_s0 + $0xcc] sm:$0xff] }
 0x127   :  { %v599_v62 = vpop.f32.mrf.mxu1  ;;  %1597 = vmatprep.mubr.bf16.mxu0 %v6081_v0 }
 0x128   :  { %v5079_v63 = vadd.f32 %v599_v62, %v349_v61  ;;  %v351_v4 = vpop.f32.mrf.mxu0 }
 0x129   :  { %v601_v8 = vpop.f32.mrf.mxu1 }
 0x12a   :  { %v5088_v9 = vadd.f32 %v601_v8, %v351_v4  ;;  %v353_v11 = vpop.f32.mrf.mxu0  ;;  %v1383_v8 = vpack.c.bf16 %v1369_v53, %v1368_v52 }
 0x12b   :  { %v603_v12 = vpop.f32.mrf.mxu1 }
 0x12c   :  { %v5090_v14 = vadd.f32 %v603_v12, %v353_v11  ;;  %v5092_v16 = vpop.f32.mrf.mxu0 }
 0x12d   :  { %v5094_v18 = vpop.f32.mrf.mxu1 }
 0x12e   :  { %v359_v19 = vpop.f32.mrf.mxu0  ;;  %3924 = vmatmul.mubr.msk.bf16.gmra.mxu0 %vm211_vm1, %v1381_v13 }
 0x12f   :  { %v609_v23 = vpop.f32.mrf.mxu1  ;;  %1607 = vmatprep.mubr.bf16.mxu0 %v6081_v0 }
 0x130   :  { %v5097_v17 = vadd.f32 %v609_v23, %v359_v19  ;;  %v361_v27 = vpop.f32.mrf.mxu0  ;;  %v3944_v19 = vld [vmem:[%s6074_s3 + $0xe8] sm:$0xff] }
 0x131   :  { %v611_v28 = vpop.f32.mrf.mxu1  ;;  %v3960_v26 = vcombine.high %v3944_v19, %v3944_v19 }
 0x132   :  { %v5106_v30 = vadd.f32 %v611_v28, %v361_v27  ;;  %v363_v32 = vpop.f32.mrf.mxu0  ;;  %v3959_v27 = vcombine.low %v3944_v19, %v3944_v19 }
 0x133   :  { %v613_v33 = vpop.f32.mrf.mxu1  ;;  %3961 = vmatprep.subr.msk.bf16.mxu1 %vm2022_vm2, %v3960_v26 }
 0x134   :  { %v5108_v39 = vadd.f32 %v613_v33, %v363_v32  ;;  %v5110_v44 = vpop.f32.mrf.mxu0  ;;  %v1370_v32 = vld [vmem:[%s6071_s0 + $0xd4] sm:$0xff]  ;;  %v1371_v33 = vld [vmem:[%s6071_s0 + $0xe4] sm:$0xff] }
 0x135   :  { %v5112_v46 = vpop.f32.mrf.mxu1 }
 0x136   :  { %v369_v47 = vpop.f32.mrf.mxu0  ;;  %3925 = vmatmul.mubr.msk.bf16.gmra.mxu0 %vm211_vm1, %v1382_v38 }
 0x137   :  { %v619_v48 = vpop.f32.mrf.mxu1  ;;  %1617 = vmatprep.mubr.bf16.mxu0 %v6081_v0 }
 0x138   :  { %v5115_v51 = vadd.f32 %v619_v48, %v369_v47  ;;  %v371_v61 = vpop.f32.mrf.mxu0  ;;  %v2024_v48 = vsel %vm2022_vm2, %v3959_v27, 0  ;;  %v1372_v27 = vld [vmem:[%s6071_s0 + $0xec] sm:$0xff] }
 0x139   :  { %v621_v62 = vpop.f32.mrf.mxu1  ;;  %2030 = vmatpush1.bf16.msra.mxu1 %v2024_v48 }
 0x13a   :  { %v5124_v2 = vadd.f32 %v621_v62, %v371_v61  ;;  %v373_v3 = vpop.f32.mrf.mxu0  ;;  %v1384_v62 = vpack.c.bf16 %v1371_v33, %v1370_v32  ;;  %v1373_v32 = vld [vmem:[%s6071_s0 + $0xf4] sm:$0xff] }
 0x13b   :  { %v623_v4 = vpop.f32.mrf.mxu1 }
 0x13c   :  { %v5126_v11 = vadd.f32 %v623_v4, %v373_v3  ;;  %v5128_v12 = vpop.f32.mrf.mxu0 }
 0x13d   :  { %6086 = vst [vmem:[#allocation14_spill] sm:$0xff] %v5128_v12  ;;  %v5130_v13 = vpop.f32.mrf.mxu1 }
 0x13e   :  { %6087 = vst [vmem:[#allocation15_spill] sm:$0xff] %v5130_v13  ;;  %v379_v23 = vpop.f32.mrf.mxu0  ;;  %3926 = vmatmul.mubr.msk.bf16.gmra.mxu0 %vm211_vm1, %v1383_v8  ;;  %v4290_v13 = vld [vmem:[%s6074_s3 + $0x1ac] ss:$8 sps:$4 sm:$0xff]  }
 0x13f   :  { %v629_v25 = vpop.f32.mrf.mxu1  ;;  %1627 = vmatprep.mubr.bf16.mxu0 %v6081_v0 }
 0x140   :  { %v5136_v28 = vadd.f32 %v629_v25, %v379_v23  ;;  %v381_v38 = vpop.f32.mrf.mxu0  ;;  %v4037_v25 = vld [vmem:[%s6074_s3 + $0x1d8] sm:$0xff] }
 0x141   :  { %v631_v47 = vpop.f32.mrf.mxu1  ;;  %v4053_v33 = vcombine.high %v4037_v25, %v4037_v25 }
 0x142   :  { %v5147_v52 = vadd.f32 %v631_v47, %v381_v38  ;;  %v383_v53 = vpop.f32.mrf.mxu0  ;;  %v4052_v38 = vcombine.low %v4037_v25, %v4037_v25  ;;  %v4278_v25 = vld [vmem:[%s6074_s3 + $0x1cc] ss:$8 sps:$4 sm:$0xff]  }
 0x143   :  { %v633_v61 = vpop.f32.mrf.mxu1  ;;  %4054 = vmatprep.subr.msk.bf16.mxu0 %vm2022_vm2, %v4053_v33  ;;  %v4271_v33 = vld [vmem:[%s6074_s3 + $0xd8] ss:$8 sps:$4 sm:$0xff]  }
 0x144   :  { %v5149_v3 = vadd.f32 %v633_v61, %v383_v53  ;;  %v5151_v4 = vpop.f32.mrf.mxu0  ;;  %v2594_v61 = vsel %vm2022_vm2, %v4052_v38, 0 }
 0x145   :  { %6088 = vst [vmem:[#allocation16_spill] sm:$0xff] %v5151_v4  ;;  %v5153_v8 = vpop.f32.mrf.mxu1  ;;  %2600 = vmatpush1.bf16.msra.mxu0 %v2594_v61  ;;  %v4287_v4 = vld [vmem:[%s6074_s3 + $0xbc] ss:$8 sps:$4 sm:$0xff]  }
 0x146   :  { %6089 = vst [vmem:[#allocation17_spill] sm:$0xff] %v5153_v8  ;;  %v389_v19 = vpop.f32.mrf.mxu0  ;;  %3927 = vmatmul.mubr.msk.bf16.gmra.mxu0 %vm211_vm1, %v1384_v62  ;;  %v4273_v8 = vld [vmem:[%s6074_s3 + $0xdc] ss:$8 sps:$4 sm:$0xff]   ;;  %2601 = vmatprep.subr.bf16.mxu0 %v4278_v25 }
 0x147   :  { %v639_v23 = vpop.f32.mrf.mxu1  ;;  %1637 = vmatprep.mubr.bf16.mxu0 %v6081_v0  ;;  %2031 = vmatprep.subr.bf16.mxu1 %v4273_v8 }
 0x148   :  { %v5159_v26 = vadd.f32 %v639_v23, %v389_v19  ;;  %v391_v47 = vpop.f32.mrf.mxu0  ;;  %v1385_v23 = vpack.c.bf16 %v1373_v32, %v1372_v27  ;;  %v4276_v27 = vld [vmem:[%s6074_s3 + $0x1c8] ss:$8 sps:$4 sm:$0xff]   ;;  %2032 = vmatpush1.bf16.msra.mxu1 %v4271_v33  ;;  %v4282_v33 = vld [vmem:[%s6074_s3 + $0x1b8] ss:$8 sps:$4 sm:$0xff]  }
 0x149   :  { %v641_v48 = vpop.f32.mrf.mxu1  ;;  %2602 = vmatpush1.bf16.msra.mxu0 %v4276_v27 }
 0x14a   :  { %v5168_v53 = vadd.f32 %v641_v48, %v391_v47  ;;  %v393_v62 = vpop.f32.mrf.mxu0 }
 0x14b   :  { %v643_v19 = vpop.f32.mrf.mxu1 }
 0x14c   :  { %v5172_v0 = vadd.f32 %v643_v19, %v393_v62  ;;  %v5180_v47 = vpop.f32.mrf.mxu0  ;;  %v4281_v62 = vld [vmem:[%s6074_s3 + $0xcc] ss:$8 sps:$4 sm:$0xff]   ;;  %v4284_v19 = vld [vmem:[%s6074_s3 + $0x1bc] ss:$8 sps:$4 sm:$0xff]  }
 0x14d   :  { %6090 = vst [vmem:[#allocation18_spill] sm:$0xff] %v5180_v47  ;;  %v5182_v48 = vpop.f32.mrf.mxu1  ;;  %2033 = vmatprep.subr.bf16.mxu1 %v4281_v62  ;;  %2603 = vmatprep.subr.bf16.mxu0 %v4284_v19  ;;  %v4285_v62 = vld [vmem:[%s6074_s3 + $0xb8] ss:$8 sps:$4 sm:$0xff]   ;;  %v4288_v19 = vld [vmem:[%s6074_s3 + $0x1a8] ss:$8 sps:$4 sm:$0xff]  }
 0x14e   :  { %6091 = vst [vmem:[#allocation19_spill] sm:$0xff] %v5182_v48  ;;  %v399_v32 = vpop.f32.mrf.mxu0  ;;  %3928 = vmatmul.mubr.msk.bf16.gmra.mxu0 %vm211_vm1, %v1385_v23  ;;  %v6092_v48 = vmov 0   ;;  %v4279_v23 = vld [vmem:[%s6074_s3 + $0xc8] ss:$8 sps:$4 sm:$0xff]  }
 0x14f   :  { %v649_v38 = vpop.f32.mrf.mxu1  ;;  %2631 = vmatprep.mubr.bf16.mxu0 %v6092_v48  ;;  %2034 = vmatpush1.bf16.msra.mxu1 %v4279_v23  ;;  %v4302_v48 = vld [vmem:[%s6074_s3 + $0x18c] ss:$8 sps:$4 sm:$0xff]  }
 0x150   :  { %v5191_v61 = vadd.f32 %v649_v38, %v399_v32  ;;  %v401_v8 = vpop.f32.mrf.mxu0  ;;  %2604 = vmatpush1.bf16.msra.mxu0 %v4282_v33  ;;  %2035 = vmatprep.subr.bf16.mxu1 %v4287_v4 }
 0x151   :  { %v651_v25 = vpop.f32.mrf.mxu1  ;;  %2605 = vmatprep.subr.bf16.mxu0 %v4290_v13  ;;  %v4291_v13 = vld [vmem:[%s6074_s3 + $0xa8] ss:$8 sps:$4 sm:$0xff]  }
 0x152   :  { %v5206_v27 = vadd.f32 %v651_v25, %v401_v8  ;;  %v403_v32 = vpop.f32.mrf.mxu0 }
 0x153   :  { %v653_v38 = vpop.f32.mrf.mxu1  ;;  %2036 = vmatpush1.bf16.msra.mxu1 %v4285_v62 }
 0x154   :  { %v5208_v47 = vadd.f32 %v653_v38, %v403_v32  ;;  %v5216_v12 = vpop.f32.mrf.mxu0  ;;  %2606 = vmatpush1.bf16.msra.mxu0 %v4288_v19  ;;  %v4293_v32 = vld [vmem:[%s6074_s3 + $0xac] ss:$8 sps:$4 sm:$0xff]   ;;  %v4296_v38 = vld [vmem:[%s6074_s3 + $0x19c] ss:$8 sps:$4 sm:$0xff]  }
 0x155   :  { %6093 = vst [vmem:[#allocation20_spill] sm:$0xff] %v5216_v12  ;;  %v5218_v8 = vpop.f32.mrf.mxu1  ;;  %2037 = vmatprep.subr.bf16.mxu1 %v4293_v32  ;;  %2607 = vmatprep.subr.bf16.mxu0 %v4296_v38 }
 0x156   :  { %6094 = vst [vmem:[#allocation21_spill] sm:$0xff] %v5218_v8  ;;  %v837_v25 = vpop.f32.mrf.mxu0 }
 0x157   :  { %v5226_v23 = vpop.f32.mrf.mxu1  ;;  %v5229_v33 = vadd.f32 %v837_v25, %v4971_v31  ;;  %v4294_v31 = vld [vmem:[%s6074_s3 + $0x198] ss:$8 sps:$4 sm:$0xff]   ;;  %2038 = vmatpush1.bf16.msra.mxu1 %v4291_v13  ;;  %v4299_v25 = vld [vmem:[%s6074_s3 + $0x9c] ss:$8 sps:$4 sm:$0xff]   ;;  %v4305_v13 = vld [vmem:[%s6074_s3 + $0x8c] ss:$8 sps:$4 sm:$0xff]  }
 0x158   :  { %v839_v8 = vpop.f32.mrf.mxu0  ;;  %2608 = vmatpush1.bf16.msra.mxu0 %v4294_v31  ;;  %2039 = vmatprep.subr.bf16.mxu1 %v4299_v25  ;;  %v4308_v31 = vld [vmem:[%s6074_s3 + $0x17c] ss:$8 sps:$4 sm:$0xff]  }
 0x159   :  { %v5237_v12 = vpop.f32.mrf.mxu1  ;;  %v5246_v4 = vadd.f32 %v839_v8, %v4980_v36  ;;  %v4297_v8 = vld [vmem:[%s6074_s3 + $0x98] ss:$8 sps:$4 sm:$0xff]   ;;  %2609 = vmatprep.subr.bf16.mxu0 %v4302_v48  ;;  %v4303_v48 = vld [vmem:[%s6074_s3 + $0x88] ss:$8 sps:$4 sm:$0xff]  }
 0x15a   :  { %v841_v62 = vpop.f32.mrf.mxu0 }
 0x15b   :  { %v5249_v19 = vadd.f32 %v841_v62, %v4982_v40  ;;  %v5259_v36 = vpop.f32.mrf.mxu1  ;;  %v4300_v40 = vld [vmem:[%s6074_s3 + $0x188] ss:$8 sps:$4 sm:$0xff]   ;;  %2040 = vmatpush1.bf16.msra.mxu1 %v4297_v8 }
 0x15c   :  { %v5257_v56 = vpop.f32.mrf.mxu0  ;;  %2610 = vmatpush1.bf16.msra.mxu0 %v4300_v40  ;;  %2041 = vmatprep.subr.bf16.mxu1 %v4305_v13 }
 0x15d   :  { %v5276_v62 = vpop.f32.mrf.mxu1  ;;  %2611 = vmatprep.subr.bf16.mxu0 %v4308_v31 }
 0x15e   :  { %v847_v32 = vpop.f32.mrf.mxu0  ;;  %6096 = vst [vmem:[#allocation23_spill] sm:$0xff] %v5276_v62 }
 0x15f   :  { %v5268_v38 = vadd.f32 %v847_v32, %v4989_v45  ;;  %v4306_v45 = vld [vmem:[%s6074_s3 + $0x178] ss:$8 sps:$4 sm:$0xff]   ;;  %2042 = vmatpush1.bf16.msra.mxu1 %v4303_v48  ;;  %v4311_v32 = vld [vmem:[%s6074_s3 + $0x7c] ss:$8 sps:$4 sm:$0xff]   ;;  %v5296_v62 = vpop.f32.mrf.mxu1 }
 0x160   :  { %v849_v55 = vpop.f32.mrf.mxu0  ;;  %2612 = vmatpush1.bf16.msra.mxu0 %v4306_v45  ;;  %2043 = vmatprep.subr.bf16.mxu1 %v4311_v32 }
 0x161   :  { %6095 = vst [vmem:[#allocation22_spill] sm:$0xff] %v5268_v38  ;;  %v5285_v25 = vadd.f32 %v849_v55, %v4998_v50  ;;  %v4314_v38 = vld [vmem:[%s6074_s3 + $0x16c] ss:$8 sps:$4 sm:$0xff]   ;;  %v4309_v55 = vld [vmem:[%s6074_s3 + $0x78] ss:$8 sps:$4 sm:$0xff]   ;;  %v5309_v48 = vpop.f32.mrf.mxu1 }
 0x162   :  { %v851_v8 = vpop.f32.mrf.mxu0  ;;  %2613 = vmatprep.subr.bf16.mxu0 %v4314_v38 }
 0x163   :  { %6097 = vst [vmem:[#allocation24_spill] sm:$0xff] %v5285_v25  ;;  %v5288_v40 = vadd.f32 %v851_v8, %v5000_v54  ;;  %v4312_v54 = vld [vmem:[%s6074_s3 + $0x168] ss:$8 sps:$4 sm:$0xff]   ;;  %2044 = vmatpush1.bf16.msra.mxu1 %v4309_v55  ;;  %v5319_v38 = vpop.f32.mrf.mxu1 }
 0x164   :  { %v5298_v50 = vpop.f32.mrf.mxu0  ;;  %2614 = vmatpush1.bf16.msra.mxu0 %v4312_v54 }
 0x165   :  { %6098 = vst [vmem:[#allocation25_spill] sm:$0xff] %v5288_v40  ;;  %6099 = vst [vmem:[#allocation26_spill] sm:$0xff] %v5298_v50  ;;  %v566_v50 = vadd.f32 %v5022_v7, %v5020_v6 }
 0x166   :  { %v857_v13 = vpop.f32.mrf.mxu0 }
 0x167   :  { %v5307_v31 = vadd.f32 %v857_v13, %v5007_v59  ;;  %v5326_v13 = vpop.f32.mrf.mxu1 }
 0x168   :  { %v859_v45 = vpop.f32.mrf.mxu0 }
 0x169   :  { %v5312_v8 = vadd.f32 %v859_v45, %v5016_v1  ;;  %v5336_v7 = vpop.f32.mrf.mxu1 }
 0x16a   :  { %v861_v40 = vpop.f32.mrf.mxu0 }
 0x16b   :  { %6100 = vst [vmem:[#allocation27_spill] sm:$0xff] %v5312_v8  ;;  %v5317_v25 = vadd.f32 %v861_v40, %v5018_v5  ;;  %v576_v5 = vadd.f32 %v5040_v22, %v5038_v21 }
 0x16c   :  { %v863_v32 = vpop.f32.mrf.mxu0 }
 0x16d   :  { %v5321_v55 = vadd.f32 %v863_v32, %v566_v50 }
 0x16e   :  { %v867_v59 = vpop.f32.mrf.mxu0 }
 0x16f   :  { %v5324_v54 = vadd.f32 %v867_v59, %v5025_v10  ;;  %v5343_v59 = vpop.f32.mrf.mxu1 }
 0x170   :  { %v869_v1 = vpop.f32.mrf.mxu0 }
 0x171   :  { %v5329_v45 = vadd.f32 %v869_v1, %v5034_v15  ;;  %v5353_v22 = vpop.f32.mrf.mxu1 }
 0x172   :  { %v871_v8 = vpop.f32.mrf.mxu0 }
 0x173   :  { %6101 = vst [vmem:[#allocation28_spill] sm:$0xff] %v5329_v45  ;;  %v5334_v6 = vadd.f32 %v871_v8, %v5036_v20  ;;  %v586_v20 = vadd.f32 %v5058_v37, %v5056_v35 }
 0x174   :  { %v873_v40 = vpop.f32.mrf.mxu0 }
 0x175   :  { %v5338_v50 = vadd.f32 %v873_v40, %v576_v5 }
 0x176   :  { %v877_v10 = vpop.f32.mrf.mxu0 }
 0x177   :  { %v5341_v32 = vadd.f32 %v877_v10, %v5043_v24  ;;  %v5360_v10 = vpop.f32.mrf.mxu1 }
 0x178   :  { %v879_v15 = vpop.f32.mrf.mxu0 }
 0x179   :  { %v5346_v1 = vadd.f32 %v879_v15, %v5052_v29  ;;  %v5370_v37 = vpop.f32.mrf.mxu1 }
 0x17a   :  { %v881_v45 = vpop.f32.mrf.mxu0 }
 0x17b   :  { %6102 = vst [vmem:[#allocation29_spill] sm:$0xff] %v5346_v1  ;;  %v5351_v21 = vadd.f32 %v881_v45, %v5054_v34  ;;  %v596_v34 = vadd.f32 %v5076_v60, %v5074_v58 }
 0x17c   :  { %v883_v8 = vpop.f32.mrf.mxu0 }
 0x17d   :  { %v5355_v5 = vadd.f32 %v883_v8, %v586_v20 }
 0x17e   :  { %v887_v24 = vpop.f32.mrf.mxu0 }
 0x17f   :  { %v5358_v40 = vadd.f32 %v887_v24, %v5061_v43  ;;  %v5377_v24 = vpop.f32.mrf.mxu1 }
 0x180   :  { %v889_v29 = vpop.f32.mrf.mxu0 }
 0x181   :  { %v5363_v15 = vadd.f32 %v889_v29, %v5070_v49  ;;  %v5387_v60 = vpop.f32.mrf.mxu1 }
 0x182   :  { %v891_v1 = vpop.f32.mrf.mxu0 }
 0x183   :  { %6103 = vst [vmem:[#allocation30_spill] sm:$0xff] %v5363_v15  ;;  %v5368_v35 = vadd.f32 %v891_v1, %v5072_v57  ;;  %v606_v57 = vadd.f32 %v5094_v18, %v5092_v16 }
 0x184   :  { %v893_v45 = vpop.f32.mrf.mxu0 }
 0x185   :  { %v5372_v20 = vadd.f32 %v893_v45, %v596_v34 }
 0x186   :  { %v897_v43 = vpop.f32.mrf.mxu0 }
 0x187   :  { %v5375_v8 = vadd.f32 %v897_v43, %v5079_v63  ;;  %v5394_v43 = vpop.f32.mrf.mxu1 }
 0x188   :  { %v899_v49 = vpop.f32.mrf.mxu0 }
 0x189   :  { %v5380_v29 = vadd.f32 %v899_v49, %v5088_v9  ;;  %v5404_v18 = vpop.f32.mrf.mxu1 }
 0x18a   :  { %v901_v15 = vpop.f32.mrf.mxu0 }
 0x18b   :  { %6104 = vst [vmem:[#allocation31_spill] sm:$0xff] %v5380_v29  ;;  %v5385_v58 = vadd.f32 %v901_v15, %v5090_v14  ;;  %v616_v14 = vadd.f32 %v5112_v46, %v5110_v44 }
 0x18c   :  { %v903_v1 = vpop.f32.mrf.mxu0 }
 0x18d   :  { %v5389_v34 = vadd.f32 %v903_v1, %v606_v57 }
 0x18e   :  { %v907_v63 = vpop.f32.mrf.mxu0 }
 0x18f   :  { %v5392_v45 = vadd.f32 %v907_v63, %v5097_v17  ;;  %v5416_v63 = vpop.f32.mrf.mxu1 }
 0x190   :  { %v909_v9 = vpop.f32.mrf.mxu0 }
 0x191   :  { %v5397_v49 = vadd.f32 %v909_v9, %v5106_v30  ;;  %v5414_v30 = vld [vmem:[%s6074_s3 + $0x70] sm:$0xff]  ;;  %v5427_v9 = vpop.f32.mrf.mxu1 }
 0x192   :  { %v911_v29 = vpop.f32.mrf.mxu0 }
 0x193   :  { %v5402_v16 = vadd.f32 %v911_v29, %v5108_v39  ;;  %v3981_v39 = vcombine.high %v5414_v30, %v5414_v30 }
 0x194   :  { %v913_v15 = vpop.f32.mrf.mxu0 }
 0x195   :  { %v5406_v57 = vadd.f32 %v913_v15, %v616_v14  ;;  %3982 = vmatprep.subr.msk.bf16.mxu1 %vm2022_vm2, %v3981_v39 }
 0x196   :  { %v917_v17 = vpop.f32.mrf.mxu0 }
 0x197   :  { %6105 = vst [vmem:[#allocation32_spill] sm:$0xff] %v5406_v57  ;;  %v5409_v1 = vadd.f32 %v917_v17, %v5115_v51 }
 0x198   :  { %v919_v44 = vpop.f32.mrf.mxu0 }
 0x199   :  { %6106 = vst [vmem:[#allocation33_spill] sm:$0xff] %v5409_v1  ;;  %v5421_v46 = vadd.f32 %v919_v44, %v5124_v2  ;;  %v5434_v1 = vpop.f32.mrf.mxu1 }
 0x19a   :  { %v921_v29 = vpop.f32.mrf.mxu0 }
 0x19b   :  { %v5425_v51 = vadd.f32 %v921_v29, %v5126_v11  ;;  %v5442_v11 = vpop.f32.mrf.mxu1 }
 0x19c   :  { %v5429_v14 = vpop.f32.mrf.mxu0 }
 0x19d   :  { %6107 = vst [vmem:[#allocation34_spill] sm:$0xff] %v5425_v51  ;;  %6108 = vst [vmem:[#allocation35_spill] sm:$0xff] %v5429_v14 }
 0x19e   :  { %v927_v15 = vpop.f32.mrf.mxu0 }
 0x19f   :  { %v5432_v17 = vadd.f32 %v927_v15, %v5136_v28  ;;  %v5449_v28 = vpop.f32.mrf.mxu1 }
 0x1a0   :  { %v929_v57 = vpop.f32.mrf.mxu0 }
 0x1a1   :  { %6109 = vst [vmem:[#allocation36_spill] sm:$0xff] %v5432_v17  ;;  %v5437_v2 = vadd.f32 %v929_v57, %v5147_v52 }
 0x1a2   :  { %v931_v44 = vpop.f32.mrf.mxu0 }
 0x1a3   :  { %v5440_v39 = vadd.f32 %v931_v44, %v5149_v3  ;;  %v5457_v3 = vpop.f32.mrf.mxu1 }
 0x1a4   :  { %v5444_v29 = vpop.f32.mrf.mxu0 }
 0x1a5   :  { %6110 = vst [vmem:[#allocation37_spill] sm:$0xff] %v5440_v39  ;;  %6111 = vst [vmem:[#allocation38_spill] sm:$0xff] %v5444_v29 }
 0x1a6   :  { %v937_v51 = vpop.f32.mrf.mxu0 }
 0x1a7   :  { %v5447_v14 = vadd.f32 %v937_v51, %v5159_v26  ;;  %v5464_v26 = vpop.f32.mrf.mxu1 }
 0x1a8   :  { %v939_v15 = vpop.f32.mrf.mxu0 }
 0x1a9   :  { %6112 = vst [vmem:[#allocation39_spill] sm:$0xff] %v5447_v14  ;;  %v5452_v17 = vadd.f32 %v939_v15, %v5168_v53 }
 0x1aa   :  { %v941_v52 = vpop.f32.mrf.mxu0 }
 0x1ab   :  { %6113 = vst [vmem:[#allocation40_spill] sm:$0xff] %v5452_v17  ;;  %v5455_v57 = vadd.f32 %v941_v52, %v5172_v0  ;;  %v5472_v0 = vpop.f32.mrf.mxu1 }
 0x1ac   :  { %v5459_v44 = vpop.f32.mrf.mxu0 }
 0x1ad   :  { %6114 = vst [vmem:[#allocation41_spill] sm:$0xff] %v5455_v57  ;;  %6115 = vst [vmem:[#allocation42_spill] sm:$0xff] %v5459_v44  ;;  %v546_v57 = vadd.f32 %v4986_v42, %v4984_v41  ;;  %v6120_v41 = vld [vmem:[#allocation23_spill] sm:$0xff] }
 0x1ae   :  { %v947_v39 = vpop.f32.mrf.mxu0 }
 0x1af   :  { %v5462_v29 = vadd.f32 %v947_v39, %v5191_v61  ;;  %v1302_v61 = vadd.f32 %v5226_v23, %v5229_v33  ;;  %v1303_v39 = vadd.f32 %v5237_v12, %v5246_v4  ;;  %v6121_v33 = vld [vmem:[#allocation12_spill] sm:$0xff]  ;;  %v6122_v12 = vld [vmem:[#allocation13_spill] sm:$0xff] }
 0x1b0   :  { %v949_v51 = vpop.f32.mrf.mxu0  ;;  %v556_v4 = vadd.f32 %v6122_v12, %v6121_v33 }
 0x1b1   :  { %6116 = vst [vmem:[#allocation43_spill] sm:$0xff] %v5462_v29  ;;  %v5467_v14 = vadd.f32 %v949_v51, %v5206_v27  ;;  %v959_v27 = vadd.f32 %v5257_v56, %v546_v57  ;;  %v5483_v51 = vpop.f32.mrf.mxu1 }
 0x1b2   :  { %v951_v53 = vpop.f32.mrf.mxu0 }
 0x1b3   :  { %6117 = vst [vmem:[#allocation44_spill] sm:$0xff] %v5467_v14  ;;  %v5470_v15 = vadd.f32 %v951_v53, %v5208_v47  ;;  %v1305_v42 = vadd.f32 %v6120_v41, %v959_v27  ;;  %v5488_v17 = vpop.f32.mrf.mxu1 }
 0x1b4   :  { %v5474_v52 = vpop.f32.mrf.mxu0 }
 0x1b5   :  { %6118 = vst [vmem:[#allocation45_spill] sm:$0xff] %v5470_v15  ;;  %6119 = vst [vmem:[#allocation46_spill] sm:$0xff] %v5474_v52  ;;  %v1304_v52 = vadd.f32 %v5259_v36, %v5249_v19  ;;  %v6125_v36 = vld [vmem:[#allocation26_spill] sm:$0xff] }
 0x1b6   :  { %v1529_v44 = vpop.f32.mrf.mxu0  ;;  %v963_v27 = vadd.f32 %v6125_v36, %v556_v4  ;;  %v5516_v36 = vld [vmem:[%s6073_s2] ss:$0 sm:$0xff] }
 0x1b7   :  { %v1648_v53 = vadd.f32 %v1529_v44, %v1302_v61  ;;  %v6123_v61 = vld [vmem:[#allocation22_spill] sm:$0xff] }
 0x1b8   :  { %v1531_v47 = vpop.f32.mrf.mxu0 }
 0x1b9   :  { %v1649_v15 = vadd.f32 %v1531_v47, %v1303_v39  ;;  %v1306_v39 = vadd.f32 %v5296_v62, %v6123_v61  ;;  %v6124_v47 = vld [vmem:[#allocation24_spill] sm:$0xff]  ;;  %v1310_v61 = vadd.f32 %v5336_v7, %v5307_v31  ;;  %v1312_v7 = vadd.f32 %v5353_v22, %v5317_v25 }
 0x1ba   :  { %v1533_v14 = vpop.f32.mrf.mxu0  ;;  %v1307_v19 = vadd.f32 %v5309_v48, %v6124_v47  ;;  %v1314_v25 = vadd.f32 %v5370_v37, %v5324_v54  ;;  %v6128_v22 = vld [vmem:[#allocation28_spill] sm:$0xff]  ;;  %v1316_v54 = vadd.f32 %v5387_v60, %v5334_v6  ;;  %v1317_v37 = vadd.f32 %v5394_v43, %v5338_v50  ;;  %v6129_v60 = vld [vmem:[#allocation29_spill] sm:$0xff] }
 0x1bb   :  { %v1696_v29 = vmax.f32 %v1648_v53, %v1649_v15  ;;  %v1650_v56 = vadd.f32 %v1533_v14, %v1304_v52  ;;  %v5498_v53 = vpop.f32.mrf.mxu1  ;;  %v6126_v14 = vld [vmem:[#allocation25_spill] sm:$0xff]  ;;  %v1318_v6 = vadd.f32 %v5404_v18, %v5341_v32  ;;  %v1319_v50 = vadd.f32 %v5416_v63, %v6129_v60 }
 0x1bc   :  { %v1535_v23 = vpop.f32.mrf.mxu0  ;;  %v1308_v52 = vadd.f32 %v5319_v38, %v6126_v14  ;;  %v1320_v32 = vadd.f32 %v5427_v9, %v5351_v21  ;;  %v1321_v18 = vadd.f32 %v5434_v1, %v5355_v5  ;;  %v1322_v21 = vadd.f32 %v5442_v11, %v5358_v40  ;;  %v6130_v9 = vld [vmem:[#allocation30_spill] sm:$0xff] }
 0x1bd   :  { %1721 = vst.msk [vmem:[#allocation2] sm:$0xff] %vm1720_vm3, %v1696_v29  ;;  %v1651_v57 = vadd.f32 %v1535_v23, %v1305_v42  ;;  %v1309_v42 = vadd.f32 %v5326_v13, %v963_v27  ;;  %v5504_v23 = vpop.f32.mrf.mxu1  ;;  %v1323_v5 = vadd.f32 %v5449_v28, %v6130_v9  ;;  %v1324_v40 = vadd.f32 %v5457_v3, %v5368_v35 }
 0x1be   :  { %v1539_v44 = vpop.f32.mrf.mxu0  ;;  %v1325_v11 = vadd.f32 %v5464_v26, %v5372_v20  ;;  %v1326_v20 = vadd.f32 %v5472_v0, %v5375_v8  ;;  %v4319_v0 = vld [vmem:[%s6074_s3 + $0x64] ss:$8 sps:$4 sm:$0xff]  }
 0x1bf   :  { %v1697_v15 = vmax.f32 %v1650_v56, %v1651_v57  ;;  %v1652_v33 = vadd.f32 %v1539_v44, %v1306_v39  ;;  %v6127_v44 = vld [vmem:[#allocation27_spill] sm:$0xff] }
 0x1c0   :  { %v1541_v41 = vpop.f32.mrf.mxu0  ;;  %v1311_v39 = vadd.f32 %v5343_v59, %v6127_v44  ;;  %v1313_v59 = vadd.f32 %v5360_v10, %v5321_v55  ;;  %v1315_v55 = vadd.f32 %v5377_v24, %v6128_v22 }
 0x1c1   :  { %1722 = vst.msk [vmem:[#allocation2 + $0x8] sm:$0xff] %vm1720_vm3, %v1697_v15  ;;  %v1653_v12 = vadd.f32 %v1541_v41, %v1307_v19  ;;  %v5511_v19 = vpop.f32.mrf.mxu1 }
 0x1c2   :  { %v1543_v29 = vpop.f32.mrf.mxu0 }
 0x1c3   :  { %v1698_v62 = vmax.f32 %v1652_v33, %v1653_v12  ;;  %v1654_v4 = vadd.f32 %v1543_v29, %v1308_v52  ;;  %v5524_v14 = vpop.f32.mrf.mxu1 }
 0x1c4   :  { %v1545_v48 = vpop.f32.mrf.mxu0 }
 0x1c5   :  { %1723 = vst.msk [vmem:[#allocation2 + $0x10] sm:$0xff] %vm1720_vm3, %v1698_v62  ;;  %v1655_v56 = vadd.f32 %v1545_v48, %v1309_v42 }
 0x1c6   :  { %v1549_v57 = vpop.f32.mrf.mxu0 }
 0x1c7   :  { %v1699_v47 = vmax.f32 %v1654_v4, %v1655_v56  ;;  %v1656_v41 = vadd.f32 %v1549_v57, %v1310_v61 }
 0x1c8   :  { %v1745_v38 = vld [vmem:[#allocation2] ss:$2 sm:$0xff]  ;;  %v1777_v13 = vld [vmem:[#allocation2 + $0x1] ss:$2 sm:$0xff]  ;;  %v1551_v27 = vpop.f32.mrf.mxu0 }
 0x1c9   :  { %v1808_v15 = vmax.f32 %v1745_v38, %v1777_v13  ;;  %1724 = vst.msk [vmem:[#allocation2 + $0x18] sm:$0xff] %vm1720_vm3, %v1699_v47  ;;  %v1657_v33 = vadd.f32 %v1551_v27, %v1311_v39  ;;  %v5533_v39 = vpop.f32.mrf.mxu1 }
 0x1ca   :  { %v1553_v31 = vpop.f32.mrf.mxu0 }
 0x1cb   :  { %v1831_v12 = vadd.f32 %v5516_v36, %v1808_v15  ;;  %v1700_v29 = vmax.f32 %v1656_v41, %v1657_v33  ;;  %v1658_v56 = vadd.f32 %v1553_v31, %v1312_v7  ;;  %v5541_v41 = vpop.f32.mrf.mxu1 }
 0x1cc   :  { %v1747_v52 = vld [vmem:[#allocation2 + $0x10] ss:$2 sm:$0xf]  ;;  %v1779_v42 = vld [vmem:[#allocation2 + $0x11] ss:$2 sm:$0xf]  ;;  %v1555_v62 = vpop.f32.mrf.mxu0 }
 0x1cd   :  { %v1847_v48 = vmax.f32 %v1831_v12, 0.0  ;;  %v1809_v4 = vmax.f32 %v1747_v52, %v1779_v42  ;;  %1725 = vst.msk [vmem:[#allocation2 + $0x20] sm:$0xff] %vm1720_vm3, %v1700_v29  ;;  %v1659_v57 = vadd.f32 %v1555_v62, %v1313_v59  ;;  %v5549_v62 = vpop.f32.mrf.mxu1 }
 0x1ce   :  { %v1559_v61 = vpop.f32.mrf.mxu0 }
 0x1cf   :  { %1863 = vst.msk [vmem:[#allocation3] sm:$0xff] %vm1720_vm3, %v1847_v48  ;;  %v1832_v10 = vadd.f32 %v5516_v36, %v1809_v4  ;;  %v1701_v44 = vmax.f32 %v1658_v56, %v1659_v57  ;;  %v1660_v13 = vadd.f32 %v1559_v61, %v1314_v25 }
 0x1d0   :  { %v1561_v47 = vpop.f32.mrf.mxu0 }
 0x1d1   :  { %v1848_v38 = vmax.f32 %v1832_v10, 0.0  ;;  %1726 = vst.msk [vmem:[#allocation2 + $0x28] sm:$0xff] %vm1720_vm3, %v1701_v44  ;;  %v1661_v27 = vadd.f32 %v1561_v47, %v1315_v55  ;;  %v5558_v44 = vpop.f32.mrf.mxu1 }
 0x1d2   :  { %v1563_v15 = vpop.f32.mrf.mxu0 }
 0x1d3   :  { %1865 = vst.msk [vmem:[#allocation3 + $0x8] sm:$0xf] %vm1864_vm4, %v1848_v38  ;;  %v1702_v24 = vmax.f32 %v1660_v13, %v1661_v27  ;;  %v1662_v12 = vadd.f32 %v1563_v15, %v1316_v54  ;;  %v5566_v54 = vpop.f32.mrf.mxu1 }
 0x1d4   :  { %v1749_v33 = vld [vmem:[#allocation2 + $0x18] ss:$2 sm:$0xff]  ;;  %v1781_v31 = vld [vmem:[#allocation2 + $0x19] ss:$2 sm:$0xff]  ;;  %v1565_v7 = vpop.f32.mrf.mxu0 }
 0x1d5   :  { %v1810_v59 = vmax.f32 %v1749_v33, %v1781_v31  ;;  %1727 = vst.msk [vmem:[#allocation2 + $0x30] sm:$0xff] %vm1720_vm3, %v1702_v24  ;;  %v1663_v29 = vadd.f32 %v1565_v7, %v1317_v37 }
 0x1d6   :  { %v1569_v52 = vpop.f32.mrf.mxu0 }
 0x1d7   :  { %v1833_v43 = vadd.f32 %v5516_v36, %v1810_v59  ;;  %v1703_v42 = vmax.f32 %v1662_v12, %v1663_v29  ;;  %v1664_v25 = vadd.f32 %v1569_v52, %v1318_v6  ;;  %v5574_v52 = vpop.f32.mrf.mxu1 }
 0x1d8   :  { %v1751_v48 = vld [vmem:[#allocation2 + $0x28] ss:$2 sm:$0xf]  ;;  %v1783_v4 = vld [vmem:[#allocation2 + $0x29] ss:$2 sm:$0xf]  ;;  %v1571_v56 = vpop.f32.mrf.mxu0 }
 0x1d9   :  { %v1849_v57 = vmax.f32 %v1833_v43, 0.0  ;;  %v1811_v61 = vmax.f32 %v1751_v48, %v1783_v4  ;;  %1728 = vst.msk [vmem:[#allocation2 + $0x38] sm:$0xff] %vm1720_vm3, %v1703_v42  ;;  %v1665_v22 = vadd.f32 %v1571_v56, %v1319_v50  ;;  %v3980_v43 = vcombine.low %v5414_v30, %v5414_v30 }
 0x1da   :  { %v1573_v55 = vpop.f32.mrf.mxu0  ;;  %v1907_v26 = vld [vmem:[#allocation3 + $0x1] sm:$0xff] }
 0x1db   :  { %1866 = vst.msk [vmem:[#allocation3 + $0x10] sm:$0xff] %vm1720_vm3, %v1849_v57  ;;  %v1834_v63 = vadd.f32 %v5516_v36, %v1811_v61  ;;  %v1704_v10 = vmax.f32 %v1664_v25, %v1665_v22  ;;  %v1666_v13 = vadd.f32 %v1573_v55, %v1320_v32  ;;  %v6131_v61 = vld [vmem:[#allocation31_spill] sm:$0xff]  ;;  %v2478_v32 = vld [vmem:[#allocation3 + $0x3] sm:$0xff]  ;;  %v2190_v8 = vsel %vm2022_vm2, %v3980_v43, 0 }
 0x1dc   :  { %v1575_v47 = vpop.f32.mrf.mxu0  ;;  %v1327_v25 = vadd.f32 %v5483_v51, %v6131_v61 }
 0x1dd   :  { %v1850_v38 = vmax.f32 %v1834_v63, 0.0  ;;  %1729 = vst.msk [vmem:[#allocation2 + $0x40] sm:$0xff] %vm1720_vm3, %v1704_v10  ;;  %v1667_v27 = vadd.f32 %v1575_v47, %v1321_v18  ;;  %v5585_v18 = vpop.f32.mrf.mxu1 }
 0x1de   :  { %v1579_v15 = vpop.f32.mrf.mxu0 }
 0x1df   :  { %1867 = vst.msk [vmem:[#allocation3 + $0x18] sm:$0xf] %vm1864_vm4, %v1850_v38  ;;  %v1705_v1 = vmax.f32 %v1666_v13, %v1667_v27  ;;  %v1668_v7 = vadd.f32 %v1579_v15, %v1322_v21  ;;  %v6132_v27 = vmov 0   ;;  %v1328_v15 = vadd.f32 %v5488_v17, %v5385_v58  ;;  %v4322_v58 = vld [vmem:[%s6074_s3 + $0x54] ss:$8 sps:$4 sm:$0xff]  }
 0x1e0   :  { %v1753_v37 = vld [vmem:[#allocation2 + $0x30] ss:$2 sm:$0xff]  ;;  %v1785_v24 = vld [vmem:[#allocation2 + $0x31] ss:$2 sm:$0xff]  ;;  %v1581_v33 = vpop.f32.mrf.mxu0  ;;  %v1329_v21 = vadd.f32 %v5498_v53, %v5389_v34 }
 0x1e1   :  { %v1812_v31 = vmax.f32 %v1753_v37, %v1785_v24  ;;  %1730 = vst.msk [vmem:[#allocation2 + $0x48] sm:$0xff] %vm1720_vm3, %v1705_v1  ;;  %v1669_v59 = vadd.f32 %v1581_v33, %v1323_v5  ;;  %v4317_v5 = vld [vmem:[%s6074_s3 + $0x60] ss:$8 sps:$4 sm:$0xff]   ;;  %v5604_v1 = vpop.f32.mrf.mxu1 }
 0x1e2   :  { %v1583_v12 = vpop.f32.mrf.mxu0 }
 0x1e3   :  { %v1835_v28 = vadd.f32 %v5516_v36, %v1812_v31  ;;  %v1706_v29 = vmax.f32 %v1668_v7, %v1669_v59  ;;  %v1670_v4 = vadd.f32 %v1583_v12, %v1324_v40  ;;  %v1330_v7 = vadd.f32 %v5504_v23, %v5392_v45 }
 0x1e4   :  { %v1755_v6 = vld [vmem:[#allocation2 + $0x40] ss:$2 sm:$0xf]  ;;  %v1787_v60 = vld [vmem:[#allocation2 + $0x41] ss:$2 sm:$0xf]  ;;  %v1585_v50 = vpop.f32.mrf.mxu0  ;;  %v1331_v59 = vadd.f32 %v5511_v19, %v5397_v49 }
 0x1e5   :  { %v1851_v42 = vmax.f32 %v1835_v28, 0.0  ;;  %v1813_v48 = vmax.f32 %v1755_v6, %v1787_v60  ;;  %1731 = vst.msk [vmem:[#allocation2 + $0x50] sm:$0xff] %vm1720_vm3, %v1706_v29  ;;  %v1671_v35 = vadd.f32 %v1585_v50, %v1325_v11  ;;  %v4320_v11 = vld [vmem:[%s6074_s3 + $0x50] ss:$8 sps:$4 sm:$0xff]   ;;  %v4325_v28 = vld [vmem:[%s6074_s3 + $0x44] ss:$8 sps:$4 sm:$0xff]   ;;  %v5621_v29 = vpop.f32.mrf.mxu1 }
 0x1e6   :  { %v1589_v3 = vpop.f32.mrf.mxu0  ;;  %v1908_v56 = vld [vmem:[#allocation3 + $0x11] sm:$0xff] }
 0x1e7   :  { %v2479_v57 = vld [vmem:[#allocation3 + $0x13] sm:$0xff]  ;;  %1868 = vst.msk [vmem:[#allocation3 + $0x20] sm:$0xff] %vm1720_vm3, %v1851_v42  ;;  %v1836_v30 = vadd.f32 %v5516_v36, %v1813_v48  ;;  %v1707_v22 = vmax.f32 %v1670_v4, %v1671_v35  ;;  %v1915_v55 = vpack.c.bf16 %v1908_v56, %v1907_v26  ;;  %v1672_v51 = vadd.f32 %v1589_v3, %v1326_v20  ;;  %v4323_v3 = vld [vmem:[%s6074_s3 + $0x40] ss:$8 sps:$4 sm:$0xff]   ;;  %v5633_v26 = vpop.f32.mrf.mxu1 }
 0x1e8   :  { %v1591_v63 = vpop.f32.mrf.mxu0  ;;  %v2486_v10 = vpack.c.bf16 %v2479_v57, %v2478_v32  ;;  %v1332_v42 = vadd.f32 %v5524_v14, %v5402_v16  ;;  %v6133_v48 = vld [vmem:[#allocation32_spill] sm:$0xff]  ;;  %v6134_v14 = vld [vmem:[#allocation14_spill] sm:$0xff] }
 0x1e9   :  { %v1852_v47 = vmax.f32 %v1836_v30, 0.0  ;;  %1732 = vst.msk [vmem:[#allocation2 + $0x58] sm:$0xff] %vm1720_vm3, %v1707_v22  ;;  %v1673_v38 = vadd.f32 %v1591_v63, %v1327_v25  ;;  %3962 = vmatmul.mubr.msk.bf16.vlgmr.msra.gmra.mxu1 %vm1720_vm3, %v1915_v55  ;;  %v1333_v4 = vadd.f32 %v5533_v39, %v6133_v48  ;;  %v4328_v16 = vld [vmem:[%s6074_s3 + $0x34] ss:$8 sps:$4 sm:$0xff]   ;;  %v6136_v55 = vld [vmem:[#allocation33_spill] sm:$0xff]  ;;  %v1335_v63 = vadd.f32 %v5549_v62, %v5421_v46 }
 0x1ea   :  { %4055 = vmatmul.mubr.msk.bf16.vlgmr.msra.gmra.mxu0 %vm1720_vm3, %v2486_v10  ;;  %v1593_v13 = vpop.f32.mrf.mxu0  ;;  %2071 = vmatprep.mubr.bf16.mxu1 %v6132_v27  ;;  %v6135_v39 = vld [vmem:[#allocation15_spill] sm:$0xff]  ;;  %v1334_v32 = vadd.f32 %v5541_v41, %v6136_v55  ;;  %v4331_v46 = vld [vmem:[%s6074_s3 + $0x24] ss:$8 sps:$4 sm:$0xff]  }
 0x1eb   :  { %1869 = vst.msk [vmem:[#allocation3 + $0x28] sm:$0xf] %vm1864_vm4, %v1852_v47  ;;  %v1708_v9 = vmax.f32 %v1672_v51, %v1673_v38  ;;  %2641 = vmatprep.mubr.bf16.mxu0 %v6132_v27  ;;  %2196 = vmatpush1.bf16.msra.mxu1 %v2190_v8  ;;  %v1674_v17 = vadd.f32 %v1593_v13, %v1328_v15  ;;  %v6137_v10 = vld [vmem:[#allocation35_spill] sm:$0xff]  ;;  %v5650_v51 = vpop.f32.mrf.mxu1 }
 0x1ec   :  { %v1757_v37 = vld [vmem:[#allocation2 + $0x48] ss:$2 sm:$0xff]  ;;  %v1789_v24 = vld [vmem:[#allocation2 + $0x49] ss:$2 sm:$0xff]  ;;  %v1595_v33 = vpop.f32.mrf.mxu0  ;;  %2197 = vmatprep.subr.bf16.mxu1 %v4319_v0  ;;  %v626_v57 = vadd.f32 %v6135_v39, %v6134_v14 }
 0x1ed   :  { %v1814_v34 = vmax.f32 %v1757_v37, %v1789_v24  ;;  %1733 = vst.msk [vmem:[#allocation2 + $0x60] sm:$0xff] %vm1720_vm3, %v1708_v9  ;;  %v1675_v53 = vadd.f32 %v1595_v33, %v1329_v21  ;;  %v4326_v47 = vld [vmem:[%s6074_s3 + $0x30] ss:$8 sps:$4 sm:$0xff]  }
 0x1ee   :  { %v1599_v31 = vpop.f32.mrf.mxu0  ;;  %v991_v8 = vadd.f32 %v6137_v10, %v626_v57 }
 0x1ef   :  { %v1837_v12 = vadd.f32 %v5516_v36, %v1814_v34  ;;  %v1709_v40 = vmax.f32 %v1674_v17, %v1675_v53  ;;  %2198 = vmatpush1.bf16.msra.mxu1 %v4317_v5  ;;  %v1676_v19 = vadd.f32 %v1599_v31, %v1330_v7  ;;  %v6138_v5 = vld [vmem:[#allocation34_spill] sm:$0xff]  ;;  %v4334_v17 = vld [vmem:[%s6074_s3 + $0x14] ss:$8 sps:$4 sm:$0xff]   ;;  %v6140_v31 = vld [vmem:[#allocation17_spill] sm:$0xff] }
 0x1f0   :  { %v1759_v6 = vld [vmem:[#allocation2 + $0x58] ss:$2 sm:$0xf]  ;;  %v1791_v60 = vld [vmem:[#allocation2 + $0x59] ss:$2 sm:$0xf]  ;;  %v1601_v45 = vpop.f32.mrf.mxu0  ;;  %2199 = vmatprep.subr.bf16.mxu1 %v4322_v58  ;;  %v1336_v37 = vadd.f32 %v5558_v44, %v6138_v5  ;;  %v1337_v24 = vadd.f32 %v5566_v54, %v991_v8 }
 0x1f1   :  { %v1853_v23 = vmax.f32 %v1837_v12, 0.0  ;;  %v1815_v49 = vmax.f32 %v1759_v6, %v1791_v60  ;;  %1734 = vst.msk [vmem:[#allocation2 + $0x68] sm:$0xff] %vm1720_vm3, %v1709_v40  ;;  %v1677_v50 = vadd.f32 %v1601_v45, %v1331_v59  ;;  %v4329_v34 = vld [vmem:[%s6074_s3 + $0x20] ss:$8 sps:$4 sm:$0xff]   ;;  %v6139_v53 = vld [vmem:[#allocation16_spill] sm:$0xff]  ;;  %v5668_v59 = vpop.f32.mrf.mxu1 }
 0x1f2   :  { %v1603_v43 = vpop.f32.mrf.mxu0  ;;  %v636_v7 = vadd.f32 %v6140_v31, %v6139_v53  ;;  %v6141_v60 = vld [vmem:[#allocation36_spill] sm:$0xff] }
 0x1f3   :  { %1870 = vst.msk [vmem:[#allocation3 + $0x30] sm:$0xff] %vm1720_vm3, %v1853_v23  ;;  %v1838_v35 = vadd.f32 %v5516_v36, %v1815_v49  ;;  %v1710_v20 = vmax.f32 %v1676_v19, %v1677_v50  ;;  %2200 = vmatpush1.bf16.msra.mxu1 %v4320_v11  ;;  %v1678_v25 = vadd.f32 %v1603_v43, %v1332_v42  ;;  %v1909_v19 = vld [vmem:[#allocation3 + $0x21] sm:$0xff]  ;;  %v6147_v5 = vld [vmem:[#allocation40_spill] sm:$0xff] }
 0x1f4   :  { %v1605_v56 = vpop.f32.mrf.mxu0  ;;  %2201 = vmatprep.subr.bf16.mxu1 %v4325_v28  ;;  %v1338_v45 = vadd.f32 %v5574_v52, %v6141_v60  ;;  %v1339_v23 = vadd.f32 %v5585_v18, %v5437_v2  ;;  %v6142_v42 = vld [vmem:[#allocation38_spill] sm:$0xff]  ;;  %v4332_v52 = vld [vmem:[%s6074_s3 + $0x10] ss:$8 sps:$4 sm:$0xff]  }
 0x1f5   :  { %v1854_v61 = vmax.f32 %v1838_v35, 0.0  ;;  %1735 = vst.msk [vmem:[#allocation2 + $0x70] sm:$0xff] %vm1720_vm3, %v1710_v20  ;;  %v1679_v30 = vadd.f32 %v1605_v56, %v1333_v4  ;;  %v995_v48 = vadd.f32 %v6142_v42, %v636_v7  ;;  %v1289_v56 = vpop.f32.mrf.mxu1 }
 0x1f6   :  { %v1609_v22 = vpop.f32.mrf.mxu0 }
 0x1f7   :  { %1871 = vst.msk [vmem:[#allocation3 + $0x38] sm:$0xf] %vm1864_vm4, %v1854_v61  ;;  %v1711_v0 = vmax.f32 %v1678_v25, %v1679_v30  ;;  %2202 = vmatpush1.bf16.msra.mxu1 %v4323_v3  ;;  %v1680_v62 = vadd.f32 %v1609_v22, %v1334_v32  ;;  %v2480_v3 = vld [vmem:[#allocation3 + $0x23] sm:$0xff]  ;;  %v1341_v55 = vadd.f32 %v5621_v29, %v995_v48  ;;  %v1293_v10 = vpop.f32.mrf.mxu1  ;;  %v6145_v29 = vld [vmem:[#allocation19_spill] sm:$0xff] }
 0x1f8   :  { %v1761_v38 = vld [vmem:[#allocation2 + $0x60] ss:$2 sm:$0xff]  ;;  %v1793_v13 = vld [vmem:[#allocation2 + $0x61] ss:$2 sm:$0xff]  ;;  %v1611_v15 = vpop.f32.mrf.mxu0  ;;  %2203 = vmatprep.subr.bf16.mxu1 %v4328_v16 }
 0x1f9   :  { %v1816_v41 = vmax.f32 %v1761_v38, %v1793_v13  ;;  %1736 = vst.msk [vmem:[#allocation2 + $0x78] sm:$0xff] %vm1720_vm3, %v1711_v0  ;;  %v1681_v21 = vadd.f32 %v1611_v15, %v1335_v63  ;;  %v4337_v16 = vld [vmem:[%s6074_s3 + $0x4] ss:$8 sps:$4 sm:$0xff]   ;;  %v4335_v63 = vld [vmem:[%s6074_s3] ss:$8 sps:$4 sm:$0xff]  }
 0x1fa   :  { %v1613_v9 = vpop.f32.mrf.mxu0  ;;  %v5689_v61 = vld [vmem:[%s6074_s3 + $0x160] sm:$0xff]  ;;  %v6144_v38 = vld [vmem:[#allocation18_spill] sm:$0xff] }
 0x1fb   :  { %v1839_v33 = vadd.f32 %v5516_v36, %v1816_v41  ;;  %v1712_v58 = vmax.f32 %v1680_v62, %v1681_v21  ;;  %2204 = vmatpush1.bf16.msra.mxu1 %v4326_v47  ;;  %v1682_v28 = vadd.f32 %v1613_v9, %v1336_v37  ;;  %v6143_v30 = vld [vmem:[#allocation37_spill] sm:$0xff]  ;;  %v646_v13 = vadd.f32 %v6145_v29, %v6144_v38  ;;  %v6146_v62 = vld [vmem:[#allocation39_spill] sm:$0xff] }
 0x1fc   :  { %v1763_v44 = vld [vmem:[#allocation2 + $0x70] ss:$2 sm:$0xf]  ;;  %v1795_v12 = vld [vmem:[#allocation2 + $0x71] ss:$2 sm:$0xf]  ;;  %v1615_v54 = vpop.f32.mrf.mxu0  ;;  %2205 = vmatprep.subr.bf16.mxu1 %v4331_v46  ;;  %v1340_v22 = vadd.f32 %v5604_v1, %v6143_v30  ;;  %v4017_v1 = vcombine.high %v5689_v61, %v5689_v61  ;;  %v1342_v21 = vadd.f32 %v5633_v26, %v6146_v62  ;;  %v1343_v37 = vadd.f32 %v5650_v51, %v6147_v5 }
 0x1fd   :  { %v1855_v40 = vmax.f32 %v1839_v33, 0.0  ;;  %v1817_v11 = vmax.f32 %v1763_v44, %v1795_v12  ;;  %1737 = vst.msk [vmem:[#allocation2 + $0x80] sm:$0xff] %vm1720_vm3, %v1712_v58  ;;  %v1683_v6 = vadd.f32 %v1615_v54, %v1337_v24  ;;  %v6148_v24 = vld [vmem:[#allocation42_spill] sm:$0xff]  ;;  %v6149_v51 = vld [vmem:[#allocation41_spill] sm:$0xff] }
 0x1fe   :  { %v1619_v49 = vpop.f32.mrf.mxu0  ;;  %v1910_v50 = vld [vmem:[#allocation3 + $0x31] sm:$0xff]  ;;  %v999_v33 = vadd.f32 %v6148_v24, %v646_v13 }
 0x1ff   :  { %v2481_v43 = vld [vmem:[#allocation3 + $0x33] sm:$0xff]  ;;  %1872 = vst.msk [vmem:[#allocation3 + $0x40] sm:$0xff] %vm1720_vm3, %v1855_v40  ;;  %v1840_v4 = vadd.f32 %v5516_v36, %v1817_v11  ;;  %v1713_v35 = vmax.f32 %v1682_v28, %v1683_v6  ;;  %v1916_v20 = vpack.c.bf16 %v1910_v50, %v1909_v19  ;;  %2206 = vmatpush1.bf16.msra.mxu1 %v4329_v34  ;;  %v6151_v19 = vld [vmem:[#allocation21_spill] sm:$0xff] }
 0x200   :  { %v1621_v2 = vpop.f32.mrf.mxu0  ;;  %v2487_v18 = vpack.c.bf16 %v2481_v43, %v2480_v3  ;;  %2207 = vmatprep.subr.bf16.mxu1 %v4334_v17  ;;  %v1684_v39 = vadd.f32 %v1619_v49, %v1338_v45  ;;  %v1295_v17 = vpop.f32.mrf.mxu1  ;;  %v1344_v11 = vadd.f32 %v5668_v59, %v6149_v51  ;;  %v1345_v28 = vadd.f32 %v1289_v56, %v999_v33  ;;  %v6150_v49 = vld [vmem:[#allocation20_spill] sm:$0xff] }
 0x201   :  { %v1856_v14 = vmax.f32 %v1840_v4, 0.0  ;;  %1738 = vst.msk [vmem:[#allocation2 + $0x88] sm:$0xff] %vm1720_vm3, %v1713_v35  ;;  %v1685_v57 = vadd.f32 %v1621_v2, %v1339_v23  ;;  %3963 = vmatmul.mubr.msk.bf16.gmra.mxu1 %vm1720_vm3, %v1916_v20  ;;  %v656_v50 = vadd.f32 %v6151_v19, %v6150_v49  ;;  %v6152_v35 = vld [vmem:[#allocation43_spill] sm:$0xff]  ;;  %v6153_v59 = vld [vmem:[#allocation44_spill] sm:$0xff] }
 0x202   :  { %4056 = vmatmul.mubr.msk.bf16.gmra.mxu0 %vm1720_vm3, %v2487_v18  ;;  %v1623_v25 = vpop.f32.mrf.mxu0  ;;  %2081 = vmatprep.mubr.bf16.mxu1 %v6132_v27  ;;  %v1297_v45 = vpop.f32.mrf.mxu1  ;;  %v1346_v20 = vadd.f32 %v1293_v10, %v6152_v35  ;;  %v1347_v3 = vadd.f32 %v1295_v17, %v6153_v59  ;;  %v4346_v59 = vld [vmem:[%s6074_s3 + $0x130] ss:$8 sps:$4 sm:$0xff]  }
 0x203   :  { %1873 = vst.msk [vmem:[#allocation3 + $0x48] sm:$0xf] %vm1864_vm4, %v1856_v14  ;;  %v1714_v32 = vmax.f32 %v1684_v39, %v1685_v57  ;;  %2651 = vmatprep.mubr.bf16.mxu0 %v6132_v27  ;;  %2208 = vmatpush1.bf16.msra.mxu1 %v4332_v52  ;;  %v1686_v46 = vadd.f32 %v1623_v25, %v1340_v22  ;;  %v6154_v52 = vld [vmem:[#allocation46_spill] sm:$0xff] }
 0x204   :  { %v1765_v8 = vld [vmem:[#allocation2 + $0x78] ss:$2 sm:$0xff]  ;;  %v1797_v0 = vld [vmem:[#allocation2 + $0x79] ss:$2 sm:$0xff]  ;;  %v1625_v47 = vpop.f32.mrf.mxu0  ;;  %2209 = vmatprep.subr.bf16.mxu1 %v4337_v16  ;;  %v1003_v56 = vadd.f32 %v6154_v52, %v656_v50  ;;  %v1299_v18 = vpop.f32.mrf.mxu1 }
 0x205   :  { %v1818_v15 = vmax.f32 %v1765_v8, %v1797_v0  ;;  %1739 = vst.msk [vmem:[#allocation2 + $0x90] sm:$0xff] %vm1720_vm3, %v1714_v32  ;;  %v1687_v41 = vadd.f32 %v1625_v47, %v1341_v55  ;;  %v6155_v55 = vld [vmem:[#allocation45_spill] sm:$0xff]  ;;  %v4342_v50 = vld [vmem:[%s6074_s3 + $0x154] ss:$8 sps:$4 sm:$0xff]  }
 0x206   :  { %v1629_v9 = vpop.f32.mrf.mxu0  ;;  %v1348_v32 = vadd.f32 %v1297_v45, %v6155_v55  ;;  %v1881_v45 = vld [vmem:[#allocation3 + $0x10] sm:$0xff] }
 0x207   :  { %v1841_v58 = vadd.f32 %v5516_v36, %v1818_v15  ;;  %v1715_v34 = vmax.f32 %v1686_v46, %v1687_v41  ;;  %2210 = vmatpush1.bf16.msra.mxu1 %v4335_v63  ;;  %v1688_v26 = vadd.f32 %v1629_v9, %v1342_v21  ;;  %v1349_v63 = vadd.f32 %v1299_v18, %v1003_v56  ;;  %v1884_v56 = vld [vmem:[#allocation3 + $0x40] sm:$0xff]  ;;  %v4360_v55 = vld [vmem:[%s6074_s3 + $0xf4] ss:$8 sps:$4 sm:$0xff]  }
 0x208   :  { %v1767_v53 = vld [vmem:[#allocation2 + $0x88] ss:$2 sm:$0xf]  ;;  %v1799_v31 = vld [vmem:[#allocation2 + $0x89] ss:$2 sm:$0xf]  ;;  %v1631_v7 = vpop.f32.mrf.mxu0  ;;  %4018 = vmatprep.subr.msk.bf16.mxu1 %vm2022_vm2, %v4017_v1 }
 0x209   :  { %v1857_v44 = vmax.f32 %v1841_v58, 0.0  ;;  %v1819_v12 = vmax.f32 %v1767_v53, %v1799_v31  ;;  %1740 = vst.msk [vmem:[#allocation2 + $0x98] sm:$0xff] %vm1720_vm3, %v1715_v34  ;;  %v1689_v54 = vadd.f32 %v1631_v7, %v1343_v37 }
 0x20a   :  { %v1633_v40 = vpop.f32.mrf.mxu0  ;;  %v1911_v46 = vld [vmem:[#allocation3 + $0x41] sm:$0xff] }
 0x20b   :  { %1874 = vst.msk [vmem:[#allocation3 + $0x50] sm:$0xff] %vm1720_vm3, %v1857_v44  ;;  %v1842_v6 = vadd.f32 %v5516_v36, %v1819_v12  ;;  %v1716_v60 = vmax.f32 %v1688_v26, %v1689_v54  ;;  %v1690_v42 = vadd.f32 %v1633_v40, %v1344_v11  ;;  %v2482_v62 = vld [vmem:[#allocation3 + $0x43] sm:$0xff] }
 0x20c   :  { %v1635_v23 = vpop.f32.mrf.mxu0 }
 0x20d   :  { %v1858_v43 = vmax.f32 %v1842_v6, 0.0  ;;  %1741 = vst.msk [vmem:[#allocation2 + $0xa0] sm:$0xff] %vm1720_vm3, %v1716_v60  ;;  %v1691_v48 = vadd.f32 %v1635_v23, %v1345_v28  ;;  %v1880_v23 = vld [vmem:[#allocation3] sm:$0xff] }
 0x20e   :  { %v1639_v4 = vpop.f32.mrf.mxu0  ;;  %v1888_v49 = vpack.c.bf16 %v1881_v45, %v1880_v23  ;;  %v2692_v23 = vld [vmem:[#allocation3 + $0x44] sm:$0xff] }
 0x20f   :  { %1875 = vst.msk [vmem:[#allocation3 + $0x58] sm:$0xf] %vm1864_vm4, %v1858_v43  ;;  %v1717_v2 = vmax.f32 %v1690_v42, %v1691_v48  ;;  %v1692_v25 = vadd.f32 %v1639_v4, %v1346_v20  ;;  %v4340_v43 = vld [vmem:[%s6074_s3 + $0x150] ss:$8 sps:$4 sm:$0xff]   ;;  %v1882_v48 = vld [vmem:[#allocation3 + $0x20] sm:$0xff] }
 0x210   :  { %v1769_v16 = vld [vmem:[#allocation2 + $0x90] ss:$2 sm:$0xff]  ;;  %v1801_v14 = vld [vmem:[#allocation2 + $0x91] ss:$2 sm:$0xff]  ;;  %v1641_v39 = vpop.f32.mrf.mxu0  ;;  %v4343_v4 = vld [vmem:[%s6074_s3 + $0x140] ss:$8 sps:$4 sm:$0xff]  }
 0x211   :  { %v1820_v57 = vmax.f32 %v1769_v16, %v1801_v14  ;;  %1742 = vst.msk [vmem:[#allocation2 + $0xa8] sm:$0xff] %vm1720_vm3, %v1717_v2  ;;  %v1693_v30 = vadd.f32 %v1641_v39, %v1347_v3  ;;  %v1883_v42 = vld [vmem:[#allocation3 + $0x30] sm:$0xff]  ;;  %v4351_v3 = vld [vmem:[%s6074_s3 + $0x124] ss:$8 sps:$4 sm:$0xff]   ;;  %v4349_v2 = vld [vmem:[%s6074_s3 + $0x120] ss:$8 sps:$4 sm:$0xff]  }
 0x212   :  { %v1643_v22 = vpop.f32.mrf.mxu0  ;;  %v1889_v35 = vpack.c.bf16 %v1883_v42, %v1882_v48  ;;  %v4348_v20 = vld [vmem:[%s6074_s3 + $0x134] ss:$8 sps:$4 sm:$0xff]   ;;  %v4352_v14 = vld [vmem:[%s6074_s3 + $0x110] ss:$8 sps:$4 sm:$0xff]   ;;  %v4357_v39 = vld [vmem:[%s6074_s3 + $0x104] ss:$8 sps:$4 sm:$0xff]  }
 0x213   :  { %v1843_v10 = vadd.f32 %v5516_v36, %v1820_v57  ;;  %v1718_v8 = vmax.f32 %v1692_v25, %v1693_v30  ;;  %v1694_v13 = vadd.f32 %v1643_v22, %v1348_v32  ;;  %v1885_v52 = vld [vmem:[#allocation3 + $0x50] sm:$0xff]  ;;  %v4355_v30 = vld [vmem:[%s6074_s3 + $0x100] ss:$8 sps:$4 sm:$0xff]  }
 0x214   :  { %v1771_v0 = vld [vmem:[#allocation2 + $0xa0] ss:$2 sm:$0xf]  ;;  %v1803_v47 = vld [vmem:[#allocation2 + $0xa1] ss:$2 sm:$0xf]  ;;  %v1645_v1 = vpop.f32.mrf.mxu0  ;;  %v1890_v18 = vpack.c.bf16 %v1885_v52, %v1884_v56 }
 0x215   :  { %v1859_v38 = vmax.f32 %v1843_v10, 0.0  ;;  %v1821_v29 = vmax.f32 %v1771_v0, %v1803_v47  ;;  %1743 = vst.msk [vmem:[#allocation2 + $0xb0] sm:$0xff] %vm1720_vm3, %v1718_v8  ;;  %v1695_v15 = vadd.f32 %v1645_v1, %v1349_v63  ;;  %v4354_v16 = vld [vmem:[%s6074_s3 + $0x114] ss:$8 sps:$4 sm:$0xff]   ;;  %v4358_v63 = vld [vmem:[%s6074_s3 + $0xf0] ss:$8 sps:$4 sm:$0xff]  }
 0x216   :  { %v1912_v41 = vld [vmem:[#allocation3 + $0x51] sm:$0xff]  ;;  %v2268_v47 = vld [vmem:[#allocation3 + $0x2] sm:$0xff] }
 0x217   :  { %v2483_v21 = vld [vmem:[#allocation3 + $0x53] sm:$0xff]  ;;  %1876 = vst.msk [vmem:[#allocation3 + $0x60] sm:$0xff] %vm1720_vm3, %v1859_v38  ;;  %v1844_v9 = vadd.f32 %v5516_v36, %v1821_v29  ;;  %v1719_v5 = vmax.f32 %v1694_v13, %v1695_v15  ;;  %v1917_v37 = vpack.c.bf16 %v1912_v41, %v1911_v46  ;;  %v4365_v29 = vld [vmem:[%s6074_s3 + $0x244] ss:$8 sps:$4 sm:$0xff]   ;;  %v4363_v13 = vld [vmem:[%s6074_s3 + $0x240] ss:$8 sps:$4 sm:$0xff]  }
 0x218   :  { %v2488_v24 = vpack.c.bf16 %v2483_v21, %v2482_v62  ;;  %v4073_v32 = vld [vmem:[%s6074_s3 + $0x250] sm:$0xff]  ;;  %v2270_v41 = vld [vmem:[#allocation3 + $0x22] sm:$0xff] }
 0x219   :  { %v1860_v33 = vmax.f32 %v1844_v9, 0.0  ;;  %1744 = vst.msk [vmem:[#allocation2 + $0xb8] sm:$0xff] %vm1720_vm3, %v1719_v5  ;;  %3964 = vmatmul.mubr.msk.bf16.gmra.mxu1 %vm1720_vm3, %v1917_v37  ;;  %v4089_v10 = vcombine.high %v4073_v32, %v4073_v32  ;;  %v4088_v8 = vcombine.low %v4073_v32, %v4073_v32  ;;  %v2269_v0 = vld [vmem:[#allocation3 + $0x12] sm:$0xff]  ;;  %v4371_v9 = vld [vmem:[%s6074_s3 + $0x224] ss:$8 sps:$4 sm:$0xff]  }
 0x21a   :  { %4057 = vmatmul.mubr.msk.bf16.gmra.mxu0 %vm1720_vm3, %v2488_v24  ;;  %2091 = vmatprep.mubr.bf16.mxu1 %v6132_v27  ;;  %v2276_v1 = vpack.c.bf16 %v2269_v0, %v2268_v47  ;;  %v4368_v15 = vld [vmem:[%s6074_s3 + $0x234] ss:$8 sps:$4 sm:$0xff]   ;;  %v4366_v62 = vld [vmem:[%s6074_s3 + $0x230] ss:$8 sps:$4 sm:$0xff]   ;;  %v4369_v5 = vld [vmem:[%s6074_s3 + $0x220] ss:$8 sps:$4 sm:$0xff]  }
 0x21b   :  { %2661 = vmatprep.mubr.bf16.mxu0 %v6132_v27  ;;  %1877 = vst.msk [vmem:[#allocation3 + $0x68] sm:$0xf] %vm1864_vm4, %v1860_v33  ;;  %v2804_v38 = vsel %vm2022_vm2, %v4088_v8, 0  ;;  %v2271_v46 = vld [vmem:[#allocation3 + $0x32] sm:$0xff]  ;;  %v2272_v33 = vld [vmem:[#allocation3 + $0x42] sm:$0xff] }
 0x21c   :  { %v1773_v58 = vld [vmem:[#allocation2 + $0xa8] ss:$2 sm:$0xff]  ;;  %v1805_v34 = vld [vmem:[#allocation2 + $0xa9] ss:$2 sm:$0xff]  ;;  %v2277_v21 = vpack.c.bf16 %v2271_v46, %v2270_v41  ;;  %v4402_v8 = vld [vmem:[#allocation8 + $0xc0] ss:$8 sps:$4 sm:$0xff]  }
 0x21d   :  { %v1822_v17 = vmax.f32 %v1773_v58, %v1805_v34  ;;  %v4374_v37 = vld [vmem:[%s6074_s3 + $0x214] ss:$8 sps:$4 sm:$0xff]   ;;  %v4372_v58 = vld [vmem:[%s6074_s3 + $0x210] ss:$8 sps:$4 sm:$0xff]  }
 0x21e   :  { %v1886_v25 = vld [vmem:[#allocation3 + $0x60] sm:$0xff]  ;;  %v2273_v24 = vld [vmem:[#allocation3 + $0x52] sm:$0xff] }
 0x21f   :  { %v1845_v53 = vadd.f32 %v5516_v36, %v1822_v17  ;;  %v2278_v34 = vpack.c.bf16 %v2273_v24, %v2272_v33  ;;  %v4377_v17 = vld [vmem:[%s6074_s3 + $0x204] ss:$8 sps:$4 sm:$0xff]   ;;  %v2693_v45 = vld [vmem:[#allocation3 + $0x54] sm:$0xff]  ;;  %v4393_v32 = vld [vmem:[#allocation8 + $0x70] ss:$8 sps:$4 sm:$0xff]  }
 0x220   :  { %v1775_v31 = vld [vmem:[#allocation2 + $0xb8] ss:$2 sm:$0xf]  ;;  %v1807_v7 = vld [vmem:[#allocation2 + $0xb9] ss:$2 sm:$0xf] }
 0x221   :  { %v1861_v44 = vmax.f32 %v1845_v53, 0.0  ;;  %v1823_v12 = vmax.f32 %v1775_v31, %v1807_v7  ;;  %v4375_v53 = vld [vmem:[%s6074_s3 + $0x200] ss:$8 sps:$4 sm:$0xff]   ;;  %v4380_v31 = vld [vmem:[%s6074_s3 + $0x1f4] ss:$8 sps:$4 sm:$0xff]  }
 0x222   :  { %v1913_v40 = vld [vmem:[#allocation3 + $0x61] sm:$0xff]  ;;  %v4386_v56 = vld [vmem:[#allocation8 + $0x94] ss:$8 sps:$4 sm:$0xff]  }
 0x223   :  { %1878 = vst.msk [vmem:[#allocation3 + $0x70] sm:$0xff] %vm1720_vm3, %v1861_v44  ;;  %v1846_v26 = vadd.f32 %v5516_v36, %v1823_v12  ;;  %v2484_v11 = vld [vmem:[#allocation3 + $0x63] sm:$0xff]  ;;  %v4016_v36 = vcombine.low %v5689_v61, %v5689_v61  ;;  %v4378_v12 = vld [vmem:[%s6074_s3 + $0x1f0] ss:$8 sps:$4 sm:$0xff]   ;;  %v4407_v47 = vld [vmem:[#allocation8 + $0xb4] ss:$8 sps:$4 sm:$0xff]  }
 0x224   :  { %v4345_v61 = vld [vmem:[%s6074_s3 + $0x144] ss:$8 sps:$4 sm:$0xff]   ;;  %v4408_v41 = vld [vmem:[#allocation8 + $0x50] ss:$8 sps:$4 sm:$0xff]  }
 0x225   :  { %v1862_v54 = vmax.f32 %v1846_v26, 0.0  ;;  %v2384_v19 = vsel %vm2022_vm2, %v4016_v36, 0  ;;  %v2274_v44 = vld [vmem:[#allocation3 + $0x62] sm:$0xff] }
 0x226   :  { %v4413_v46 = vld [vmem:[#allocation8 + $0xa4] ss:$8 sps:$4 sm:$0xff]  }
 0x227   :  { %1879 = vst.msk [vmem:[#allocation3 + $0x78] sm:$0xf] %vm1864_vm4, %v1862_v54  ;;  %v4383_v54 = vld [vmem:[%s6074_s3 + $0x1e4] ss:$8 sps:$4 sm:$0xff]  }
 0x22a   :  { %v1887_v57 = vld [vmem:[#allocation3 + $0x70] sm:$0xff] }
 0x22b   :  { %v1891_v22 = vpack.c.bf16 %v1887_v57, %v1886_v25  ;;  %v4387_v57 = vld [vmem:[#allocation8 + $0x80] ss:$8 sps:$4 sm:$0xff]   ;;  %v4395_v25 = vld [vmem:[#allocation8 + $0x74] ss:$8 sps:$4 sm:$0xff]  }
 0x22e   :  { %v1914_v51 = vld [vmem:[#allocation3 + $0x71] sm:$0xff] }
 0x22f   :  { %v2485_v28 = vld [vmem:[#allocation3 + $0x73] sm:$0xff]  ;;  %v1918_v6 = vpack.c.bf16 %v1914_v51, %v1913_v40  ;;  %v4381_v40 = vld [vmem:[%s6074_s3 + $0x1e0] ss:$8 sps:$4 sm:$0xff]  }
 0x230   :  { %v2489_v60 = vpack.c.bf16 %v2485_v28, %v2484_v11  ;;  %v2275_v7 = vld [vmem:[#allocation3 + $0x72] sm:$0xff]  ;;  %v2688_v11 = vld [vmem:[#allocation3 + $0x4] sm:$0xff] }
 0x231   :  { %3965 = vmatmul.mubr.msk.bf16.gmra.mxu1 %vm1720_vm3, %v1918_v6  ;;  %v2279_v26 = vpack.c.bf16 %v2275_v7, %v2274_v44  ;;  %v2689_v51 = vld [vmem:[#allocation3 + $0x14] sm:$0xff] }
 0x232   :  { %4058 = vmatmul.mubr.msk.bf16.gmra.mxu0 %vm1720_vm3, %v2489_v60  ;;  %2227 = vmatprep.mubr.bf16.mxu1 %v6132_v27  ;;  %v2696_v28 = vpack.c.bf16 %v2689_v51, %v2688_v11  ;;  %v2691_v6 = vld [vmem:[#allocation3 + $0x34] sm:$0xff]  ;;  %v2690_v60 = vld [vmem:[#allocation3 + $0x24] sm:$0xff] }
 0x233   :  { %3439 = vmatprep.mubr.bf16.mxu0 %v6132_v27  ;;  %v2697_v36 = vpack.c.bf16 %v2691_v6, %v2690_v60 }
 0x239   :  { %3983 = vmatmul.mubr.msk.bf16.vlgmr.msra.gmra.mxu1 %vm1720_vm3, %v1888_v49  ;;  %v2698_v49 = vpack.c.bf16 %v2693_v45, %v2692_v23 }
 0x23a   :  { %2390 = vmatpush1.bf16.msra.mxu1 %v2384_v19  ;;  %2237 = vmatprep.mubr.bf16.mxu1 %v6132_v27  ;;  %v2695_v19 = vld [vmem:[#allocation3 + $0x74] sm:$0xff] }
 0x23b   :  { %2391 = vmatprep.subr.bf16.mxu1 %v4342_v50  ;;  %v2694_v50 = vld [vmem:[#allocation3 + $0x64] sm:$0xff] }
 0x23e   :  { %2392 = vmatpush1.bf16.msra.mxu1 %v4340_v43  ;;  %v2699_v43 = vpack.c.bf16 %v2695_v19, %v2694_v50 }
 0x23f   :  { %2393 = vmatprep.subr.bf16.mxu1 %v4345_v61 }
 0x241   :  { %3984 = vmatmul.mubr.msk.bf16.gmra.mxu1 %vm1720_vm3, %v1889_v35 }
 0x242   :  { %2394 = vmatpush1.bf16.msra.mxu1 %v4343_v4  ;;  %2247 = vmatprep.mubr.bf16.mxu1 %v6132_v27 }
 0x243   :  { %2395 = vmatprep.subr.bf16.mxu1 %v4348_v20 }
 0x246   :  { %2396 = vmatpush1.bf16.msra.mxu1 %v4346_v59 }
 0x247   :  { %2397 = vmatprep.subr.bf16.mxu1 %v4351_v3 }
 0x249   :  { %3985 = vmatmul.mubr.msk.bf16.gmra.mxu1 %vm1720_vm3, %v1890_v18  ;;  %v4392_v18 = vld [vmem:[#allocation8 + $0xe4] ss:$8 sps:$4 sm:$0xff]  }
 0x24a   :  { %2398 = vmatpush1.bf16.msra.mxu1 %v4349_v2  ;;  %2257 = vmatprep.mubr.bf16.mxu1 %v6132_v27  ;;  %v4384_v2 = vld [vmem:[#allocation8 + $0x90] ss:$8 sps:$4 sm:$0xff]  }
 0x24b   :  { %2399 = vmatprep.subr.bf16.mxu1 %v4354_v16  ;;  %3413 = vmatprep.subr.bf16.mxu0 %v4392_v18 }
 0x24e   :  { %2400 = vmatpush1.bf16.msra.mxu1 %v4352_v14  ;;  %v4390_v14 = vld [vmem:[#allocation8 + $0xe0] ss:$8 sps:$4 sm:$0xff]  }
 0x24f   :  { %2401 = vmatprep.subr.bf16.mxu1 %v4357_v39  ;;  %v4389_v39 = vld [vmem:[#allocation8 + $0x84] ss:$8 sps:$4 sm:$0xff]   ;;  %3414 = vmatpush1.bf16.msra.mxu0 %v4390_v14 }
 0x251   :  { %3986 = vmatmul.mubr.msk.bf16.gmra.mxu1 %vm1720_vm3, %v1891_v22  ;;  %v4396_v22 = vld [vmem:[#allocation8 + $0xd0] ss:$8 sps:$4 sm:$0xff]  }
 0x252   :  { %2402 = vmatpush1.bf16.msra.mxu1 %v4355_v30  ;;  %2421 = vmatprep.mubr.bf16.mxu1 %v6132_v27 }
 0x253   :  { %2403 = vmatprep.subr.bf16.mxu1 %v4360_v55  ;;  %v4398_v55 = vld [vmem:[#allocation8 + $0xd4] ss:$8 sps:$4 sm:$0xff]  }
 0x254   :  { %3415 = vmatprep.subr.bf16.mxu0 %v4398_v55 }
 0x255   :  { %3416 = vmatpush1.bf16.msra.mxu0 %v4396_v22 }
 0x256   :  { %2404 = vmatpush1.bf16.msra.mxu1 %v4358_v63  ;;  %v4404_v63 = vld [vmem:[#allocation8 + $0xc4] ss:$8 sps:$4 sm:$0xff]  }
 0x257   :  { %4090 = vmatprep.subr.msk.bf16.mxu1 %vm2022_vm2, %v4089_v10  ;;  %v4401_v10 = vld [vmem:[#allocation8 + $0x64] ss:$8 sps:$4 sm:$0xff]   ;;  %3417 = vmatprep.subr.bf16.mxu0 %v4404_v63 }
 0x259   :  { %4019 = vmatmul.mubr.msk.bf16.vlgmr.msra.gmra.mxu1 %vm1720_vm3, %v2276_v1  ;;  %v4399_v1 = vld [vmem:[#allocation8 + $0x60] ss:$8 sps:$4 sm:$0xff]   ;;  %3418 = vmatpush1.bf16.msra.mxu0 %v4402_v8 }
 0x25a   :  { %2810 = vmatpush1.bf16.msra.mxu1 %v2804_v38  ;;  %2431 = vmatprep.mubr.bf16.mxu1 %v6132_v27 }
 0x25b   :  { %2811 = vmatprep.subr.bf16.mxu1 %v4365_v29  ;;  %v4410_v29 = vld [vmem:[#allocation8 + $0x54] ss:$8 sps:$4 sm:$0xff]   ;;  %3419 = vmatprep.subr.bf16.mxu0 %v4407_v47 }
 0x25e   :  { %2812 = vmatpush1.bf16.msra.mxu1 %v4363_v13  ;;  %v4405_v13 = vld [vmem:[#allocation8 + $0xb0] ss:$8 sps:$4 sm:$0xff]  }
 0x25f   :  { %2813 = vmatprep.subr.bf16.mxu1 %v4368_v15  ;;  %3420 = vmatpush1.bf16.msra.mxu0 %v4405_v13 }
 0x260   :  { %3421 = vmatprep.subr.bf16.mxu0 %v4413_v46 }
 0x261   :  { %4020 = vmatmul.mubr.msk.bf16.gmra.mxu1 %vm1720_vm3, %v2277_v21  ;;  %v4416_v21 = vld [vmem:[#allocation8 + $0x44] ss:$8 sps:$4 sm:$0xff]  }
 0x262   :  { %2814 = vmatpush1.bf16.msra.mxu1 %v4366_v62  ;;  %2441 = vmatprep.mubr.bf16.mxu1 %v6132_v27 }
 0x263   :  { %2815 = vmatprep.subr.bf16.mxu1 %v4371_v9  ;;  %v4411_v9 = vld [vmem:[#allocation8 + $0xa0] ss:$8 sps:$4 sm:$0xff]  }
 0x264   :  { %3422 = vmatpush1.bf16.msra.mxu0 %v4411_v9 }
 0x266   :  { %2816 = vmatpush1.bf16.msra.mxu1 %v4369_v5 }
 0x267   :  { %2817 = vmatprep.subr.bf16.mxu1 %v4374_v37 }
 0x269   :  { %4021 = vmatmul.mubr.msk.bf16.gmra.mxu1 %vm1720_vm3, %v2278_v34 }
 0x26a   :  { %2818 = vmatpush1.bf16.msra.mxu1 %v4372_v58  ;;  %2451 = vmatprep.mubr.bf16.mxu1 %v6132_v27 }
 0x26b   :  { %2819 = vmatprep.subr.bf16.mxu1 %v4377_v17 }
 0x26e   :  { %2820 = vmatpush1.bf16.msra.mxu1 %v4375_v53 }
 0x26f   :  { %2821 = vmatprep.subr.bf16.mxu1 %v4380_v31 }
 0x271   :  { %4022 = vmatmul.mubr.msk.bf16.gmra.mxu1 %vm1720_vm3, %v2279_v26 }
 0x272   :  { %2822 = vmatpush1.bf16.msra.mxu1 %v4378_v12  ;;  %2841 = vmatprep.mubr.bf16.mxu1 %v6132_v27 }
 0x273   :  { %2823 = vmatprep.subr.bf16.mxu1 %v4383_v54 }
 0x276   :  { %2824 = vmatpush1.bf16.msra.mxu1 %v4381_v40 }
 0x277   :  { %3136 = vmatprep.subr.bf16.mxu1 %v4386_v56 }
 0x279   :  { %4091 = vmatmul.mubr.msk.bf16.vlgmr.msra.gmra.mxu1 %vm1720_vm3, %v2696_v28 }
 0x27a   :  { %2851 = vmatprep.mubr.bf16.mxu1 %v6132_v27  ;;  %3137 = vmatpush1.bf16.msra.mxu1 %v4384_v2 }
 0x27b   :  { %3138 = vmatprep.subr.bf16.mxu1 %v4389_v39 }
 0x27e   :  { %3139 = vmatpush1.bf16.msra.mxu1 %v4387_v57 }
 0x27f   :  { %3140 = vmatprep.subr.bf16.mxu1 %v4395_v25 }
 0x281   :  { %4092 = vmatmul.mubr.msk.bf16.gmra.mxu1 %vm1720_vm3, %v2697_v36 }
 0x282   :  { %2861 = vmatprep.mubr.bf16.mxu1 %v6132_v27  ;;  %3141 = vmatpush1.bf16.msra.mxu1 %v4393_v32 }
 0x283   :  { %3142 = vmatprep.subr.bf16.mxu1 %v4401_v10 }
 0x286   :  { %3143 = vmatpush1.bf16.msra.mxu1 %v4399_v1 }
 0x287   :  { %3144 = vmatprep.subr.bf16.mxu1 %v4410_v29 }
 0x289   :  { %4093 = vmatmul.mubr.msk.bf16.gmra.mxu1 %vm1720_vm3, %v2698_v49 }
 0x28a   :  { %2871 = vmatprep.mubr.bf16.mxu1 %v6132_v27  ;;  %3145 = vmatpush1.bf16.msra.mxu1 %v4408_v41 }
 0x28b   :  { %3261 = vmatprep.subr.bf16.mxu1 %v4416_v21 }
 0x291   :  { %4094 = vmatmul.mubr.msk.bf16.gmra.mxu1 %vm1720_vm3, %v2699_v43 }
 0x292   :  { %3162 = vmatprep.mubr.bf16.mxu1 %v6132_v27 }
 0x2a9   :  { %v5861_v61 = vpop.f32.mrf.mxu1 }
 0x2aa   :  { %v2633_v36 = vpop.f32.mrf.mxu0 }
 0x2ab   :  { %v5863_v42 = vpop.f32.mrf.mxu1 }
 0x2ac   :  { %v2635_v49 = vpop.f32.mrf.mxu0 }
 0x2ad   :  { %v5865_v48 = vpop.f32.mrf.mxu1 }
 0x2ae   :  { %v2637_v43 = vpop.f32.mrf.mxu0 }
 0x2af   :  { %v5867_v4 = vpop.f32.mrf.mxu1 }
 0x2b0   :  { %v2639_v18 = vpop.f32.mrf.mxu0 }
 0x2c1   :  { %v5869_v35 = vpop.f32.mrf.mxu1 }
 0x2c2   :  { %v2643_v39 = vpop.f32.mrf.mxu0 }
 0x2c3   :  { %v5871_v20 = vpop.f32.mrf.mxu1 }
 0x2c4   :  { %v2645_v22 = vpop.f32.mrf.mxu0 }
 0x2c5   :  { %v5873_v59 = vpop.f32.mrf.mxu1 }
 0x2c6   :  { %v2647_v8 = vpop.f32.mrf.mxu0 }
 0x2c7   :  { %v5875_v3 = vpop.f32.mrf.mxu1 }
 0x2c8   :  { %v2649_v21 = vpop.f32.mrf.mxu0 }
 0x2d9   :  { %v5877_v52 = vpop.f32.mrf.mxu1 }
 0x2db   :  { %v5879_v16 = vpop.f32.mrf.mxu1 }
 0x2dd   :  { %v5881_v30 = vpop.f32.mrf.mxu1 }
 0x2df   :  { %v5883_v0 = vpop.f32.mrf.mxu1 }
 0x2f1   :  { %v5885_v38 = vpop.f32.mrf.mxu1 }
 0x2f3   :  { %v5887_v15 = vpop.f32.mrf.mxu1 }
 0x2f5   :  { %v5889_v62 = vpop.f32.mrf.mxu1 }
 0x2f7   :  { %v5891_v5 = vpop.f32.mrf.mxu1 }
 0x2f8   :  { %6156 = vst [vmem:[#allocation23_spill] sm:$0xff] %v5891_v5 }
 0x2f9   :  { %v2229_v37 = vpop.f32.mrf.mxu1 }
 0x2fa   :  { %v2230_v63 = vadd.f32 %v2229_v37, %v5861_v61  ;;  %v2653_v61 = vpop.f32.mrf.mxu0 }
 0x2fb   :  { %v2231_v24 = vpop.f32.mrf.mxu1 }
 0x2fc   :  { %v2232_v10 = vadd.f32 %v2231_v24, %v5863_v42 }
 0x2fd   :  { %v2233_v33 = vpop.f32.mrf.mxu1 }
 0x2fe   :  { %v2234_v46 = vadd.f32 %v2233_v33, %v5865_v48 }
 0x2ff   :  { %v2235_v58 = vpop.f32.mrf.mxu1 }
 0x300   :  { %v2236_v41 = vadd.f32 %v2235_v58, %v5867_v4 }
 0x301   :  { %v2239_v34 = vpop.f32.mrf.mxu1 }
 0x302   :  { %v2240_v42 = vadd.f32 %v2239_v34, %v5869_v35 }
 0x303   :  { %v2241_v17 = vpop.f32.mrf.mxu1 }
 0x304   :  { %v2242_v24 = vadd.f32 %v2241_v17, %v5871_v20 }
 0x305   :  { %v2243_v53 = vpop.f32.mrf.mxu1 }
 0x307   :  { %v2245_v31 = vpop.f32.mrf.mxu1 }
 0x309   :  { %v5893_v7 = vpop.f32.mrf.mxu1 }
 0x30b   :  { %v5895_v44 = vpop.f32.mrf.mxu1 }
 0x30d   :  { %v5897_v12 = vpop.f32.mrf.mxu1 }
 0x30f   :  { %v5899_v26 = vpop.f32.mrf.mxu1 }
 0x311   :  { %v5901_v54 = vpop.f32.mrf.mxu1 }
 0x313   :  { %v5903_v40 = vpop.f32.mrf.mxu1 }
 0x315   :  { %v5905_v51 = vpop.f32.mrf.mxu1 }
 0x316   :  { %6157 = vst [vmem:[#allocation12_spill] sm:$0xff] %v5905_v51 }
 0x317   :  { %v5907_v11 = vpop.f32.mrf.mxu1 }
 0x318   :  { %6158 = vst [vmem:[#allocation13_spill] sm:$0xff] %v5907_v11 }
 0x319   :  { %v2423_v28 = vpop.f32.mrf.mxu1 }
 0x31a   :  { %v2462_v1 = vadd.f32 %v2423_v28, %v2230_v63 }
 0x31b   :  { %v2425_v6 = vpop.f32.mrf.mxu1 }
 0x31c   :  { %v2463_v29 = vadd.f32 %v2425_v6, %v2232_v10  ;;  %v2672_v5 = vadd.f32 %v2633_v36, %v2462_v1  ;;  %v2244_v36 = vadd.f32 %v2243_v53, %v5873_v59  ;;  %v2252_v59 = vadd.f32 %v5895_v44, %v5879_v16 }
 0x31d   :  { %v2427_v60 = vpop.f32.mrf.mxu1 }
 0x31e   :  { %v2464_v27 = vadd.f32 %v2427_v60, %v2234_v46  ;;  %v2673_v51 = vadd.f32 %v2635_v49, %v2463_v29 }
 0x31f   :  { %v2429_v45 = vpop.f32.mrf.mxu1 }
 0x320   :  { %v2465_v11 = vadd.f32 %v2429_v45, %v2236_v41  ;;  %v2674_v4 = vadd.f32 %v2637_v43, %v2464_v27  ;;  %v2246_v45 = vadd.f32 %v2245_v31, %v5875_v3  ;;  %v2250_v27 = vadd.f32 %v5893_v7, %v5877_v52 }
 0x321   :  { %v2433_v23 = vpop.f32.mrf.mxu1  ;;  %v2254_v7 = vadd.f32 %v5897_v12, %v5881_v30 }
 0x322   :  { %v2466_v63 = vadd.f32 %v2433_v23, %v2240_v42  ;;  %v2675_v58 = vadd.f32 %v2639_v18, %v2465_v11 }
 0x323   :  { %v2435_v19 = vpop.f32.mrf.mxu1 }
 0x324   :  { %v2467_v48 = vadd.f32 %v2435_v19, %v2242_v24  ;;  %v2676_v20 = vadd.f32 %v2643_v39, %v2466_v63 }
 0x325   :  { %v2437_v50 = vpop.f32.mrf.mxu1 }
 0x326   :  { %v2468_v17 = vadd.f32 %v2437_v50, %v2244_v36  ;;  %v2677_v49 = vadd.f32 %v2645_v22, %v2467_v48  ;;  %v5938_v50 = vld [vmem:[%s6075_s4] ss:$0 sm:$0xff] }
 0x327   :  { %v2439_v56 = vpop.f32.mrf.mxu1  ;;  %v6162_v36 = vld [vmem:[#allocation13_spill] sm:$0xff] }
 0x328   :  { %v2678_v39 = vadd.f32 %v2647_v8, %v2468_v17 }
 0x329   :  { %v2443_v2 = vpop.f32.mrf.mxu1 }
 0x32a   :  { %v2470_v31 = vadd.f32 %v2443_v2, %v2250_v27  ;;  %v2256_v2 = vadd.f32 %v5899_v26, %v5883_v0  ;;  %v2260_v0 = vadd.f32 %v5901_v54, %v5885_v38  ;;  %v2262_v26 = vadd.f32 %v5903_v40, %v5887_v15  ;;  %v6160_v40 = vld [vmem:[#allocation12_spill] sm:$0xff] }
 0x32b   :  { %v2445_v14 = vpop.f32.mrf.mxu1 }
 0x32c   :  { %v2471_v18 = vadd.f32 %v2445_v14, %v2252_v59  ;;  %v2680_v8 = vadd.f32 %v2653_v61, %v2470_v31 }
 0x32d   :  { %v5909_v57 = vpop.f32.mrf.mxu1 }
 0x32f   :  { %v5911_v25 = vpop.f32.mrf.mxu1 }
 0x330   :  { %v2473_v42 = vadd.f32 %v5911_v25, %v2256_v2 }
 0x331   :  { %v5913_v55 = vpop.f32.mrf.mxu1 }
 0x332   :  { %v2474_v48 = vadd.f32 %v5913_v55, %v2260_v0 }
 0x333   :  { %v5915_v32 = vpop.f32.mrf.mxu1 }
 0x335   :  { %v5919_v47 = vpop.f32.mrf.mxu1 }
 0x337   :  { %v5921_v13 = vpop.f32.mrf.mxu1 }
 0x338   :  { %6159 = vst [vmem:[#allocation22_spill] sm:$0xff] %v5921_v13  ;;  %v2655_v13 = vpop.f32.mrf.mxu0 }
 0x339   :  { %v2843_v9 = vpop.f32.mrf.mxu1 }
 0x33a   :  { %v2882_v28 = vadd.f32 %v2843_v9, %v2672_v5  ;;  %v2657_v19 = vpop.f32.mrf.mxu0  ;;  %v2472_v9 = vadd.f32 %v5909_v57, %v2254_v7 }
 0x33b   :  { %v2845_v37 = vpop.f32.mrf.mxu1 }
 0x33c   :  { %v2883_v6 = vadd.f32 %v2845_v37, %v2673_v51  ;;  %v2469_v51 = vadd.f32 %v2439_v56, %v2246_v45  ;;  %v2659_v52 = vpop.f32.mrf.mxu0  ;;  %v2681_v37 = vadd.f32 %v2655_v13, %v2471_v18 }
 0x33d   :  { %v2847_v10 = vpop.f32.mrf.mxu1  ;;  %v2683_v54 = vadd.f32 %v2659_v52, %v2473_v42 }
 0x33e   :  { %v2898_v33 = vmax.f32 %v2882_v28, %v2883_v6  ;;  %v2884_v35 = vadd.f32 %v2847_v10, %v2674_v4  ;;  %v2679_v22 = vadd.f32 %v2649_v21, %v2469_v51  ;;  %v2663_v41 = vpop.f32.mrf.mxu0  ;;  %v2475_v4 = vadd.f32 %v5915_v32, %v2262_v26 }
 0x33f   :  { %v2849_v60 = vpop.f32.mrf.mxu1  ;;  %v6163_v27 = vld [vmem:[#allocation22_spill] sm:$0xff] }
 0x340   :  { %2907 = vst.msk [vmem:[#allocation4] sm:$0xff] %vm2906_vm5, %v2898_v33  ;;  %v2885_v34 = vadd.f32 %v2849_v60, %v2675_v58  ;;  %v2665_v25 = vpop.f32.mrf.mxu0  ;;  %v2682_v33 = vadd.f32 %v2657_v19, %v2472_v9  ;;  %v2264_v58 = vadd.f32 %v6160_v40, %v5889_v62  ;;  %v6161_v60 = vld [vmem:[#allocation23_spill] sm:$0xff] }
 0x341   :  { %v2853_v5 = vpop.f32.mrf.mxu1  ;;  %v2266_v45 = vadd.f32 %v6162_v36, %v6161_v60 }
 0x342   :  { %v2899_v23 = vmax.f32 %v2884_v35, %v2885_v34  ;;  %v2886_v3 = vadd.f32 %v2853_v5, %v2676_v20  ;;  %v2667_v51 = vpop.f32.mrf.mxu0 }
 0x343   :  { %v2855_v11 = vpop.f32.mrf.mxu1 }
 0x344   :  { %2908 = vst.msk [vmem:[#allocation4 + $0x8] sm:$0xff] %vm2906_vm5, %v2899_v23  ;;  %v2887_v53 = vadd.f32 %v2855_v11, %v2677_v49  ;;  %v2476_v23 = vadd.f32 %v5919_v47, %v2264_v58  ;;  %v2684_v49 = vadd.f32 %v2663_v41, %v2474_v48  ;;  %v2477_v11 = vadd.f32 %v6163_v27, %v2266_v45  ;;  %v2669_v47 = vpop.f32.mrf.mxu0 }
 0x345   :  { %v2857_v43 = vpop.f32.mrf.mxu1 }
 0x346   :  { %v2900_v56 = vmax.f32 %v2886_v3, %v2887_v53  ;;  %v2888_v14 = vadd.f32 %v2857_v43, %v2678_v39  ;;  %v2685_v3 = vadd.f32 %v2665_v25, %v2475_v4 }
 0x347   :  { %v2915_v16 = vld [vmem:[#allocation4] ss:$2 sm:$0xf]  ;;  %v2931_v44 = vld [vmem:[#allocation4 + $0x1] ss:$2 sm:$0xf]  ;;  %v2859_v1 = vpop.f32.mrf.mxu1 }
 0x348   :  { %v2946_v29 = vmax.f32 %v2915_v16, %v2931_v44  ;;  %2909 = vst.msk [vmem:[#allocation4 + $0x10] sm:$0xff] %vm2906_vm5, %v2900_v56  ;;  %v2889_v46 = vadd.f32 %v2859_v1, %v2679_v22  ;;  %v2686_v44 = vadd.f32 %v2667_v51, %v2476_v23  ;;  %v2687_v1 = vadd.f32 %v2669_v47, %v2477_v11 }
 0x349   :  { %v2863_v21 = vpop.f32.mrf.mxu1 }
 0x34a   :  { %v2961_v30 = vadd.f32 %v5938_v50, %v2946_v29  ;;  %v2901_v12 = vmax.f32 %v2888_v14, %v2889_v46  ;;  %v2890_v61 = vadd.f32 %v2863_v21, %v2680_v8 }
 0x34b   :  { %v2917_v24 = vld [vmem:[#allocation4 + $0x8] ss:$2 sm:$0xf]  ;;  %v2933_v28 = vld [vmem:[#allocation4 + $0x9] ss:$2 sm:$0xf]  ;;  %v2865_v6 = vpop.f32.mrf.mxu1 }
 0x34c   :  { %v2969_v63 = vmax.f32 %v2961_v30, 0.0  ;;  %v2947_v57 = vmax.f32 %v2917_v24, %v2933_v28  ;;  %2910 = vst.msk [vmem:[#allocation4 + $0x18] sm:$0xff] %vm2906_vm5, %v2901_v12  ;;  %v2891_v10 = vadd.f32 %v2865_v6, %v2681_v37 }
 0x34d   :  { %v2867_v13 = vpop.f32.mrf.mxu1 }
 0x34e   :  { %2978 = vst.msk [vmem:[#allocation5] sm:$0xf] %vm2977_vm6, %v2969_v63  ;;  %v2962_v38 = vadd.f32 %v5938_v50, %v2947_v57  ;;  %v2902_v15 = vmax.f32 %v2890_v61, %v2891_v10  ;;  %v2892_v32 = vadd.f32 %v2867_v13, %v2682_v33 }
 0x34f   :  { %v2919_v35 = vld [vmem:[#allocation4 + $0x10] ss:$2 sm:$0xf]  ;;  %v2935_v34 = vld [vmem:[#allocation4 + $0x11] ss:$2 sm:$0xf]  ;;  %v2869_v20 = vpop.f32.mrf.mxu1 }
 0x350   :  { %v2970_v55 = vmax.f32 %v2962_v38, 0.0  ;;  %v2948_v5 = vmax.f32 %v2919_v35, %v2935_v34  ;;  %2911 = vst.msk [vmem:[#allocation4 + $0x20] sm:$0xff] %vm2906_vm5, %v2902_v15  ;;  %v2893_v17 = vadd.f32 %v2869_v20, %v2683_v54 }
 0x351   :  { %v2873_v19 = vpop.f32.mrf.mxu1 }
 0x352   :  { %2979 = vst.msk [vmem:[#allocation5 + $0x4] sm:$0xf] %vm2977_vm6, %v2970_v55  ;;  %v2963_v62 = vadd.f32 %v5938_v50, %v2948_v5  ;;  %v2903_v59 = vmax.f32 %v2892_v32, %v2893_v17  ;;  %v2894_v39 = vadd.f32 %v2873_v19, %v2684_v49 }
 0x353   :  { %v2921_v53 = vld [vmem:[#allocation4 + $0x18] ss:$2 sm:$0xf]  ;;  %v2937_v31 = vld [vmem:[#allocation4 + $0x19] ss:$2 sm:$0xf]  ;;  %v2875_v43 = vpop.f32.mrf.mxu1 }
 0x354   :  { %v2971_v18 = vmax.f32 %v2963_v62, 0.0  ;;  %v2949_v56 = vmax.f32 %v2921_v53, %v2937_v31  ;;  %2912 = vst.msk [vmem:[#allocation4 + $0x28] sm:$0xff] %vm2906_vm5, %v2903_v59  ;;  %v2895_v22 = vadd.f32 %v2875_v43, %v2685_v3 }
 0x355   :  { %v2877_v52 = vpop.f32.mrf.mxu1  ;;  %v3012_v55 = vld [vmem:[#allocation5 + $0x1] sm:$0x1]  ;;  %v3296_v32 = vld [vmem:[#allocation5 + $0x2] sm:$0x1] }
 0x356   :  { %2980 = vst.msk [vmem:[#allocation5 + $0x8] sm:$0xf] %vm2977_vm6, %v2971_v18  ;;  %v2964_v7 = vadd.f32 %v5938_v50, %v2949_v56  ;;  %v2904_v16 = vmax.f32 %v2894_v39, %v2895_v22  ;;  %v2896_v9 = vadd.f32 %v2877_v52, %v2686_v44  ;;  %v3020_v59 = vpack.c.bf16 %v3012_v55, %v3012_v55 }
 0x357   :  { %v2923_v2 = vld [vmem:[#allocation4 + $0x20] ss:$2 sm:$0xf]  ;;  %v2939_v29 = vld [vmem:[#allocation4 + $0x21] ss:$2 sm:$0xf]  ;;  %v2879_v14 = vpop.f32.mrf.mxu1  ;;  %v3304_v53 = vpack.c.bf16 %v3296_v32, %v3296_v32 }
 0x358   :  { %v2972_v46 = vmax.f32 %v2964_v7, 0.0  ;;  %v2950_v41 = vmax.f32 %v2923_v2, %v2939_v29  ;;  %2913 = vst.msk [vmem:[#allocation4 + $0x30] sm:$0xff] %vm2906_vm5, %v2904_v16  ;;  %v2897_v8 = vadd.f32 %v2879_v14, %v2687_v1  ;;  %v3047_v29 = vunpack.c.l.b16 %v3020_v59 }
 0x359   :  { %v3013_v61 = vld [vmem:[#allocation5 + $0x5] sm:$0x1]  ;;  %v3297_v10 = vld [vmem:[#allocation5 + $0x6] sm:$0x1] }
 0x35a   :  { %2981 = vst.msk [vmem:[#allocation5 + $0xc] sm:$0xf] %vm2977_vm6, %v2972_v46  ;;  %v2965_v21 = vadd.f32 %v5938_v50, %v2950_v41  ;;  %v2905_v42 = vmax.f32 %v2896_v9, %v2897_v8  ;;  %v3021_v54 = vpack.c.bf16 %v3013_v61, %v3013_v61  ;;  %v3305_v58 = vpack.c.bf16 %v3297_v10, %v3297_v10 }
 0x35b   :  { %v2925_v30 = vld [vmem:[#allocation4 + $0x28] ss:$2 sm:$0xf]  ;;  %v2941_v12 = vld [vmem:[#allocation4 + $0x29] ss:$2 sm:$0xf]  ;;  %v3331_v46 = vunpack.c.l.b16 %v3304_v53 }
 0x35c   :  { %v2973_v37 = vmax.f32 %v2965_v21, 0.0  ;;  %v2951_v0 = vmax.f32 %v2925_v30, %v2941_v12  ;;  %2914 = vst.msk [vmem:[#allocation4 + $0x38] sm:$0xff] %vm2906_vm5, %v2905_v42  ;;  %v3048_v49 = vunpack.c.l.b16 %v3021_v54  ;;  %v3332_v11 = vunpack.c.l.b16 %v3305_v58 }
 0x35d   :  { %v3014_v4 = vld [vmem:[#allocation5 + $0x9] sm:$0x1]  ;;  %v3298_v38 = vld [vmem:[#allocation5 + $0xa] sm:$0x1] }
 0x35e   :  { %2982 = vst.msk [vmem:[#allocation5 + $0x10] sm:$0xf] %vm2977_vm6, %v2973_v37  ;;  %v2966_v26 = vadd.f32 %v5938_v50, %v2951_v0  ;;  %v3022_v35 = vpack.c.bf16 %v3014_v4, %v3014_v4  ;;  %v3306_v34 = vpack.c.bf16 %v3298_v38, %v3298_v38  ;;  %v3055_v22 = vrot.slane %v3048_v49, 7 }
 0x35f   :  { %v2927_v24 = vld [vmem:[#allocation4 + $0x30] ss:$2 sm:$0xf]  ;;  %v2943_v28 = vld [vmem:[#allocation4 + $0x31] ss:$2 sm:$0xf] }
 0x360   :  { %v2974_v6 = vmax.f32 %v2966_v26, 0.0  ;;  %v2952_v63 = vmax.f32 %v2927_v24, %v2943_v28  ;;  %v3049_v3 = vunpack.c.l.b16 %v3022_v35  ;;  %v3333_v31 = vunpack.c.l.b16 %v3306_v34  ;;  %v2988_v35 = vld [vmem:[#allocation5 + $0x8] sm:$0x1] }
 0x361   :  { %v3015_v15 = vld [vmem:[#allocation5 + $0xd] sm:$0x1]  ;;  %v3299_v40 = vld [vmem:[#allocation5 + $0xe] sm:$0x1]  ;;  %v3339_v7 = vrot.slane %v3332_v11, 7  ;;  %v3057_v12 = vsel %vm3056_vm7, %v3055_v22, %v3047_v29 }
 0x362   :  { %2983 = vst.msk [vmem:[#allocation5 + $0x14] sm:$0xf] %vm2977_vm6, %v2974_v6  ;;  %v2967_v57 = vadd.f32 %v5938_v50, %v2952_v63  ;;  %v3023_v5 = vpack.c.bf16 %v3015_v15, %v3015_v15  ;;  %v3307_v17 = vpack.c.bf16 %v3299_v40, %v3299_v40  ;;  %v3058_v14 = vrot.slane %v3049_v3, 6  ;;  %v2987_v40 = vld [vmem:[#allocation5 + $0x4] sm:$0x1] }
 0x363   :  { %v2929_v25 = vld [vmem:[#allocation4 + $0x38] ss:$2 sm:$0xf]  ;;  %v2945_v48 = vld [vmem:[#allocation4 + $0x39] ss:$2 sm:$0xf]  ;;  %v3340_v26 = vsel %vm3056_vm7, %v3339_v7, %v3331_v46 }
 0x364   :  { %v2975_v33 = vmax.f32 %v2967_v57, 0.0  ;;  %v2953_v13 = vmax.f32 %v2929_v25, %v2945_v48  ;;  %v3050_v43 = vunpack.c.l.b16 %v3023_v5  ;;  %v3334_v18 = vunpack.c.l.b16 %v3307_v17  ;;  %v2989_v55 = vld [vmem:[#allocation5 + $0xc] sm:$0x1]  ;;  %v4414_v5 = vld [vmem:[#allocation8 + $0x40] ss:$8 sps:$4 sm:$0xff]  }
 0x365   :  { %v3016_v36 = vld [vmem:[#allocation5 + $0x11] sm:$0x1]  ;;  %v3300_v45 = vld [vmem:[#allocation5 + $0x12] sm:$0x1]  ;;  %v3341_v41 = vrot.slane %v3333_v31, 6  ;;  %v3060_v61 = vsel %vm3059_vm8, %v3058_v14, %v3057_v12  ;;  %v2997_v59 = vpack.c.bf16 %v2989_v55, %v2989_v55 }
 0x366   :  { %2984 = vst.msk [vmem:[#allocation5 + $0x18] sm:$0xf] %vm2977_vm6, %v2975_v33  ;;  %v2968_v60 = vadd.f32 %v5938_v50, %v2953_v13  ;;  %v3024_v23 = vpack.c.bf16 %v3016_v36, %v3016_v36  ;;  %v3308_v27 = vpack.c.bf16 %v3300_v45, %v3300_v45  ;;  %v3061_v8 = vrot.slane %v3050_v43, 5  ;;  %v2986_v3 = vld [vmem:[#allocation5] sm:$0x1] }
 0x367   :  { %v3343_v42 = vrot.slane %v3334_v18, 5  ;;  %v3342_v25 = vsel %vm3059_vm8, %v3341_v41, %v3340_v26  ;;  %v4417_v43 = vld [vmem:[#allocation8 + $0x30] ss:$8 sps:$4 sm:$0xff]   ;;  %v6164_v18 = vmov 0   ;;  %v4422_v22 = vld [vmem:[#allocation8 + $0x24] ss:$8 sps:$4 sm:$0xff]   ;;  %v2994_v7 = vpack.c.bf16 %v2986_v3, %v2986_v3 }
 0x368   :  { %v2976_v20 = vmax.f32 %v2968_v60, 0.0  ;;  %v3051_v39 = vunpack.c.l.b16 %v3024_v23  ;;  %v3335_v52 = vunpack.c.l.b16 %v3308_v27  ;;  %v3063_v13 = vsel %vm3062_vm9, %v3061_v8, %v3060_v61  ;;  %v4419_v27 = vld [vmem:[#allocation8 + $0x34] ss:$8 sps:$4 sm:$0xff]   ;;  %v4423_v12 = vld [vmem:[#allocation8 + $0x10] ss:$8 sps:$4 sm:$0xff]  }
 0x369   :  { %v3017_v51 = vld [vmem:[#allocation5 + $0x15] sm:$0x1]  ;;  %v3301_v19 = vld [vmem:[#allocation5 + $0x16] sm:$0x1]  ;;  %v3344_v38 = vsel %vm3062_vm9, %v3343_v42, %v3342_v25  ;;  %v2995_v23 = vpack.c.bf16 %v2987_v40, %v2987_v40  ;;  %v2991_v11 = vld [vmem:[#allocation5 + $0x14] sm:$0x1]  ;;  %v3179_v8 = vunpack.c.l.b16 %v2994_v7 }
 0x36a   :  { %2985 = vst.msk [vmem:[#allocation5 + $0x1c] sm:$0xf] %vm2977_vm6, %v2976_v20  ;;  %v3025_v50 = vpack.c.bf16 %v3017_v51, %v3017_v51  ;;  %v3309_v62 = vpack.c.bf16 %v3301_v19, %v3301_v19  ;;  %v3064_v37 = vrot.slane %v3051_v39, 4  ;;  %v3345_v24 = vrot.slane %v3335_v52, 4  ;;  %v2990_v51 = vld [vmem:[#allocation5 + $0x10] sm:$0x1] }
 0x36b   :  { %v2998_v31 = vpack.c.bf16 %v2990_v51, %v2990_v51  ;;  %v3180_v39 = vunpack.c.l.b16 %v2995_v23  ;;  %v4425_v46 = vld [vmem:[#allocation8 + $0x14] ss:$8 sps:$4 sm:$0xff]   ;;  %v4428_v26 = vld [vmem:[#allocation8 + $0x4] ss:$8 sps:$4 sm:$0xff]   ;;  %v4426_v61 = vld [vmem:[#allocation8] ss:$8 sps:$4 sm:$0xff]  }
 0x36c   :  { %v3052_v44 = vunpack.c.l.b16 %v3025_v50  ;;  %v3336_v2 = vunpack.c.l.b16 %v3309_v62  ;;  %v3066_v15 = vsel %vm3065_vm10, %v3064_v37, %v3063_v13  ;;  %v3346_v54 = vsel %vm3065_vm10, %v3345_v24, %v3344_v38  ;;  %v3453_v38 = vld [vmem:[#allocation5 + $0xf] sm:$0x1] }
 0x36d   :  { %v3018_v56 = vld [vmem:[#allocation5 + $0x19] sm:$0x1]  ;;  %v3302_v47 = vld [vmem:[#allocation5 + $0x1a] sm:$0x1]  ;;  %v2996_v50 = vpack.c.bf16 %v2988_v35, %v2988_v35  ;;  %v2992_v62 = vld [vmem:[#allocation5 + $0x18] sm:$0x1] }
 0x36e   :  { %v3026_v16 = vpack.c.bf16 %v3018_v56, %v3018_v56  ;;  %v3310_v1 = vpack.c.bf16 %v3302_v47, %v3302_v47  ;;  %v3067_v6 = vrot.slane %v3052_v44, 3  ;;  %v3347_v57 = vrot.slane %v3336_v2, 3  ;;  %v4420_v2 = vld [vmem:[#allocation8 + $0x20] ss:$8 sps:$4 sm:$0xff]   ;;  %v4437_v23 = vld [vmem:[#allocation8 + $0x114] ss:$8 sps:$4 sm:$0xff]  }
 0x36f   :  { %v2999_v56 = vpack.c.bf16 %v2991_v11, %v2991_v11  ;;  %v3000_v47 = vpack.c.bf16 %v2992_v62, %v2992_v62  ;;  %v3181_v52 = vunpack.c.l.b16 %v2996_v50  ;;  %v3182_v44 = vunpack.c.l.b16 %v2997_v59  ;;  %v3456_v35 = vld [vmem:[#allocation5 + $0x1b] sm:$0x1]  ;;  %v4435_v59 = vld [vmem:[#allocation8 + $0x110] ss:$8 sps:$4 sm:$0xff]  }
 0x370   :  { %v3053_v9 = vunpack.c.l.b16 %v3026_v16  ;;  %v3337_v21 = vunpack.c.l.b16 %v3310_v1  ;;  %v3069_v58 = vsel %vm3068_vm11, %v3067_v6, %v3066_v15  ;;  %v3348_v36 = vsel %vm3068_vm11, %v3347_v57, %v3346_v54  ;;  %v4429_v15 = vld [vmem:[#allocation8 + $0x130] ss:$8 sps:$4 sm:$0xff]  }
 0x371   :  { %v3019_v30 = vld [vmem:[#allocation5 + $0x1d] sm:$0x1]  ;;  %v3303_v0 = vld [vmem:[#allocation5 + $0x1e] sm:$0x1]  ;;  %v2993_v53 = vld [vmem:[#allocation5 + $0x1c] sm:$0x1]  ;;  %v3183_v1 = vunpack.c.l.b16 %v2998_v31  ;;  %v3184_v29 = vunpack.c.l.b16 %v2999_v56  ;;  %v3185_v41 = vunpack.c.l.b16 %v3000_v47 }
 0x372   :  { %v3027_v28 = vpack.c.bf16 %v3019_v30, %v3019_v30  ;;  %v3311_v63 = vpack.c.bf16 %v3303_v0, %v3303_v0  ;;  %v3070_v10 = vrot.slane %v3053_v9, 2  ;;  %v3349_v48 = vrot.slane %v3337_v21, 2  ;;  %v3454_v54 = vld [vmem:[#allocation5 + $0x13] sm:$0x1]  ;;  %v3457_v55 = vld [vmem:[#allocation5 + $0x1f] sm:$0x1] }
 0x373   :  { %v3001_v16 = vpack.c.bf16 %v2993_v53, %v2993_v53  ;;  %v3187_v14 = vrot.slane %v3180_v39, 7  ;;  %v3189_v9 = vrot.slane %v3181_v52, 6  ;;  %v3191_v42 = vrot.slane %v3182_v44, 5  ;;  %v4440_v31 = vld [vmem:[#allocation8 + $0x104] ss:$8 sps:$4 sm:$0xff]  }
 0x374   :  { %v3054_v33 = vunpack.c.l.b16 %v3027_v28  ;;  %v3338_v4 = vunpack.c.l.b16 %v3311_v63  ;;  %v3072_v34 = vsel %vm3071_vm12, %v3070_v10, %v3069_v58  ;;  %v3350_v20 = vsel %vm3071_vm12, %v3349_v48, %v3348_v36  ;;  %v4431_v48 = vld [vmem:[#allocation8 + $0x134] ss:$8 sps:$4 sm:$0xff]   ;;  %v4438_v52 = vld [vmem:[#allocation8 + $0x100] ss:$8 sps:$4 sm:$0xff]  }
 0x375   :  { %v3186_v21 = vunpack.c.l.b16 %v3001_v16  ;;  %v3193_v30 = vrot.slane %v3183_v1, 4  ;;  %v3188_v37 = vsel %vm3056_vm7, %v3187_v14, %v3179_v8  ;;  %v3195_v0 = vrot.slane %v3184_v29, 3  ;;  %v3455_v36 = vld [vmem:[#allocation5 + $0x17] sm:$0x1] }
 0x376   :  { %v3073_v60 = vrot.slane %v3054_v33, 1  ;;  %v3351_v45 = vrot.slane %v3338_v4, 1  ;;  %v3190_v24 = vsel %vm3059_vm8, %v3189_v9, %v3188_v37  ;;  %v3197_v28 = vrot.slane %v3185_v41, 2  ;;  %v3451_v33 = vld [vmem:[#allocation5 + $0x7] sm:$0x1]  ;;  %v4446_v37 = vld [vmem:[%s6078_s7 + $0x70] sm:$0xff]  }
 0x377   :  { %v3192_v6 = vsel %vm3062_vm9, %v3191_v42, %v3190_v24  ;;  %v3199_v63 = vrot.slane %v3186_v21, 1  ;;  %v3452_v4 = vld [vmem:[#allocation5 + $0xb] sm:$0x1]  ;;  %v3459_v40 = vpack.c.bf16 %v3451_v33, %v3451_v33  ;;  %v3465_v11 = vpack.c.bf16 %v3457_v55, %v3457_v55  ;;  %v4443_v44 = vld [vmem:[#allocation8 + $0xf4] ss:$8 sps:$4 sm:$0xff]   ;;  %v4458_v33 = vld [vmem:[%s6078_s7 + $0x40] sm:$0xff]  }
 0x378   :  { %v3075_v32 = vsel %vm3074_vm13, %v3073_v60, %v3072_v34  ;;  %v3352_v17 = vsel %vm3074_vm13, %v3351_v45, %v3350_v20  ;;  %v3194_v57 = vsel %vm3065_vm10, %v3193_v30, %v3192_v6  ;;  %v4434_v60 = vld [vmem:[#allocation8 + $0x124] ss:$8 sps:$4 sm:$0xff]   ;;  %v3460_v45 = vpack.c.bf16 %v3452_v4, %v3452_v4  ;;  %v3450_v20 = vld [vmem:[#allocation5 + $0x3] sm:$0x1]  ;;  %v4441_v41 = vld [vmem:[#allocation8 + $0xf0] ss:$8 sps:$4 sm:$0xff]  }
 0x379   :  { %v3076_v49 = vpack.c.b16 %v3075_v32, %v3075_v32  ;;  %v3353_v19 = vpack.c.b16 %v3352_v17, %v3352_v17  ;;  %v3196_v10 = vsel %vm3068_vm11, %v3195_v0, %v3194_v57  ;;  %v3461_v34 = vpack.c.bf16 %v3453_v38, %v3453_v38  ;;  %v4432_v32 = vld [vmem:[#allocation8 + $0x120] ss:$8 sps:$4 sm:$0xff]   ;;  %v4447_v0 = vld [vmem:[%s6078_s7 + $0x30] sm:$0xff]   ;;  %v4449_v24 = vld [vmem:[%s6078_s7 + $0x28] sm:$0xff]  }
 0x37a   :  { %v3198_v25 = vsel %vm3071_vm12, %v3197_v28, %v3196_v10  ;;  %v3463_v17 = vpack.c.bf16 %v3455_v36, %v3455_v36  ;;  %v3486_v51 = vunpack.c.l.b16 %v3459_v40  ;;  %v4444_v30 = vld [vmem:[%s6078_s7 + $0x78] sm:$0xff]   ;;  %v4450_v28 = vld [vmem:[%s6078_s7 + $0x60] sm:$0xff]   ;;  %v4455_v10 = vld [vmem:[%s6078_s7 + $0x10] sm:$0xff]   ;;  %v3606_v55 = vlaneseq }
 0x37b   :  { %4106 = vmatmul.mubr.msk.bf16.vlgmr.msra.gmra.mxu1 %vm2906_vm5, %v3076_v49  ;;  %4128 = vmatmul.mubr.msk.bf16.vlgmr.msra.gmra.mxu0 %vm2906_vm5, %v3353_v19  ;;  %v3200_v13 = vsel %vm3074_vm13, %v3199_v63, %v3198_v25  ;;  %v3464_v49 = vpack.c.bf16 %v3456_v35, %v3456_v35  ;;  %v3487_v19 = vunpack.c.l.b16 %v3460_v45  ;;  %v3488_v50 = vunpack.c.l.b16 %v3461_v34  ;;  %v4451_v6 = vld [vmem:[%s6078_s7 + $0x20] sm:$0xff]   ;;  %v4452_v63 = vld [vmem:[%s6078_s7 + $0x58] sm:$0xff]   ;;  %v4456_v25 = vld [vmem:[%s6078_s7 + $0x48] sm:$0xff]  }
 0x37c   :  { %3262 = vmatpush1.bf16.msra.mxu1 %v4414_v5  ;;  %3287 = vmatprep.mubr.bf16.mxu1 %v6164_v18  ;;  %v3201_v58 = vpack.c.b16 %v3200_v13, %v3200_v13  ;;  %v3462_v5 = vpack.c.bf16 %v3454_v54, %v3454_v54  ;;  %v3490_v3 = vunpack.c.l.b16 %v3463_v17  ;;  %v3493_v53 = vrot.slane %v3486_v51, 7  ;;  %v4453_v57 = vld [vmem:[%s6078_s7 + $0x18] sm:$0xff]   ;;  %v4459_v13 = vld [vmem:[%s6078_s7] sm:$0xff]  }
 0x37d   :  { %3263 = vmatprep.subr.bf16.mxu1 %v4419_v27  ;;  %v3458_v27 = vpack.c.bf16 %v3450_v20, %v3450_v20  ;;  %v3495_v56 = vrot.slane %v3487_v19, 6  ;;  %4157 = vmatprep.subr.bf16.mxu0 %v4444_v30  ;;  %v3604_v51 = vld [vmem:[%s6077_s6] sm:$0x3] }
 0x37e   :  { %v3489_v62 = vunpack.c.l.b16 %v3462_v5  ;;  %v3501_v16 = vrot.slane %v3490_v3, 3  ;;  %v3607_v5 = vshrl.u32 %v3606_v55, 7 }
 0x37f   :  { %v3485_v39 = vunpack.c.l.b16 %v3458_v27 }
 0x380   :  { %3264 = vmatpush1.bf16.msra.mxu1 %v4417_v43  ;;  %v3491_v43 = vunpack.c.l.b16 %v3464_v49  ;;  %v3499_v47 = vrot.slane %v3489_v62, 4  ;;  %v3608_v17 = vsub.s32 0, %v3607_v5  ;;  %v3612_v49 = vsub.s32 1, %v3607_v5 }
 0x381   :  { %3265 = vmatprep.subr.bf16.mxu1 %v4422_v22  ;;  %v3497_v22 = vrot.slane %v3488_v50, 5  ;;  %v3494_v7 = vsel %vm3056_vm7, %v3493_v53, %v3485_v39 }
 0x382   :  { %v3496_v1 = vsel %vm3059_vm8, %v3495_v56, %v3494_v7  ;;  %v3609_v27 = vrot.slane %v3604_v51, %v3608_v17 }
 0x383   :  { %v3498_v29 = vsel %vm3062_vm9, %v3497_v22, %v3496_v1 }
 0x384   :  { %3266 = vmatpush1.bf16.msra.mxu1 %v4420_v2  ;;  %v3503_v2 = vrot.slane %v3491_v43, 2 }
 0x385   :  { %3267 = vmatprep.subr.bf16.mxu1 %v4425_v46  ;;  %v3500_v46 = vsel %vm3065_vm10, %v3499_v47, %v3498_v29 }
 0x386   :  { %v3502_v9 = vsel %vm3068_vm11, %v3501_v16, %v3500_v46  ;;  %v4140_v16 = vld [vmem:[%s6079_s8] ss:$0 sm:$0xff] }
 0x387   :  { %v3504_v8 = vsel %vm3071_vm12, %v3503_v2, %v3502_v9 }
 0x388   :  { %3268 = vmatpush1.bf16.msra.mxu1 %v4423_v12  ;;  %v4445_v12 = vld [vmem:[%s6078_s7 + $0x38] sm:$0xff]  }
 0x389   :  { %3269 = vmatprep.subr.bf16.mxu1 %v4428_v26  ;;  %4158 = vmatpush3.bf16.msra.mxu0 %v4445_v12  ;;  %v4448_v26 = vld [vmem:[%s6078_s7 + $0x68] sm:$0xff]  }
 0x38a   :  { %4159 = vmatprep.subr.bf16.mxu0 %v4446_v37 }
 0x38c   :  { %3270 = vmatpush1.bf16.msra.mxu1 %v4426_v61  ;;  %v4454_v61 = vld [vmem:[%s6078_s7 + $0x50] sm:$0xff]  }
 0x38d   :  { %3567 = vmatprep.subr.bf16.mxu1 %v4431_v48  ;;  %4160 = vmatpush3.bf16.msra.mxu0 %v4447_v0  ;;  %v4457_v48 = vld [vmem:[%s6078_s7 + $0x8] sm:$0xff]  }
 0x38e   :  { %4161 = vmatprep.subr.bf16.mxu0 %v4448_v26 }
 0x38f   :  { %4117 = vmatmul.mubr.msk.bf16.vlgmr.msra.gmra.mxu1 %vm2906_vm5, %v3201_v58 }
 0x390   :  { %3568 = vmatpush1.bf16.msra.mxu1 %v4429_v15  ;;  %3593 = vmatprep.mubr.bf16.mxu1 %v6164_v18  ;;  %v3492_v18 = vunpack.c.l.b16 %v3465_v11 }
 0x391   :  { %3569 = vmatprep.subr.bf16.mxu1 %v4434_v60  ;;  %4162 = vmatpush3.bf16.msra.mxu0 %v4449_v24 }
 0x392   :  { %v3505_v14 = vrot.slane %v3492_v18, 1  ;;  %4163 = vmatprep.subr.bf16.mxu0 %v4450_v28 }
 0x394   :  { %3570 = vmatpush1.bf16.msra.mxu1 %v4432_v32  ;;  %v3506_v21 = vsel %vm3074_vm13, %v3505_v14, %v3504_v8 }
 0x395   :  { %3571 = vmatprep.subr.bf16.mxu1 %v4437_v23  ;;  %v3507_v42 = vpack.c.b16 %v3506_v21, %v3506_v21  ;;  %4164 = vmatpush3.bf16.msra.mxu0 %v4451_v6 }
 0x396   :  { %4165 = vmatprep.subr.bf16.mxu0 %v4452_v63 }
 0x398   :  { %3572 = vmatpush1.bf16.msra.mxu1 %v4435_v59  ;;  %v3613_v59 = vrot.slane %v3604_v51, %v3612_v49 }
 0x399   :  { %3573 = vmatprep.subr.bf16.mxu1 %v4440_v31  ;;  %4166 = vmatpush3.bf16.msra.mxu0 %v4453_v57 }
 0x39a   :  { %4167 = vmatprep.subr.bf16.mxu0 %v4454_v61 }
 0x39c   :  { %3574 = vmatpush1.bf16.msra.mxu1 %v4438_v52 }
 0x39d   :  { %3575 = vmatprep.subr.bf16.mxu1 %v4443_v44  ;;  %4168 = vmatpush3.bf16.msra.mxu0 %v4455_v10 }
 0x39e   :  { %4169 = vmatprep.subr.bf16.mxu0 %v4456_v25 }
 0x3a0   :  { %3576 = vmatpush1.bf16.msra.mxu1 %v4441_v41 }
 0x3a1   :  { %4170 = vmatpush3.bf16.msra.mxu0 %v4457_v48 }
 0x3a2   :  { %4171 = vmatprep.subr.bf16.mxu0 %v4458_v33 }
 0x3a3   :  { %4139 = vmatmul.mubr.msk.bf16.vlgmr.msra.gmra.mxu1 %vm2906_vm5, %v3507_v42 }
 0x3a5   :  { %4172 = vmatpush3.bf16.msra.mxu0 %v4459_v13 }
 0x43b   :  { %v3164_v4 = vpop.f32.mrf.mxu1  ;;  %v3441_v38 = vpop.f32.mrf.mxu0 }
 0x43d   :  { %v3166_v15 = vpop.f32.mrf.mxu1  ;;  %v3443_v54 = vpop.f32.mrf.mxu0 }
 0x43f   :  { %v3168_v40 = vpop.f32.mrf.mxu1  ;;  %v3445_v58 = vpop.f32.mrf.mxu0 }
 0x441   :  { %v3169_v60 = vpop.f32.mrf.mxu1  ;;  %v3446_v36 = vpop.f32.mrf.mxu0 }
 0x44f   :  { %v3289_v45 = vpop.f32.mrf.mxu1 }
 0x450   :  { %v3290_v32 = vadd.f32 %v3289_v45, %v3164_v4 }
 0x451   :  { %v3291_v35 = vpop.f32.mrf.mxu1 }
 0x452   :  { %v3292_v23 = vadd.f32 %v3291_v35, %v3166_v15  ;;  %v3448_v19 = vadd.f32 %v3441_v38, %v3290_v32 }
 0x453   :  { %v3293_v34 = vpop.f32.mrf.mxu1 }
 0x454   :  { %v3449_v62 = vadd.f32 %v3443_v54, %v3292_v23 }
 0x455   :  { %v3294_v20 = vpop.f32.mrf.mxu1 }
 0x463   :  { %v3595_v11 = vpop.f32.mrf.mxu1 }
 0x464   :  { %v3602_v50 = vadd.f32 %v3595_v11, %v3448_v19 }
 0x465   :  { %v3597_v3 = vpop.f32.mrf.mxu1 }
 0x466   :  { %v3616_v53 = vadd.f32 %v3609_v27, %v3602_v50  ;;  %v3603_v31 = vadd.f32 %v3597_v3, %v3449_v62 }
 0x467   :  { %v3599_v43 = vpop.f32.mrf.mxu1 }
 0x468   :  { %v3617_v56 = vadd.f32 %v3613_v59, %v3603_v31  ;;  %v3618_v39 = vmax.f32 %v3616_v53, 0.0 }
 0x469   :  { %v3600_v18 = vpop.f32.mrf.mxu1 }
 0x46a   :  { %v3619_v22 = vmax.f32 %v3617_v56, 0.0  ;;  %v3620_v52 = vpack.c.bf16 %v3618_v39, %v3618_v39 }
 0x46c   :  { %v3621_v47 = vpack.c.bf16 %v3619_v22, %v3619_v22 }
 0x46e   :  { %3789 = vmatprep.mubr.bf16.mxu0 %v3621_v47 }
 0x46f   :  { %3790 = vmatmul.mubr.bf16.vlgmr.msra.gmra.mxu0 %v3620_v52 }
 0x52f   :  { %v4173_v7 = vpop.f32.mrf.mxu0 }
 0x531   :  { %v4174_v44 = vpop.f32.mrf.mxu0 }
 0x532   :  { %v4175_v1 = vadd.f32 %v4174_v44, %v4173_v7 }
 0x533   :  { %v4176_v2 = vpop.f32.mrf.mxu0 }
 0x534   :  { %v3792_v29 = vadd.f32 %v4175_v1, %v4140_v16 }
 0x535   :  { %v4177_v14 = vpop.f32.mrf.mxu0 }
 0x536   :  { %3797 = vst [vmem:[%s6080_s9] sm:$0xff] %v3792_v29 }
 0x537   :  { %3802 = vsyncpa [#allocation7], 1 }
 0x538   :  { %3803 = vsyncpa [#allocation9], 1 }

</bundles_post_ra>
